<compile_context>
chip_gen: v7x
topology: tpu7x:2x2x1
jax: 0.10.0
libtpu: 0.0.40
codegen_flags: <defaults>
</compile_context>

<pallas_src>
import math

import jax
import jax.numpy as jnp
from jax import lax
from jax.experimental import pallas as pl
from jax.experimental.pallas import tpu as pltpu

# ---------------- model configuration (small, consistent with the module) ---
BS         = 2
INPUT_DIM  = 4
SEQ_LEN    = 8          # q_len
MODEL_DIM  = 32
N_HEADS    = 4
D_K        = MODEL_DIM // N_HEADS   # 8
D_V        = MODEL_DIM // N_HEADS   # 8
D_FF       = 64
N_LAYERS   = 2
OUTPUT_DIM = 3
BN_EPS     = 1e-5

_INV_SQRT_DK = 1.0 / math.sqrt(D_K)


def _gelu(x):
    # exact (erf-based) GELU, matching torch.nn.GELU default
    return 0.5 * x * (1.0 + lax.erf(x * 0.7071067811865476))


def _bf16(x):
    return x.astype(jnp.bfloat16)


# ---------------------------------------------------------------------------
# Fused forward kernel: input projection + N_LAYERS encoder layers + head.
# All inputs are whole-array VMEM blocks (total params ~30 KB, activations
# ~2 KB -> trivially VMEM resident on v5e/v6e/v7x).
# ---------------------------------------------------------------------------
def fused_tst_kernel(x_ref, wp_ref, posb_ref,
                     wq_ref, wk_ref, wv_ref, wo_ref, bn_ref,
                     ffw1_ref, ffb1_ref, ffw2_ref, ffb2_ref,
                     wh_ref, bh_ref, out_ref):
    # ---- input projection + positional embedding -----------------------
    # x is NCL (bs, input_dim, q); transpose once in-kernel (tiny 2-D .T).
    wp = wp_ref[...]                        # (din, dm)  f32
    posb = posb_ref[...]                    # (q, dm)    f32  (= b_P + W_pos)
    rows = []
    for b in range(BS):                     # static unroll, BS = 2
        xb_t = x_ref[b].T                   # (q, din)
        rows.append(jnp.dot(xb_t, wp, preferred_element_type=jnp.float32) + posb)
    src = jnp.concatenate(rows, axis=0)     # (bs*q, dm) f32  -- batch in sublanes

    # ---- encoder layers (static unroll over N_LAYERS) -------------------
    for l in range(N_LAYERS):
        src_b = _bf16(src)                                   # (bs*q, dm) bf16
        attn_out = jnp.zeros((BS * SEQ_LEN, MODEL_DIM), jnp.float32)

        # Multi-head self attention: per-head weight tensors (no lane
        # slicing), bs-batched einsums, output projection accumulated over
        # heads (mathematically identical to concat -> W_O).
        for h in range(N_HEADS):                             # static unroll
            qh = jnp.dot(src_b, wq_ref[l, h], preferred_element_type=jnp.float32)
            kh = jnp.dot(src_b, wk_ref[l, h], preferred_element_type=jnp.float32)
            vh = jnp.dot(src_b, wv_ref[l, h], preferred_element_type=jnp.float32)
            qh3 = qh.reshape(BS, SEQ_LEN, D_K)
            kh3 = kh.reshape(BS, SEQ_LEN, D_K)
            vh3 = vh.reshape(BS, SEQ_LEN, D_V)

            s = jnp.einsum('bqd,bkd->bqk', _bf16(qh3), _bf16(kh3),
                           preferred_element_type=jnp.float32) * _INV_SQRT_DK
            s = s - jnp.max(s, axis=-1, keepdims=True)
            e = jnp.exp(s)
            inv_den = pl.reciprocal(jnp.sum(e, axis=-1, keepdims=True),
                                    approx=True)
            attn = e * inv_den                               # softmax

            ctx = jnp.einsum('bqk,bkd->bqd', _bf16(attn), _bf16(vh3),
                             preferred_element_type=jnp.float32)
            attn_out = attn_out + jnp.dot(
                _bf16(ctx.reshape(BS * SEQ_LEN, D_V)), wo_ref[l, h],
                preferred_element_type=jnp.float32)

        x1 = src + attn_out                                  # residual (dropout = id)

        # BatchNorm1d (eval), pre-folded to per-channel affine on host.
        bn = bn_ref[l]                                       # (4, dm): [s1, b1, s2, b2]
        x1 = x1 * bn[0:1, :] + bn[1:2, :]

        # Feed-forward: Linear -> GELU -> Linear
        h1 = jnp.dot(_bf16(x1), ffw1_ref[l],
                     preferred_element_type=jnp.float32) + ffb1_ref[l]
        h1 = _gelu(h1)
        y = jnp.dot(_bf16(h1), ffw2_ref[l],
                    preferred_element_type=jnp.float32) + ffb2_ref[l]

        x1 = x1 + y                                          # residual (dropout = id)
        src = x1 * bn[2:3, :] + bn[3:4, :]                   # second BN (folded)

    # ---- head: GELU -> Flatten -> Linear --------------------------------
    # W_head rows were pre-permuted at init to (q, dm, out), so we contract
    # per timestep against the naturally (bs, q, dm)-ordered activations.
    gz = _gelu(src).reshape(BS, SEQ_LEN, MODEL_DIM)          # (bs, q, dm)
    acc = jnp.zeros((BS, OUTPUT_DIM), jnp.float32)
    for t in range(SEQ_LEN):                                 # static unroll, q = 8
        acc = acc + jnp.dot(_bf16(gz[:, t, :]), wh_ref[t],
                            preferred_element_type=jnp.float32)
    out_ref[...] = acc + bh_ref[...]


# ---------------------------------------------------------------------------
# Wrapper: single pallas_call, no grid, everything in VMEM.
# ---------------------------------------------------------------------------
def tst_forward(x, params):
    inputs = (x,
              params["W_P"], params["posb"],
              params["w_q"], params["w_k"], params["w_v"], params["w_o"],
              params["bn"],
              params["ff_w1"], params["ff_b1"], params["ff_w2"], params["ff_b2"],
              params["W_head"], params["b_head"])
    vmem_spec = pl.BlockSpec(memory_space=pltpu.MemorySpace.VMEM)
    return pl.pallas_call(
        fused_tst_kernel,
        out_shape=jax.ShapeDtypeStruct((BS, OUTPUT_DIM), jnp.float32),
        in_specs=[vmem_spec] * len(inputs),
        out_specs=vmem_spec,
    )(*inputs)


# ---------------------------------------------------------------------------
# Deterministic parameter initialization (synthetic, PyTorch-like bounds),
# repacked into kernel-ready layouts:
#   * QKV/O weights head-major: (L, H, dm, d_k) / (L, H, d_v, dm), bf16
#   * BN folded to (scale, shift) pairs: (L, 4, dm) = [s1, b1, s2, b2], f32
#   * W_P bias folded into positional term: posb = b_P + W_pos
#   * Head weight permuted from (dm*q)-major Flatten order to (q, dm, out)
# ---------------------------------------------------------------------------
def init_params(key):
    keys = jax.random.split(key, 96)
    ki = iter(keys)

    def unif(shape, bound):
        return jax.random.uniform(next(ki), shape, jnp.float32, -bound, bound)

    def bn_affine():
        gamma = jax.random.uniform(next(ki), (1, MODEL_DIM), jnp.float32, 0.5, 1.5)
        beta = jax.random.uniform(next(ki), (1, MODEL_DIM), jnp.float32, -0.1, 0.1)
        rmean = jax.random.uniform(next(ki), (1, MODEL_DIM), jnp.float32, -0.1, 0.1)
        rvar = jax.random.uniform(next(ki), (1, MODEL_DIM), jnp.float32, 0.5, 1.5)
        scale = gamma * lax.rsqrt(rvar + BN_EPS)     # eval-mode BN folded
        shift = beta - rmean * scale
        return scale, shift

    params = {}
    b_in = 1.0 / math.sqrt(INPUT_DIM)
    params["W_P"] = unif((INPUT_DIM, MODEL_DIM), b_in)
    b_p = unif((1, MODEL_DIM), b_in)
    w_pos = jax.random.uniform(next(ki), (SEQ_LEN, MODEL_DIM), jnp.float32,
                               -0.02, 0.02)
    params["posb"] = w_pos + b_p                      # fold Linear bias into pos term

    b_dm = 1.0 / math.sqrt(MODEL_DIM)
    wq_l, wk_l, wv_l, wo_l, bn_l = [], [], [], [], []
    ffw1_l, ffb1_l, ffw2_l, ffb2_l = [], [], [], []
    for _ in range(N_LAYERS):
        # torch-layout (dm, H*d_k) projections, repacked head-major (H, dm, d_k)
        wq = unif((MODEL_DIM, N_HEADS * D_K), b_dm).reshape(MODEL_DIM, N_HEADS, D_K)
        wk = unif((MODEL_DIM, N_HEADS * D_K), b_dm).reshape(MODEL_DIM, N_HEADS, D_K)
        wv = unif((MODEL_DIM, N_HEADS * D_V), b_dm).reshape(MODEL_DIM, N_HEADS, D_V)
        wo = unif((N_HEADS * D_V, MODEL_DIM),
                  1.0 / math.sqrt(N_HEADS * D_V)).reshape(N_HEADS, D_V, MODEL_DIM)
        wq_l.append(jnp.transpose(wq, (1, 0, 2)))
        wk_l.append(jnp.transpose(wk, (1, 0, 2)))
        wv_l.append(jnp.transpose(wv, (1, 0, 2)))
        wo_l.append(wo)

        s1, sh1 = bn_affine()
        s2, sh2 = bn_affine()
        bn_l.append(jnp.concatenate([s1, sh1, s2, sh2], axis=0))   # (4, dm)

        ffw1_l.append(unif((MODEL_DIM, D_FF), b_dm))
        ffb1_l.append(unif((1, D_FF), b_dm))
        ffw2_l.append(unif((D_FF, MODEL_DIM), 1.0 / math.sqrt(D_FF)))
        ffb2_l.append(unif((1, MODEL_DIM), 1.0 / math.sqrt(D_FF)))

    params["w_q"] = jnp.stack(wq_l).astype(jnp.bfloat16)    # (L, H, dm, dk)
    params["w_k"] = jnp.stack(wk_l).astype(jnp.bfloat16)
    params["w_v"] = jnp.stack(wv_l).astype(jnp.bfloat16)
    params["w_o"] = jnp.stack(wo_l).astype(jnp.bfloat16)    # (L, H, dv, dm)
    params["bn"] = jnp.stack(bn_l)                          # (L, 4, dm) f32
    params["ff_w1"] = jnp.stack(ffw1_l).astype(jnp.bfloat16)  # (L, dm, dff)
    params["ff_b1"] = jnp.stack(ffb1_l)                       # (L, 1, dff) f32
    params["ff_w2"] = jnp.stack(ffw2_l).astype(jnp.bfloat16)  # (L, dff, dm)
    params["ff_b2"] = jnp.stack(ffb2_l)                       # (L, 1, dm) f32

    # Head: rows of W_head follow the Flatten order of (model_dim, q_len),
    # i.e. feature f = m * q_len + t.  Permute once at init to (q, dm, out)
    # so the kernel's (b, q, dm)-ordered activations feed it directly.
    nf = MODEL_DIM * SEQ_LEN
    b_h = 1.0 / math.sqrt(nf)
    w_head = unif((nf, OUTPUT_DIM), b_h).reshape(MODEL_DIM, SEQ_LEN, OUTPUT_DIM)
    params["W_head"] = jnp.transpose(w_head, (1, 0, 2)).astype(jnp.bfloat16)
    params["b_head"] = unif((1, OUTPUT_DIM), b_h)
    return params


if __name__ == "__main__":
    key = jax.random.PRNGKey(0)
    k_param, k_x = jax.random.split(key)
    params = init_params(k_param)
    x = jax.random.normal(k_x, (BS, INPUT_DIM, SEQ_LEN), jnp.float32)

    out = tst_forward(x, params)
    out = jax.block_until_ready(out)
    assert out.shape == (BS, OUTPUT_DIM), out.shape
    assert bool(jnp.all(jnp.isfinite(out)))
    print("KERNEL_OK")
</pallas_src>

<mosaic_0001>
module attributes {stable_mosaic.version = 11 : i64} {
  func.func @fused_tst_kernel(%arg0: memref<2x4x8xf32, #tpu.memory_space<vmem>>, %arg1: memref<4x32xf32, #tpu.memory_space<vmem>>, %arg2: memref<8x32xf32, #tpu.memory_space<vmem>>, %arg3: memref<2x4x32x8xbf16, #tpu.memory_space<vmem>>, %arg4: memref<2x4x32x8xbf16, #tpu.memory_space<vmem>>, %arg5: memref<2x4x32x8xbf16, #tpu.memory_space<vmem>>, %arg6: memref<2x4x8x32xbf16, #tpu.memory_space<vmem>>, %arg7: memref<2x4x32xf32, #tpu.memory_space<vmem>>, %arg8: memref<2x32x64xbf16, #tpu.memory_space<vmem>>, %arg9: memref<2x1x64xf32, #tpu.memory_space<vmem>>, %arg10: memref<2x64x32xbf16, #tpu.memory_space<vmem>>, %arg11: memref<2x1x32xf32, #tpu.memory_space<vmem>>, %arg12: memref<8x32x3xbf16, #tpu.memory_space<vmem>>, %arg13: memref<1x3xf32, #tpu.memory_space<vmem>>, %arg14: memref<2x3xf32, #tpu.memory_space<vmem>>) attributes {dimension_semantics = [], scalar_prefetch = 0 : i64, scratch_operands = 0 : i64, tpu.core_type = #tpu.core_type<tc>} {
    %c0 = arith.constant 0 : index
    %c0_0 = arith.constant 0 : index
    %0 = vector.load %arg1[%c0, %c0_0] : memref<4x32xf32, #tpu.memory_space<vmem>>, vector<4x32xf32>
    %c0_1 = arith.constant 0 : index
    %c0_2 = arith.constant 0 : index
    %1 = vector.load %arg2[%c0_1, %c0_2] : memref<8x32xf32, #tpu.memory_space<vmem>>, vector<8x32xf32>
    %c0_3 = arith.constant 0 : index
    %c0_4 = arith.constant 0 : index
    %c0_5 = arith.constant 0 : index
    %2 = vector.load %arg0[%c0_3, %c0_4, %c0_5] : memref<2x4x8xf32, #tpu.memory_space<vmem>>, vector<1x4x8xf32>
    %3 = vector.shape_cast %2 : vector<1x4x8xf32> to vector<4x8xf32>
    %4 = tpu.transpose %3, [1, 0] : vector<4x8xf32> -> vector<8x4xf32>
    %cst = arith.constant dense<0.000000e+00> : vector<8x32xf32>
    %5 = tpu.matmul %4, %0, %cst {dimension_numbers = #tpu.dot_dimension_numbers<[1], [0], [0], [1], [0, 0, 1, 1], [], []>} : vector<8x4xf32>, vector<4x32xf32>, vector<8x32xf32> -> vector<8x32xf32>
    %6 = arith.addf %5, %1 : vector<8x32xf32>
    %c1 = arith.constant 1 : index
    %c0_6 = arith.constant 0 : index
    %c0_7 = arith.constant 0 : index
    %7 = vector.load %arg0[%c1, %c0_6, %c0_7] : memref<2x4x8xf32, #tpu.memory_space<vmem>>, vector<1x4x8xf32>
    %8 = vector.shape_cast %7 : vector<1x4x8xf32> to vector<4x8xf32>
    %9 = tpu.transpose %8, [1, 0] : vector<4x8xf32> -> vector<8x4xf32>
    %cst_8 = arith.constant dense<0.000000e+00> : vector<8x32xf32>
    %10 = tpu.matmul %9, %0, %cst_8 {dimension_numbers = #tpu.dot_dimension_numbers<[1], [0], [0], [1], [0, 0, 1, 1], [], []>} : vector<8x4xf32>, vector<4x32xf32>, vector<8x32xf32> -> vector<8x32xf32>
    %11 = arith.addf %10, %1 : vector<8x32xf32>
    %12 = tpu.concatenate %6, %11 in 0 : vector<8x32xf32>, vector<8x32xf32> -> vector<16x32xf32>
    %13 = arith.truncf %12 : vector<16x32xf32> to vector<16x32xbf16>
    %cst_9 = arith.constant 0.000000e+00 : f32
    %14 = vector.broadcast %cst_9 : f32 to vector<16x32xf32>
    %c0_10 = arith.constant 0 : index
    %c0_11 = arith.constant 0 : index
    %c0_12 = arith.constant 0 : index
    %c0_13 = arith.constant 0 : index
    %15 = vector.load %arg3[%c0_10, %c0_11, %c0_12, %c0_13] : memref<2x4x32x8xbf16, #tpu.memory_space<vmem>>, vector<1x1x32x8xbf16>
    %16 = vector.shape_cast %15 : vector<1x1x32x8xbf16> to vector<32x8xbf16>
    %cst_14 = arith.constant dense<0.000000e+00> : vector<16x8xf32>
    %17 = tpu.matmul %13, %16, %cst_14 {dimension_numbers = #tpu.dot_dimension_numbers<[1], [0], [0], [1], [0, 0, 1, 1], [], []>} : vector<16x32xbf16>, vector<32x8xbf16>, vector<16x8xf32> -> vector<16x8xf32>
    %c0_15 = arith.constant 0 : index
    %c0_16 = arith.constant 0 : index
    %c0_17 = arith.constant 0 : index
    %c0_18 = arith.constant 0 : index
    %18 = vector.load %arg4[%c0_15, %c0_16, %c0_17, %c0_18] : memref<2x4x32x8xbf16, #tpu.memory_space<vmem>>, vector<1x1x32x8xbf16>
    %19 = vector.shape_cast %18 : vector<1x1x32x8xbf16> to vector<32x8xbf16>
    %cst_19 = arith.constant dense<0.000000e+00> : vector<16x8xf32>
    %20 = tpu.matmul %13, %19, %cst_19 {dimension_numbers = #tpu.dot_dimension_numbers<[1], [0], [0], [1], [0, 0, 1, 1], [], []>} : vector<16x32xbf16>, vector<32x8xbf16>, vector<16x8xf32> -> vector<16x8xf32>
    %c0_20 = arith.constant 0 : index
    %c0_21 = arith.constant 0 : index
    %c0_22 = arith.constant 0 : index
    %c0_23 = arith.constant 0 : index
    %21 = vector.load %arg5[%c0_20, %c0_21, %c0_22, %c0_23] : memref<2x4x32x8xbf16, #tpu.memory_space<vmem>>, vector<1x1x32x8xbf16>
    %22 = vector.shape_cast %21 : vector<1x1x32x8xbf16> to vector<32x8xbf16>
    %cst_24 = arith.constant dense<0.000000e+00> : vector<16x8xf32>
    %23 = tpu.matmul %13, %22, %cst_24 {dimension_numbers = #tpu.dot_dimension_numbers<[1], [0], [0], [1], [0, 0, 1, 1], [], []>} : vector<16x32xbf16>, vector<32x8xbf16>, vector<16x8xf32> -> vector<16x8xf32>
    %24 = vector.shape_cast %17 : vector<16x8xf32> to vector<2x8x8xf32>
    %25 = vector.shape_cast %20 : vector<16x8xf32> to vector<2x8x8xf32>
    %26 = vector.shape_cast %23 : vector<16x8xf32> to vector<2x8x8xf32>
    %27 = arith.truncf %24 : vector<2x8x8xf32> to vector<2x8x8xbf16>
    %28 = arith.truncf %25 : vector<2x8x8xf32> to vector<2x8x8xbf16>
    "tpu.trace_start"() <{level = 10 : i32, message = "bqd,bkd->bqk"}> : () -> ()
    %cst_25 = arith.constant dense<0.000000e+00> : vector<2x8x8xf32>
    %29 = tpu.matmul %27, %28, %cst_25 {dimension_numbers = #tpu.dot_dimension_numbers<[2], [2], [1], [1], [0, 0, 0, 1, 1, 1], [0], [0]>} : vector<2x8x8xbf16>, vector<2x8x8xbf16>, vector<2x8x8xf32> -> vector<2x8x8xf32>
    "tpu.trace_stop"() : () -> ()
    %cst_26 = arith.constant 0.353553385 : f32
    %30 = vector.broadcast %cst_26 : f32 to vector<2x8x8xf32>
    %31 = arith.mulf %29, %30 : vector<2x8x8xf32>
    %cst_27 = arith.constant dense<0xFF800000> : vector<2x8xf32>
    %32 = vector.multi_reduction <maximumf>, %31, %cst_27 [2] : vector<2x8x8xf32> to vector<2x8xf32>
    %33 = vector.shape_cast %32 : vector<2x8xf32> to vector<2x8x1xf32>
    %34 = vector.broadcast %33 : vector<2x8x1xf32> to vector<2x8x8xf32>
    %35 = arith.subf %31, %34 : vector<2x8x8xf32>
    %36 = math.exp %35 : vector<2x8x8xf32>
    %cst_28 = arith.constant dense<0.000000e+00> : vector<2x8xf32>
    %37 = vector.multi_reduction <add>, %36, %cst_28 [2] : vector<2x8x8xf32> to vector<2x8xf32>
    %38 = vector.shape_cast %37 : vector<2x8xf32> to vector<2x8x1xf32>
    %39 = tpu.reciprocal %38 {approx = true} : vector<2x8x1xf32> -> vector<2x8x1xf32>
    %40 = vector.broadcast %39 : vector<2x8x1xf32> to vector<2x8x8xf32>
    %41 = arith.mulf %36, %40 : vector<2x8x8xf32>
    %42 = arith.truncf %41 : vector<2x8x8xf32> to vector<2x8x8xbf16>
    %43 = arith.truncf %26 : vector<2x8x8xf32> to vector<2x8x8xbf16>
    "tpu.trace_start"() <{level = 10 : i32, message = "bqk,bkd->bqd"}> : () -> ()
    %cst_29 = arith.constant dense<0.000000e+00> : vector<2x8x8xf32>
    %44 = tpu.matmul %42, %43, %cst_29 {dimension_numbers = #tpu.dot_dimension_numbers<[2], [1], [1], [2], [0, 0, 0, 1, 1, 2], [0], [0]>} : vector<2x8x8xbf16>, vector<2x8x8xbf16>, vector<2x8x8xf32> -> vector<2x8x8xf32>
    "tpu.trace_stop"() : () -> ()
    %45 = vector.shape_cast %44 : vector<2x8x8xf32> to vector<16x8xf32>
    %46 = arith.truncf %45 : vector<16x8xf32> to vector<16x8xbf16>
    %c0_30 = arith.constant 0 : index
    %c0_31 = arith.constant 0 : index
    %c0_32 = arith.constant 0 : index
    %c0_33 = arith.constant 0 : index
    %47 = vector.load %arg6[%c0_30, %c0_31, %c0_32, %c0_33] : memref<2x4x8x32xbf16, #tpu.memory_space<vmem>>, vector<1x1x8x32xbf16>
    %48 = vector.shape_cast %47 : vector<1x1x8x32xbf16> to vector<8x32xbf16>
    %cst_34 = arith.constant dense<0.000000e+00> : vector<16x32xf32>
    %49 = tpu.matmul %46, %48, %cst_34 {dimension_numbers = #tpu.dot_dimension_numbers<[1], [0], [0], [1], [0, 0, 1, 1], [], []>} : vector<16x8xbf16>, vector<8x32xbf16>, vector<16x32xf32> -> vector<16x32xf32>
    %50 = arith.addf %14, %49 : vector<16x32xf32>
    %c0_35 = arith.constant 0 : index
    %c1_36 = arith.constant 1 : index
    %c0_37 = arith.constant 0 : index
    %c0_38 = arith.constant 0 : index
    %51 = vector.load %arg3[%c0_35, %c1_36, %c0_37, %c0_38] : memref<2x4x32x8xbf16, #tpu.memory_space<vmem>>, vector<1x1x32x8xbf16>
    %52 = vector.shape_cast %51 : vector<1x1x32x8xbf16> to vector<32x8xbf16>
    %cst_39 = arith.constant dense<0.000000e+00> : vector<16x8xf32>
    %53 = tpu.matmul %13, %52, %cst_39 {dimension_numbers = #tpu.dot_dimension_numbers<[1], [0], [0], [1], [0, 0, 1, 1], [], []>} : vector<16x32xbf16>, vector<32x8xbf16>, vector<16x8xf32> -> vector<16x8xf32>
    %c0_40 = arith.constant 0 : index
    %c1_41 = arith.constant 1 : index
    %c0_42 = arith.constant 0 : index
    %c0_43 = arith.constant 0 : index
    %54 = vector.load %arg4[%c0_40, %c1_41, %c0_42, %c0_43] : memref<2x4x32x8xbf16, #tpu.memory_space<vmem>>, vector<1x1x32x8xbf16>
    %55 = vector.shape_cast %54 : vector<1x1x32x8xbf16> to vector<32x8xbf16>
    %cst_44 = arith.constant dense<0.000000e+00> : vector<16x8xf32>
    %56 = tpu.matmul %13, %55, %cst_44 {dimension_numbers = #tpu.dot_dimension_numbers<[1], [0], [0], [1], [0, 0, 1, 1], [], []>} : vector<16x32xbf16>, vector<32x8xbf16>, vector<16x8xf32> -> vector<16x8xf32>
    %c0_45 = arith.constant 0 : index
    %c1_46 = arith.constant 1 : index
    %c0_47 = arith.constant 0 : index
    %c0_48 = arith.constant 0 : index
    %57 = vector.load %arg5[%c0_45, %c1_46, %c0_47, %c0_48] : memref<2x4x32x8xbf16, #tpu.memory_space<vmem>>, vector<1x1x32x8xbf16>
    %58 = vector.shape_cast %57 : vector<1x1x32x8xbf16> to vector<32x8xbf16>
    %cst_49 = arith.constant dense<0.000000e+00> : vector<16x8xf32>
    %59 = tpu.matmul %13, %58, %cst_49 {dimension_numbers = #tpu.dot_dimension_numbers<[1], [0], [0], [1], [0, 0, 1, 1], [], []>} : vector<16x32xbf16>, vector<32x8xbf16>, vector<16x8xf32> -> vector<16x8xf32>
    %60 = vector.shape_cast %53 : vector<16x8xf32> to vector<2x8x8xf32>
    %61 = vector.shape_cast %56 : vector<16x8xf32> to vector<2x8x8xf32>
    %62 = vector.shape_cast %59 : vector<16x8xf32> to vector<2x8x8xf32>
    %63 = arith.truncf %60 : vector<2x8x8xf32> to vector<2x8x8xbf16>
    %64 = arith.truncf %61 : vector<2x8x8xf32> to vector<2x8x8xbf16>
    "tpu.trace_start"() <{level = 10 : i32, message = "bqd,bkd->bqk"}> : () -> ()
    %cst_50 = arith.constant dense<0.000000e+00> : vector<2x8x8xf32>
    %65 = tpu.matmul %63, %64, %cst_50 {dimension_numbers = #tpu.dot_dimension_numbers<[2], [2], [1], [1], [0, 0, 0, 1, 1, 1], [0], [0]>} : vector<2x8x8xbf16>, vector<2x8x8xbf16>, vector<2x8x8xf32> -> vector<2x8x8xf32>
    "tpu.trace_stop"() : () -> ()
    %cst_51 = arith.constant 0.353553385 : f32
    %66 = vector.broadcast %cst_51 : f32 to vector<2x8x8xf32>
    %67 = arith.mulf %65, %66 : vector<2x8x8xf32>
    %cst_52 = arith.constant dense<0xFF800000> : vector<2x8xf32>
    %68 = vector.multi_reduction <maximumf>, %67, %cst_52 [2] : vector<2x8x8xf32> to vector<2x8xf32>
    %69 = vector.shape_cast %68 : vector<2x8xf32> to vector<2x8x1xf32>
    %70 = vector.broadcast %69 : vector<2x8x1xf32> to vector<2x8x8xf32>
    %71 = arith.subf %67, %70 : vector<2x8x8xf32>
    %72 = math.exp %71 : vector<2x8x8xf32>
    %cst_53 = arith.constant dense<0.000000e+00> : vector<2x8xf32>
    %73 = vector.multi_reduction <add>, %72, %cst_53 [2] : vector<2x8x8xf32> to vector<2x8xf32>
    %74 = vector.shape_cast %73 : vector<2x8xf32> to vector<2x8x1xf32>
    %75 = tpu.reciprocal %74 {approx = true} : vector<2x8x1xf32> -> vector<2x8x1xf32>
    %76 = vector.broadcast %75 : vector<2x8x1xf32> to vector<2x8x8xf32>
    %77 = arith.mulf %72, %76 : vector<2x8x8xf32>
    %78 = arith.truncf %77 : vector<2x8x8xf32> to vector<2x8x8xbf16>
    %79 = arith.truncf %62 : vector<2x8x8xf32> to vector<2x8x8xbf16>
    "tpu.trace_start"() <{level = 10 : i32, message = "bqk,bkd->bqd"}> : () -> ()
    %cst_54 = arith.constant dense<0.000000e+00> : vector<2x8x8xf32>
    %80 = tpu.matmul %78, %79, %cst_54 {dimension_numbers = #tpu.dot_dimension_numbers<[2], [1], [1], [2], [0, 0, 0, 1, 1, 2], [0], [0]>} : vector<2x8x8xbf16>, vector<2x8x8xbf16>, vector<2x8x8xf32> -> vector<2x8x8xf32>
    "tpu.trace_stop"() : () -> ()
    %81 = vector.shape_cast %80 : vector<2x8x8xf32> to vector<16x8xf32>
    %82 = arith.truncf %81 : vector<16x8xf32> to vector<16x8xbf16>
    %c0_55 = arith.constant 0 : index
    %c1_56 = arith.constant 1 : index
    %c0_57 = arith.constant 0 : index
    %c0_58 = arith.constant 0 : index
    %83 = vector.load %arg6[%c0_55, %c1_56, %c0_57, %c0_58] : memref<2x4x8x32xbf16, #tpu.memory_space<vmem>>, vector<1x1x8x32xbf16>
    %84 = vector.shape_cast %83 : vector<1x1x8x32xbf16> to vector<8x32xbf16>
    %cst_59 = arith.constant dense<0.000000e+00> : vector<16x32xf32>
    %85 = tpu.matmul %82, %84, %cst_59 {dimension_numbers = #tpu.dot_dimension_numbers<[1], [0], [0], [1], [0, 0, 1, 1], [], []>} : vector<16x8xbf16>, vector<8x32xbf16>, vector<16x32xf32> -> vector<16x32xf32>
    %86 = arith.addf %50, %85 : vector<16x32xf32>
    %c0_60 = arith.constant 0 : index
    %c2 = arith.constant 2 : index
    %c0_61 = arith.constant 0 : index
    %c0_62 = arith.constant 0 : index
    %87 = vector.load %arg3[%c0_60, %c2, %c0_61, %c0_62] : memref<2x4x32x8xbf16, #tpu.memory_space<vmem>>, vector<1x1x32x8xbf16>
    %88 = vector.shape_cast %87 : vector<1x1x32x8xbf16> to vector<32x8xbf16>
    %cst_63 = arith.constant dense<0.000000e+00> : vector<16x8xf32>
    %89 = tpu.matmul %13, %88, %cst_63 {dimension_numbers = #tpu.dot_dimension_numbers<[1], [0], [0], [1], [0, 0, 1, 1], [], []>} : vector<16x32xbf16>, vector<32x8xbf16>, vector<16x8xf32> -> vector<16x8xf32>
    %c0_64 = arith.constant 0 : index
    %c2_65 = arith.constant 2 : index
    %c0_66 = arith.constant 0 : index
    %c0_67 = arith.constant 0 : index
    %90 = vector.load %arg4[%c0_64, %c2_65, %c0_66, %c0_67] : memref<2x4x32x8xbf16, #tpu.memory_space<vmem>>, vector<1x1x32x8xbf16>
    %91 = vector.shape_cast %90 : vector<1x1x32x8xbf16> to vector<32x8xbf16>
    %cst_68 = arith.constant dense<0.000000e+00> : vector<16x8xf32>
    %92 = tpu.matmul %13, %91, %cst_68 {dimension_numbers = #tpu.dot_dimension_numbers<[1], [0], [0], [1], [0, 0, 1, 1], [], []>} : vector<16x32xbf16>, vector<32x8xbf16>, vector<16x8xf32> -> vector<16x8xf32>
    %c0_69 = arith.constant 0 : index
    %c2_70 = arith.constant 2 : index
    %c0_71 = arith.constant 0 : index
    %c0_72 = arith.constant 0 : index
    %93 = vector.load %arg5[%c0_69, %c2_70, %c0_71, %c0_72] : memref<2x4x32x8xbf16, #tpu.memory_space<vmem>>, vector<1x1x32x8xbf16>
    %94 = vector.shape_cast %93 : vector<1x1x32x8xbf16> to vector<32x8xbf16>
    %cst_73 = arith.constant dense<0.000000e+00> : vector<16x8xf32>
    %95 = tpu.matmul %13, %94, %cst_73 {dimension_numbers = #tpu.dot_dimension_numbers<[1], [0], [0], [1], [0, 0, 1, 1], [], []>} : vector<16x32xbf16>, vector<32x8xbf16>, vector<16x8xf32> -> vector<16x8xf32>
    %96 = vector.shape_cast %89 : vector<16x8xf32> to vector<2x8x8xf32>
    %97 = vector.shape_cast %92 : vector<16x8xf32> to vector<2x8x8xf32>
    %98 = vector.shape_cast %95 : vector<16x8xf32> to vector<2x8x8xf32>
    %99 = arith.truncf %96 : vector<2x8x8xf32> to vector<2x8x8xbf16>
    %100 = arith.truncf %97 : vector<2x8x8xf32> to vector<2x8x8xbf16>
    "tpu.trace_start"() <{level = 10 : i32, message = "bqd,bkd->bqk"}> : () -> ()
    %cst_74 = arith.constant dense<0.000000e+00> : vector<2x8x8xf32>
    %101 = tpu.matmul %99, %100, %cst_74 {dimension_numbers = #tpu.dot_dimension_numbers<[2], [2], [1], [1], [0, 0, 0, 1, 1, 1], [0], [0]>} : vector<2x8x8xbf16>, vector<2x8x8xbf16>, vector<2x8x8xf32> -> vector<2x8x8xf32>
    "tpu.trace_stop"() : () -> ()
    %cst_75 = arith.constant 0.353553385 : f32
    %102 = vector.broadcast %cst_75 : f32 to vector<2x8x8xf32>
    %103 = arith.mulf %101, %102 : vector<2x8x8xf32>
    %cst_76 = arith.constant dense<0xFF800000> : vector<2x8xf32>
    %104 = vector.multi_reduction <maximumf>, %103, %cst_76 [2] : vector<2x8x8xf32> to vector<2x8xf32>
    %105 = vector.shape_cast %104 : vector<2x8xf32> to vector<2x8x1xf32>
    %106 = vector.broadcast %105 : vector<2x8x1xf32> to vector<2x8x8xf32>
    %107 = arith.subf %103, %106 : vector<2x8x8xf32>
    %108 = math.exp %107 : vector<2x8x8xf32>
    %cst_77 = arith.constant dense<0.000000e+00> : vector<2x8xf32>
    %109 = vector.multi_reduction <add>, %108, %cst_77 [2] : vector<2x8x8xf32> to vector<2x8xf32>
    %110 = vector.shape_cast %109 : vector<2x8xf32> to vector<2x8x1xf32>
    %111 = tpu.reciprocal %110 {approx = true} : vector<2x8x1xf32> -> vector<2x8x1xf32>
    %112 = vector.broadcast %111 : vector<2x8x1xf32> to vector<2x8x8xf32>
    %113 = arith.mulf %108, %112 : vector<2x8x8xf32>
    %114 = arith.truncf %113 : vector<2x8x8xf32> to vector<2x8x8xbf16>
    %115 = arith.truncf %98 : vector<2x8x8xf32> to vector<2x8x8xbf16>
    "tpu.trace_start"() <{level = 10 : i32, message = "bqk,bkd->bqd"}> : () -> ()
    %cst_78 = arith.constant dense<0.000000e+00> : vector<2x8x8xf32>
    %116 = tpu.matmul %114, %115, %cst_78 {dimension_numbers = #tpu.dot_dimension_numbers<[2], [1], [1], [2], [0, 0, 0, 1, 1, 2], [0], [0]>} : vector<2x8x8xbf16>, vector<2x8x8xbf16>, vector<2x8x8xf32> -> vector<2x8x8xf32>
    "tpu.trace_stop"() : () -> ()
    %117 = vector.shape_cast %116 : vector<2x8x8xf32> to vector<16x8xf32>
    %118 = arith.truncf %117 : vector<16x8xf32> to vector<16x8xbf16>
    %c0_79 = arith.constant 0 : index
    %c2_80 = arith.constant 2 : index
    %c0_81 = arith.constant 0 : index
    %c0_82 = arith.constant 0 : index
    %119 = vector.load %arg6[%c0_79, %c2_80, %c0_81, %c0_82] : memref<2x4x8x32xbf16, #tpu.memory_space<vmem>>, vector<1x1x8x32xbf16>
    %120 = vector.shape_cast %119 : vector<1x1x8x32xbf16> to vector<8x32xbf16>
    %cst_83 = arith.constant dense<0.000000e+00> : vector<16x32xf32>
    %121 = tpu.matmul %118, %120, %cst_83 {dimension_numbers = #tpu.dot_dimension_numbers<[1], [0], [0], [1], [0, 0, 1, 1], [], []>} : vector<16x8xbf16>, vector<8x32xbf16>, vector<16x32xf32> -> vector<16x32xf32>
    %122 = arith.addf %86, %121 : vector<16x32xf32>
    %c0_84 = arith.constant 0 : index
    %c3 = arith.constant 3 : index
    %c0_85 = arith.constant 0 : index
    %c0_86 = arith.constant 0 : index
    %123 = vector.load %arg3[%c0_84, %c3, %c0_85, %c0_86] : memref<2x4x32x8xbf16, #tpu.memory_space<vmem>>, vector<1x1x32x8xbf16>
    %124 = vector.shape_cast %123 : vector<1x1x32x8xbf16> to vector<32x8xbf16>
    %cst_87 = arith.constant dense<0.000000e+00> : vector<16x8xf32>
    %125 = tpu.matmul %13, %124, %cst_87 {dimension_numbers = #tpu.dot_dimension_numbers<[1], [0], [0], [1], [0, 0, 1, 1], [], []>} : vector<16x32xbf16>, vector<32x8xbf16>, vector<16x8xf32> -> vector<16x8xf32>
    %c0_88 = arith.constant 0 : index
    %c3_89 = arith.constant 3 : index
    %c0_90 = arith.constant 0 : index
    %c0_91 = arith.constant 0 : index
    %126 = vector.load %arg4[%c0_88, %c3_89, %c0_90, %c0_91] : memref<2x4x32x8xbf16, #tpu.memory_space<vmem>>, vector<1x1x32x8xbf16>
    %127 = vector.shape_cast %126 : vector<1x1x32x8xbf16> to vector<32x8xbf16>
    %cst_92 = arith.constant dense<0.000000e+00> : vector<16x8xf32>
    %128 = tpu.matmul %13, %127, %cst_92 {dimension_numbers = #tpu.dot_dimension_numbers<[1], [0], [0], [1], [0, 0, 1, 1], [], []>} : vector<16x32xbf16>, vector<32x8xbf16>, vector<16x8xf32> -> vector<16x8xf32>
    %c0_93 = arith.constant 0 : index
    %c3_94 = arith.constant 3 : index
    %c0_95 = arith.constant 0 : index
    %c0_96 = arith.constant 0 : index
    %129 = vector.load %arg5[%c0_93, %c3_94, %c0_95, %c0_96] : memref<2x4x32x8xbf16, #tpu.memory_space<vmem>>, vector<1x1x32x8xbf16>
    %130 = vector.shape_cast %129 : vector<1x1x32x8xbf16> to vector<32x8xbf16>
    %cst_97 = arith.constant dense<0.000000e+00> : vector<16x8xf32>
    %131 = tpu.matmul %13, %130, %cst_97 {dimension_numbers = #tpu.dot_dimension_numbers<[1], [0], [0], [1], [0, 0, 1, 1], [], []>} : vector<16x32xbf16>, vector<32x8xbf16>, vector<16x8xf32> -> vector<16x8xf32>
    %132 = vector.shape_cast %125 : vector<16x8xf32> to vector<2x8x8xf32>
    %133 = vector.shape_cast %128 : vector<16x8xf32> to vector<2x8x8xf32>
    %134 = vector.shape_cast %131 : vector<16x8xf32> to vector<2x8x8xf32>
    %135 = arith.truncf %132 : vector<2x8x8xf32> to vector<2x8x8xbf16>
    %136 = arith.truncf %133 : vector<2x8x8xf32> to vector<2x8x8xbf16>
    "tpu.trace_start"() <{level = 10 : i32, message = "bqd,bkd->bqk"}> : () -> ()
    %cst_98 = arith.constant dense<0.000000e+00> : vector<2x8x8xf32>
    %137 = tpu.matmul %135, %136, %cst_98 {dimension_numbers = #tpu.dot_dimension_numbers<[2], [2], [1], [1], [0, 0, 0, 1, 1, 1], [0], [0]>} : vector<2x8x8xbf16>, vector<2x8x8xbf16>, vector<2x8x8xf32> -> vector<2x8x8xf32>
    "tpu.trace_stop"() : () -> ()
    %cst_99 = arith.constant 0.353553385 : f32
    %138 = vector.broadcast %cst_99 : f32 to vector<2x8x8xf32>
    %139 = arith.mulf %137, %138 : vector<2x8x8xf32>
    %cst_100 = arith.constant dense<0xFF800000> : vector<2x8xf32>
    %140 = vector.multi_reduction <maximumf>, %139, %cst_100 [2] : vector<2x8x8xf32> to vector<2x8xf32>
    %141 = vector.shape_cast %140 : vector<2x8xf32> to vector<2x8x1xf32>
    %142 = vector.broadcast %141 : vector<2x8x1xf32> to vector<2x8x8xf32>
    %143 = arith.subf %139, %142 : vector<2x8x8xf32>
    %144 = math.exp %143 : vector<2x8x8xf32>
    %cst_101 = arith.constant dense<0.000000e+00> : vector<2x8xf32>
    %145 = vector.multi_reduction <add>, %144, %cst_101 [2] : vector<2x8x8xf32> to vector<2x8xf32>
    %146 = vector.shape_cast %145 : vector<2x8xf32> to vector<2x8x1xf32>
    %147 = tpu.reciprocal %146 {approx = true} : vector<2x8x1xf32> -> vector<2x8x1xf32>
    %148 = vector.broadcast %147 : vector<2x8x1xf32> to vector<2x8x8xf32>
    %149 = arith.mulf %144, %148 : vector<2x8x8xf32>
    %150 = arith.truncf %149 : vector<2x8x8xf32> to vector<2x8x8xbf16>
    %151 = arith.truncf %134 : vector<2x8x8xf32> to vector<2x8x8xbf16>
    "tpu.trace_start"() <{level = 10 : i32, message = "bqk,bkd->bqd"}> : () -> ()
    %cst_102 = arith.constant dense<0.000000e+00> : vector<2x8x8xf32>
    %152 = tpu.matmul %150, %151, %cst_102 {dimension_numbers = #tpu.dot_dimension_numbers<[2], [1], [1], [2], [0, 0, 0, 1, 1, 2], [0], [0]>} : vector<2x8x8xbf16>, vector<2x8x8xbf16>, vector<2x8x8xf32> -> vector<2x8x8xf32>
    "tpu.trace_stop"() : () -> ()
    %153 = vector.shape_cast %152 : vector<2x8x8xf32> to vector<16x8xf32>
    %154 = arith.truncf %153 : vector<16x8xf32> to vector<16x8xbf16>
    %c0_103 = arith.constant 0 : index
    %c3_104 = arith.constant 3 : index
    %c0_105 = arith.constant 0 : index
    %c0_106 = arith.constant 0 : index
    %155 = vector.load %arg6[%c0_103, %c3_104, %c0_105, %c0_106] : memref<2x4x8x32xbf16, #tpu.memory_space<vmem>>, vector<1x1x8x32xbf16>
    %156 = vector.shape_cast %155 : vector<1x1x8x32xbf16> to vector<8x32xbf16>
    %cst_107 = arith.constant dense<0.000000e+00> : vector<16x32xf32>
    %157 = tpu.matmul %154, %156, %cst_107 {dimension_numbers = #tpu.dot_dimension_numbers<[1], [0], [0], [1], [0, 0, 1, 1], [], []>} : vector<16x8xbf16>, vector<8x32xbf16>, vector<16x32xf32> -> vector<16x32xf32>
    %158 = arith.addf %122, %157 : vector<16x32xf32>
    %159 = arith.addf %12, %158 : vector<16x32xf32>
    %c0_108 = arith.constant 0 : index
    %c0_109 = arith.constant 0 : index
    %c0_110 = arith.constant 0 : index
    %160 = vector.load %arg7[%c0_108, %c0_109, %c0_110] : memref<2x4x32xf32, #tpu.memory_space<vmem>>, vector<1x4x32xf32>
    %161 = vector.shape_cast %160 : vector<1x4x32xf32> to vector<4x32xf32>
    %162 = vector.extract_strided_slice %161 {offsets = [0, 0], sizes = [1, 32], strides = [1, 1]} : vector<4x32xf32> to vector<1x32xf32>
    %163 = vector.broadcast %162 : vector<1x32xf32> to vector<16x32xf32>
    %164 = arith.mulf %159, %163 : vector<16x32xf32>
    %165 = vector.extract_strided_slice %161 {offsets = [1, 0], sizes = [1, 32], strides = [1, 1]} : vector<4x32xf32> to vector<1x32xf32>
    %166 = vector.broadcast %165 : vector<1x32xf32> to vector<16x32xf32>
    %167 = arith.addf %164, %166 : vector<16x32xf32>
    %168 = arith.truncf %167 : vector<16x32xf32> to vector<16x32xbf16>
    %c0_111 = arith.constant 0 : index
    %c0_112 = arith.constant 0 : index
    %c0_113 = arith.constant 0 : index
    %169 = vector.load %arg8[%c0_111, %c0_112, %c0_113] : memref<2x32x64xbf16, #tpu.memory_space<vmem>>, vector<1x32x64xbf16>
    %170 = vector.shape_cast %169 : vector<1x32x64xbf16> to vector<32x64xbf16>
    %cst_114 = arith.constant dense<0.000000e+00> : vector<16x64xf32>
    %171 = tpu.matmul %168, %170, %cst_114 {dimension_numbers = #tpu.dot_dimension_numbers<[1], [0], [0], [1], [0, 0, 1, 1], [], []>} : vector<16x32xbf16>, vector<32x64xbf16>, vector<16x64xf32> -> vector<16x64xf32>
    %c0_115 = arith.constant 0 : index
    %c0_116 = arith.constant 0 : index
    %c0_117 = arith.constant 0 : index
    %172 = vector.load %arg9[%c0_115, %c0_116, %c0_117] : memref<2x1x64xf32, #tpu.memory_space<vmem>>, vector<1x1x64xf32>
    %173 = vector.shape_cast %172 : vector<1x1x64xf32> to vector<1x64xf32>
    %174 = vector.broadcast %173 : vector<1x64xf32> to vector<16x64xf32>
    %175 = arith.addf %171, %174 : vector<16x64xf32>
    %cst_118 = arith.constant 5.000000e-01 : f32
    %176 = vector.broadcast %cst_118 : f32 to vector<16x64xf32>
    %177 = arith.mulf %176, %175 : vector<16x64xf32>
    %cst_119 = arith.constant 0.707106769 : f32
    %178 = vector.broadcast %cst_119 : f32 to vector<16x64xf32>
    %179 = arith.mulf %175, %178 : vector<16x64xf32>
    %180 = math.erf %179 : vector<16x64xf32>
    %cst_120 = arith.constant 1.000000e+00 : f32
    %181 = vector.broadcast %cst_120 : f32 to vector<16x64xf32>
    %182 = arith.addf %181, %180 : vector<16x64xf32>
    %183 = arith.mulf %177, %182 : vector<16x64xf32>
    %184 = arith.truncf %183 : vector<16x64xf32> to vector<16x64xbf16>
    %c0_121 = arith.constant 0 : index
    %c0_122 = arith.constant 0 : index
    %c0_123 = arith.constant 0 : index
    %185 = vector.load %arg10[%c0_121, %c0_122, %c0_123] : memref<2x64x32xbf16, #tpu.memory_space<vmem>>, vector<1x64x32xbf16>
    %186 = vector.shape_cast %185 : vector<1x64x32xbf16> to vector<64x32xbf16>
    %cst_124 = arith.constant dense<0.000000e+00> : vector<16x32xf32>
    %187 = tpu.matmul %184, %186, %cst_124 {dimension_numbers = #tpu.dot_dimension_numbers<[1], [0], [0], [1], [0, 0, 1, 1], [], []>} : vector<16x64xbf16>, vector<64x32xbf16>, vector<16x32xf32> -> vector<16x32xf32>
    %c0_125 = arith.constant 0 : index
    %c0_126 = arith.constant 0 : index
    %c0_127 = arith.constant 0 : index
    %188 = vector.load %arg11[%c0_125, %c0_126, %c0_127] : memref<2x1x32xf32, #tpu.memory_space<vmem>>, vector<1x1x32xf32>
    %189 = vector.shape_cast %188 : vector<1x1x32xf32> to vector<1x32xf32>
    %190 = vector.broadcast %189 : vector<1x32xf32> to vector<16x32xf32>
    %191 = arith.addf %187, %190 : vector<16x32xf32>
    %192 = arith.addf %167, %191 : vector<16x32xf32>
    %193 = vector.extract_strided_slice %161 {offsets = [2, 0], sizes = [1, 32], strides = [1, 1]} : vector<4x32xf32> to vector<1x32xf32>
    %194 = vector.broadcast %193 : vector<1x32xf32> to vector<16x32xf32>
    %195 = arith.mulf %192, %194 : vector<16x32xf32>
    %196 = vector.extract_strided_slice %161 {offsets = [3, 0], sizes = [1, 32], strides = [1, 1]} : vector<4x32xf32> to vector<1x32xf32>
    %197 = vector.broadcast %196 : vector<1x32xf32> to vector<16x32xf32>
    %198 = arith.addf %195, %197 : vector<16x32xf32>
    %199 = arith.truncf %198 : vector<16x32xf32> to vector<16x32xbf16>
    %cst_128 = arith.constant 0.000000e+00 : f32
    %200 = vector.broadcast %cst_128 : f32 to vector<16x32xf32>
    %c1_129 = arith.constant 1 : index
    %c0_130 = arith.constant 0 : index
    %c0_131 = arith.constant 0 : index
    %c0_132 = arith.constant 0 : index
    %201 = vector.load %arg3[%c1_129, %c0_130, %c0_131, %c0_132] : memref<2x4x32x8xbf16, #tpu.memory_space<vmem>>, vector<1x1x32x8xbf16>
    %202 = vector.shape_cast %201 : vector<1x1x32x8xbf16> to vector<32x8xbf16>
    %cst_133 = arith.constant dense<0.000000e+00> : vector<16x8xf32>
    %203 = tpu.matmul %199, %202, %cst_133 {dimension_numbers = #tpu.dot_dimension_numbers<[1], [0], [0], [1], [0, 0, 1, 1], [], []>} : vector<16x32xbf16>, vector<32x8xbf16>, vector<16x8xf32> -> vector<16x8xf32>
    %c1_134 = arith.constant 1 : index
    %c0_135 = arith.constant 0 : index
    %c0_136 = arith.constant 0 : index
    %c0_137 = arith.constant 0 : index
    %204 = vector.load %arg4[%c1_134, %c0_135, %c0_136, %c0_137] : memref<2x4x32x8xbf16, #tpu.memory_space<vmem>>, vector<1x1x32x8xbf16>
    %205 = vector.shape_cast %204 : vector<1x1x32x8xbf16> to vector<32x8xbf16>
    %cst_138 = arith.constant dense<0.000000e+00> : vector<16x8xf32>
    %206 = tpu.matmul %199, %205, %cst_138 {dimension_numbers = #tpu.dot_dimension_numbers<[1], [0], [0], [1], [0, 0, 1, 1], [], []>} : vector<16x32xbf16>, vector<32x8xbf16>, vector<16x8xf32> -> vector<16x8xf32>
    %c1_139 = arith.constant 1 : index
    %c0_140 = arith.constant 0 : index
    %c0_141 = arith.constant 0 : index
    %c0_142 = arith.constant 0 : index
    %207 = vector.load %arg5[%c1_139, %c0_140, %c0_141, %c0_142] : memref<2x4x32x8xbf16, #tpu.memory_space<vmem>>, vector<1x1x32x8xbf16>
    %208 = vector.shape_cast %207 : vector<1x1x32x8xbf16> to vector<32x8xbf16>
    %cst_143 = arith.constant dense<0.000000e+00> : vector<16x8xf32>
    %209 = tpu.matmul %199, %208, %cst_143 {dimension_numbers = #tpu.dot_dimension_numbers<[1], [0], [0], [1], [0, 0, 1, 1], [], []>} : vector<16x32xbf16>, vector<32x8xbf16>, vector<16x8xf32> -> vector<16x8xf32>
    %210 = vector.shape_cast %203 : vector<16x8xf32> to vector<2x8x8xf32>
    %211 = vector.shape_cast %206 : vector<16x8xf32> to vector<2x8x8xf32>
    %212 = vector.shape_cast %209 : vector<16x8xf32> to vector<2x8x8xf32>
    %213 = arith.truncf %210 : vector<2x8x8xf32> to vector<2x8x8xbf16>
    %214 = arith.truncf %211 : vector<2x8x8xf32> to vector<2x8x8xbf16>
    "tpu.trace_start"() <{level = 10 : i32, message = "bqd,bkd->bqk"}> : () -> ()
    %cst_144 = arith.constant dense<0.000000e+00> : vector<2x8x8xf32>
    %215 = tpu.matmul %213, %214, %cst_144 {dimension_numbers = #tpu.dot_dimension_numbers<[2], [2], [1], [1], [0, 0, 0, 1, 1, 1], [0], [0]>} : vector<2x8x8xbf16>, vector<2x8x8xbf16>, vector<2x8x8xf32> -> vector<2x8x8xf32>
    "tpu.trace_stop"() : () -> ()
    %cst_145 = arith.constant 0.353553385 : f32
    %216 = vector.broadcast %cst_145 : f32 to vector<2x8x8xf32>
    %217 = arith.mulf %215, %216 : vector<2x8x8xf32>
    %cst_146 = arith.constant dense<0xFF800000> : vector<2x8xf32>
    %218 = vector.multi_reduction <maximumf>, %217, %cst_146 [2] : vector<2x8x8xf32> to vector<2x8xf32>
    %219 = vector.shape_cast %218 : vector<2x8xf32> to vector<2x8x1xf32>
    %220 = vector.broadcast %219 : vector<2x8x1xf32> to vector<2x8x8xf32>
    %221 = arith.subf %217, %220 : vector<2x8x8xf32>
    %222 = math.exp %221 : vector<2x8x8xf32>
    %cst_147 = arith.constant dense<0.000000e+00> : vector<2x8xf32>
    %223 = vector.multi_reduction <add>, %222, %cst_147 [2] : vector<2x8x8xf32> to vector<2x8xf32>
    %224 = vector.shape_cast %223 : vector<2x8xf32> to vector<2x8x1xf32>
    %225 = tpu.reciprocal %224 {approx = true} : vector<2x8x1xf32> -> vector<2x8x1xf32>
    %226 = vector.broadcast %225 : vector<2x8x1xf32> to vector<2x8x8xf32>
    %227 = arith.mulf %222, %226 : vector<2x8x8xf32>
    %228 = arith.truncf %227 : vector<2x8x8xf32> to vector<2x8x8xbf16>
    %229 = arith.truncf %212 : vector<2x8x8xf32> to vector<2x8x8xbf16>
    "tpu.trace_start"() <{level = 10 : i32, message = "bqk,bkd->bqd"}> : () -> ()
    %cst_148 = arith.constant dense<0.000000e+00> : vector<2x8x8xf32>
    %230 = tpu.matmul %228, %229, %cst_148 {dimension_numbers = #tpu.dot_dimension_numbers<[2], [1], [1], [2], [0, 0, 0, 1, 1, 2], [0], [0]>} : vector<2x8x8xbf16>, vector<2x8x8xbf16>, vector<2x8x8xf32> -> vector<2x8x8xf32>
    "tpu.trace_stop"() : () -> ()
    %231 = vector.shape_cast %230 : vector<2x8x8xf32> to vector<16x8xf32>
    %232 = arith.truncf %231 : vector<16x8xf32> to vector<16x8xbf16>
    %c1_149 = arith.constant 1 : index
    %c0_150 = arith.constant 0 : index
    %c0_151 = arith.constant 0 : index
    %c0_152 = arith.constant 0 : index
    %233 = vector.load %arg6[%c1_149, %c0_150, %c0_151, %c0_152] : memref<2x4x8x32xbf16, #tpu.memory_space<vmem>>, vector<1x1x8x32xbf16>
    %234 = vector.shape_cast %233 : vector<1x1x8x32xbf16> to vector<8x32xbf16>
    %cst_153 = arith.constant dense<0.000000e+00> : vector<16x32xf32>
    %235 = tpu.matmul %232, %234, %cst_153 {dimension_numbers = #tpu.dot_dimension_numbers<[1], [0], [0], [1], [0, 0, 1, 1], [], []>} : vector<16x8xbf16>, vector<8x32xbf16>, vector<16x32xf32> -> vector<16x32xf32>
    %236 = arith.addf %200, %235 : vector<16x32xf32>
    %c1_154 = arith.constant 1 : index
    %c1_155 = arith.constant 1 : index
    %c0_156 = arith.constant 0 : index
    %c0_157 = arith.constant 0 : index
    %237 = vector.load %arg3[%c1_154, %c1_155, %c0_156, %c0_157] : memref<2x4x32x8xbf16, #tpu.memory_space<vmem>>, vector<1x1x32x8xbf16>
    %238 = vector.shape_cast %237 : vector<1x1x32x8xbf16> to vector<32x8xbf16>
    %cst_158 = arith.constant dense<0.000000e+00> : vector<16x8xf32>
    %239 = tpu.matmul %199, %238, %cst_158 {dimension_numbers = #tpu.dot_dimension_numbers<[1], [0], [0], [1], [0, 0, 1, 1], [], []>} : vector<16x32xbf16>, vector<32x8xbf16>, vector<16x8xf32> -> vector<16x8xf32>
    %c1_159 = arith.constant 1 : index
    %c1_160 = arith.constant 1 : index
    %c0_161 = arith.constant 0 : index
    %c0_162 = arith.constant 0 : index
    %240 = vector.load %arg4[%c1_159, %c1_160, %c0_161, %c0_162] : memref<2x4x32x8xbf16, #tpu.memory_space<vmem>>, vector<1x1x32x8xbf16>
    %241 = vector.shape_cast %240 : vector<1x1x32x8xbf16> to vector<32x8xbf16>
    %cst_163 = arith.constant dense<0.000000e+00> : vector<16x8xf32>
    %242 = tpu.matmul %199, %241, %cst_163 {dimension_numbers = #tpu.dot_dimension_numbers<[1], [0], [0], [1], [0, 0, 1, 1], [], []>} : vector<16x32xbf16>, vector<32x8xbf16>, vector<16x8xf32> -> vector<16x8xf32>
    %c1_164 = arith.constant 1 : index
    %c1_165 = arith.constant 1 : index
    %c0_166 = arith.constant 0 : index
    %c0_167 = arith.constant 0 : index
    %243 = vector.load %arg5[%c1_164, %c1_165, %c0_166, %c0_167] : memref<2x4x32x8xbf16, #tpu.memory_space<vmem>>, vector<1x1x32x8xbf16>
    %244 = vector.shape_cast %243 : vector<1x1x32x8xbf16> to vector<32x8xbf16>
    %cst_168 = arith.constant dense<0.000000e+00> : vector<16x8xf32>
    %245 = tpu.matmul %199, %244, %cst_168 {dimension_numbers = #tpu.dot_dimension_numbers<[1], [0], [0], [1], [0, 0, 1, 1], [], []>} : vector<16x32xbf16>, vector<32x8xbf16>, vector<16x8xf32> -> vector<16x8xf32>
    %246 = vector.shape_cast %239 : vector<16x8xf32> to vector<2x8x8xf32>
    %247 = vector.shape_cast %242 : vector<16x8xf32> to vector<2x8x8xf32>
    %248 = vector.shape_cast %245 : vector<16x8xf32> to vector<2x8x8xf32>
    %249 = arith.truncf %246 : vector<2x8x8xf32> to vector<2x8x8xbf16>
    %250 = arith.truncf %247 : vector<2x8x8xf32> to vector<2x8x8xbf16>
    "tpu.trace_start"() <{level = 10 : i32, message = "bqd,bkd->bqk"}> : () -> ()
    %cst_169 = arith.constant dense<0.000000e+00> : vector<2x8x8xf32>
    %251 = tpu.matmul %249, %250, %cst_169 {dimension_numbers = #tpu.dot_dimension_numbers<[2], [2], [1], [1], [0, 0, 0, 1, 1, 1], [0], [0]>} : vector<2x8x8xbf16>, vector<2x8x8xbf16>, vector<2x8x8xf32> -> vector<2x8x8xf32>
    "tpu.trace_stop"() : () -> ()
    %cst_170 = arith.constant 0.353553385 : f32
    %252 = vector.broadcast %cst_170 : f32 to vector<2x8x8xf32>
    %253 = arith.mulf %251, %252 : vector<2x8x8xf32>
    %cst_171 = arith.constant dense<0xFF800000> : vector<2x8xf32>
    %254 = vector.multi_reduction <maximumf>, %253, %cst_171 [2] : vector<2x8x8xf32> to vector<2x8xf32>
    %255 = vector.shape_cast %254 : vector<2x8xf32> to vector<2x8x1xf32>
    %256 = vector.broadcast %255 : vector<2x8x1xf32> to vector<2x8x8xf32>
    %257 = arith.subf %253, %256 : vector<2x8x8xf32>
    %258 = math.exp %257 : vector<2x8x8xf32>
    %cst_172 = arith.constant dense<0.000000e+00> : vector<2x8xf32>
    %259 = vector.multi_reduction <add>, %258, %cst_172 [2] : vector<2x8x8xf32> to vector<2x8xf32>
    %260 = vector.shape_cast %259 : vector<2x8xf32> to vector<2x8x1xf32>
    %261 = tpu.reciprocal %260 {approx = true} : vector<2x8x1xf32> -> vector<2x8x1xf32>
    %262 = vector.broadcast %261 : vector<2x8x1xf32> to vector<2x8x8xf32>
    %263 = arith.mulf %258, %262 : vector<2x8x8xf32>
    %264 = arith.truncf %263 : vector<2x8x8xf32> to vector<2x8x8xbf16>
    %265 = arith.truncf %248 : vector<2x8x8xf32> to vector<2x8x8xbf16>
    "tpu.trace_start"() <{level = 10 : i32, message = "bqk,bkd->bqd"}> : () -> ()
    %cst_173 = arith.constant dense<0.000000e+00> : vector<2x8x8xf32>
    %266 = tpu.matmul %264, %265, %cst_173 {dimension_numbers = #tpu.dot_dimension_numbers<[2], [1], [1], [2], [0, 0, 0, 1, 1, 2], [0], [0]>} : vector<2x8x8xbf16>, vector<2x8x8xbf16>, vector<2x8x8xf32> -> vector<2x8x8xf32>
    "tpu.trace_stop"() : () -> ()
    %267 = vector.shape_cast %266 : vector<2x8x8xf32> to vector<16x8xf32>
    %268 = arith.truncf %267 : vector<16x8xf32> to vector<16x8xbf16>
    %c1_174 = arith.constant 1 : index
    %c1_175 = arith.constant 1 : index
    %c0_176 = arith.constant 0 : index
    %c0_177 = arith.constant 0 : index
    %269 = vector.load %arg6[%c1_174, %c1_175, %c0_176, %c0_177] : memref<2x4x8x32xbf16, #tpu.memory_space<vmem>>, vector<1x1x8x32xbf16>
    %270 = vector.shape_cast %269 : vector<1x1x8x32xbf16> to vector<8x32xbf16>
    %cst_178 = arith.constant dense<0.000000e+00> : vector<16x32xf32>
    %271 = tpu.matmul %268, %270, %cst_178 {dimension_numbers = #tpu.dot_dimension_numbers<[1], [0], [0], [1], [0, 0, 1, 1], [], []>} : vector<16x8xbf16>, vector<8x32xbf16>, vector<16x32xf32> -> vector<16x32xf32>
    %272 = arith.addf %236, %271 : vector<16x32xf32>
    %c1_179 = arith.constant 1 : index
    %c2_180 = arith.constant 2 : index
    %c0_181 = arith.constant 0 : index
    %c0_182 = arith.constant 0 : index
    %273 = vector.load %arg3[%c1_179, %c2_180, %c0_181, %c0_182] : memref<2x4x32x8xbf16, #tpu.memory_space<vmem>>, vector<1x1x32x8xbf16>
    %274 = vector.shape_cast %273 : vector<1x1x32x8xbf16> to vector<32x8xbf16>
    %cst_183 = arith.constant dense<0.000000e+00> : vector<16x8xf32>
    %275 = tpu.matmul %199, %274, %cst_183 {dimension_numbers = #tpu.dot_dimension_numbers<[1], [0], [0], [1], [0, 0, 1, 1], [], []>} : vector<16x32xbf16>, vector<32x8xbf16>, vector<16x8xf32> -> vector<16x8xf32>
    %c1_184 = arith.constant 1 : index
    %c2_185 = arith.constant 2 : index
    %c0_186 = arith.constant 0 : index
    %c0_187 = arith.constant 0 : index
    %276 = vector.load %arg4[%c1_184, %c2_185, %c0_186, %c0_187] : memref<2x4x32x8xbf16, #tpu.memory_space<vmem>>, vector<1x1x32x8xbf16>
    %277 = vector.shape_cast %276 : vector<1x1x32x8xbf16> to vector<32x8xbf16>
    %cst_188 = arith.constant dense<0.000000e+00> : vector<16x8xf32>
    %278 = tpu.matmul %199, %277, %cst_188 {dimension_numbers = #tpu.dot_dimension_numbers<[1], [0], [0], [1], [0, 0, 1, 1], [], []>} : vector<16x32xbf16>, vector<32x8xbf16>, vector<16x8xf32> -> vector<16x8xf32>
    %c1_189 = arith.constant 1 : index
    %c2_190 = arith.constant 2 : index
    %c0_191 = arith.constant 0 : index
    %c0_192 = arith.constant 0 : index
    %279 = vector.load %arg5[%c1_189, %c2_190, %c0_191, %c0_192] : memref<2x4x32x8xbf16, #tpu.memory_space<vmem>>, vector<1x1x32x8xbf16>
    %280 = vector.shape_cast %279 : vector<1x1x32x8xbf16> to vector<32x8xbf16>
    %cst_193 = arith.constant dense<0.000000e+00> : vector<16x8xf32>
    %281 = tpu.matmul %199, %280, %cst_193 {dimension_numbers = #tpu.dot_dimension_numbers<[1], [0], [0], [1], [0, 0, 1, 1], [], []>} : vector<16x32xbf16>, vector<32x8xbf16>, vector<16x8xf32> -> vector<16x8xf32>
    %282 = vector.shape_cast %275 : vector<16x8xf32> to vector<2x8x8xf32>
    %283 = vector.shape_cast %278 : vector<16x8xf32> to vector<2x8x8xf32>
    %284 = vector.shape_cast %281 : vector<16x8xf32> to vector<2x8x8xf32>
    %285 = arith.truncf %282 : vector<2x8x8xf32> to vector<2x8x8xbf16>
    %286 = arith.truncf %283 : vector<2x8x8xf32> to vector<2x8x8xbf16>
    "tpu.trace_start"() <{level = 10 : i32, message = "bqd,bkd->bqk"}> : () -> ()
    %cst_194 = arith.constant dense<0.000000e+00> : vector<2x8x8xf32>
    %287 = tpu.matmul %285, %286, %cst_194 {dimension_numbers = #tpu.dot_dimension_numbers<[2], [2], [1], [1], [0, 0, 0, 1, 1, 1], [0], [0]>} : vector<2x8x8xbf16>, vector<2x8x8xbf16>, vector<2x8x8xf32> -> vector<2x8x8xf32>
    "tpu.trace_stop"() : () -> ()
    %cst_195 = arith.constant 0.353553385 : f32
    %288 = vector.broadcast %cst_195 : f32 to vector<2x8x8xf32>
    %289 = arith.mulf %287, %288 : vector<2x8x8xf32>
    %cst_196 = arith.constant dense<0xFF800000> : vector<2x8xf32>
    %290 = vector.multi_reduction <maximumf>, %289, %cst_196 [2] : vector<2x8x8xf32> to vector<2x8xf32>
    %291 = vector.shape_cast %290 : vector<2x8xf32> to vector<2x8x1xf32>
    %292 = vector.broadcast %291 : vector<2x8x1xf32> to vector<2x8x8xf32>
    %293 = arith.subf %289, %292 : vector<2x8x8xf32>
    %294 = math.exp %293 : vector<2x8x8xf32>
    %cst_197 = arith.constant dense<0.000000e+00> : vector<2x8xf32>
    %295 = vector.multi_reduction <add>, %294, %cst_197 [2] : vector<2x8x8xf32> to vector<2x8xf32>
    %296 = vector.shape_cast %295 : vector<2x8xf32> to vector<2x8x1xf32>
    %297 = tpu.reciprocal %296 {approx = true} : vector<2x8x1xf32> -> vector<2x8x1xf32>
    %298 = vector.broadcast %297 : vector<2x8x1xf32> to vector<2x8x8xf32>
    %299 = arith.mulf %294, %298 : vector<2x8x8xf32>
    %300 = arith.truncf %299 : vector<2x8x8xf32> to vector<2x8x8xbf16>
    %301 = arith.truncf %284 : vector<2x8x8xf32> to vector<2x8x8xbf16>
    "tpu.trace_start"() <{level = 10 : i32, message = "bqk,bkd->bqd"}> : () -> ()
    %cst_198 = arith.constant dense<0.000000e+00> : vector<2x8x8xf32>
    %302 = tpu.matmul %300, %301, %cst_198 {dimension_numbers = #tpu.dot_dimension_numbers<[2], [1], [1], [2], [0, 0, 0, 1, 1, 2], [0], [0]>} : vector<2x8x8xbf16>, vector<2x8x8xbf16>, vector<2x8x8xf32> -> vector<2x8x8xf32>
    "tpu.trace_stop"() : () -> ()
    %303 = vector.shape_cast %302 : vector<2x8x8xf32> to vector<16x8xf32>
    %304 = arith.truncf %303 : vector<16x8xf32> to vector<16x8xbf16>
    %c1_199 = arith.constant 1 : index
    %c2_200 = arith.constant 2 : index
    %c0_201 = arith.constant 0 : index
    %c0_202 = arith.constant 0 : index
    %305 = vector.load %arg6[%c1_199, %c2_200, %c0_201, %c0_202] : memref<2x4x8x32xbf16, #tpu.memory_space<vmem>>, vector<1x1x8x32xbf16>
    %306 = vector.shape_cast %305 : vector<1x1x8x32xbf16> to vector<8x32xbf16>
    %cst_203 = arith.constant dense<0.000000e+00> : vector<16x32xf32>
    %307 = tpu.matmul %304, %306, %cst_203 {dimension_numbers = #tpu.dot_dimension_numbers<[1], [0], [0], [1], [0, 0, 1, 1], [], []>} : vector<16x8xbf16>, vector<8x32xbf16>, vector<16x32xf32> -> vector<16x32xf32>
    %308 = arith.addf %272, %307 : vector<16x32xf32>
    %c1_204 = arith.constant 1 : index
    %c3_205 = arith.constant 3 : index
    %c0_206 = arith.constant 0 : index
    %c0_207 = arith.constant 0 : index
    %309 = vector.load %arg3[%c1_204, %c3_205, %c0_206, %c0_207] : memref<2x4x32x8xbf16, #tpu.memory_space<vmem>>, vector<1x1x32x8xbf16>
    %310 = vector.shape_cast %309 : vector<1x1x32x8xbf16> to vector<32x8xbf16>
    %cst_208 = arith.constant dense<0.000000e+00> : vector<16x8xf32>
    %311 = tpu.matmul %199, %310, %cst_208 {dimension_numbers = #tpu.dot_dimension_numbers<[1], [0], [0], [1], [0, 0, 1, 1], [], []>} : vector<16x32xbf16>, vector<32x8xbf16>, vector<16x8xf32> -> vector<16x8xf32>
    %c1_209 = arith.constant 1 : index
    %c3_210 = arith.constant 3 : index
    %c0_211 = arith.constant 0 : index
    %c0_212 = arith.constant 0 : index
    %312 = vector.load %arg4[%c1_209, %c3_210, %c0_211, %c0_212] : memref<2x4x32x8xbf16, #tpu.memory_space<vmem>>, vector<1x1x32x8xbf16>
    %313 = vector.shape_cast %312 : vector<1x1x32x8xbf16> to vector<32x8xbf16>
    %cst_213 = arith.constant dense<0.000000e+00> : vector<16x8xf32>
    %314 = tpu.matmul %199, %313, %cst_213 {dimension_numbers = #tpu.dot_dimension_numbers<[1], [0], [0], [1], [0, 0, 1, 1], [], []>} : vector<16x32xbf16>, vector<32x8xbf16>, vector<16x8xf32> -> vector<16x8xf32>
    %c1_214 = arith.constant 1 : index
    %c3_215 = arith.constant 3 : index
    %c0_216 = arith.constant 0 : index
    %c0_217 = arith.constant 0 : index
    %315 = vector.load %arg5[%c1_214, %c3_215, %c0_216, %c0_217] : memref<2x4x32x8xbf16, #tpu.memory_space<vmem>>, vector<1x1x32x8xbf16>
    %316 = vector.shape_cast %315 : vector<1x1x32x8xbf16> to vector<32x8xbf16>
    %cst_218 = arith.constant dense<0.000000e+00> : vector<16x8xf32>
    %317 = tpu.matmul %199, %316, %cst_218 {dimension_numbers = #tpu.dot_dimension_numbers<[1], [0], [0], [1], [0, 0, 1, 1], [], []>} : vector<16x32xbf16>, vector<32x8xbf16>, vector<16x8xf32> -> vector<16x8xf32>
    %318 = vector.shape_cast %311 : vector<16x8xf32> to vector<2x8x8xf32>
    %319 = vector.shape_cast %314 : vector<16x8xf32> to vector<2x8x8xf32>
    %320 = vector.shape_cast %317 : vector<16x8xf32> to vector<2x8x8xf32>
    %321 = arith.truncf %318 : vector<2x8x8xf32> to vector<2x8x8xbf16>
    %322 = arith.truncf %319 : vector<2x8x8xf32> to vector<2x8x8xbf16>
    "tpu.trace_start"() <{level = 10 : i32, message = "bqd,bkd->bqk"}> : () -> ()
    %cst_219 = arith.constant dense<0.000000e+00> : vector<2x8x8xf32>
    %323 = tpu.matmul %321, %322, %cst_219 {dimension_numbers = #tpu.dot_dimension_numbers<[2], [2], [1], [1], [0, 0, 0, 1, 1, 1], [0], [0]>} : vector<2x8x8xbf16>, vector<2x8x8xbf16>, vector<2x8x8xf32> -> vector<2x8x8xf32>
    "tpu.trace_stop"() : () -> ()
    %cst_220 = arith.constant 0.353553385 : f32
    %324 = vector.broadcast %cst_220 : f32 to vector<2x8x8xf32>
    %325 = arith.mulf %323, %324 : vector<2x8x8xf32>
    %cst_221 = arith.constant dense<0xFF800000> : vector<2x8xf32>
    %326 = vector.multi_reduction <maximumf>, %325, %cst_221 [2] : vector<2x8x8xf32> to vector<2x8xf32>
    %327 = vector.shape_cast %326 : vector<2x8xf32> to vector<2x8x1xf32>
    %328 = vector.broadcast %327 : vector<2x8x1xf32> to vector<2x8x8xf32>
    %329 = arith.subf %325, %328 : vector<2x8x8xf32>
    %330 = math.exp %329 : vector<2x8x8xf32>
    %cst_222 = arith.constant dense<0.000000e+00> : vector<2x8xf32>
    %331 = vector.multi_reduction <add>, %330, %cst_222 [2] : vector<2x8x8xf32> to vector<2x8xf32>
    %332 = vector.shape_cast %331 : vector<2x8xf32> to vector<2x8x1xf32>
    %333 = tpu.reciprocal %332 {approx = true} : vector<2x8x1xf32> -> vector<2x8x1xf32>
    %334 = vector.broadcast %333 : vector<2x8x1xf32> to vector<2x8x8xf32>
    %335 = arith.mulf %330, %334 : vector<2x8x8xf32>
    %336 = arith.truncf %335 : vector<2x8x8xf32> to vector<2x8x8xbf16>
    %337 = arith.truncf %320 : vector<2x8x8xf32> to vector<2x8x8xbf16>
    "tpu.trace_start"() <{level = 10 : i32, message = "bqk,bkd->bqd"}> : () -> ()
    %cst_223 = arith.constant dense<0.000000e+00> : vector<2x8x8xf32>
    %338 = tpu.matmul %336, %337, %cst_223 {dimension_numbers = #tpu.dot_dimension_numbers<[2], [1], [1], [2], [0, 0, 0, 1, 1, 2], [0], [0]>} : vector<2x8x8xbf16>, vector<2x8x8xbf16>, vector<2x8x8xf32> -> vector<2x8x8xf32>
    "tpu.trace_stop"() : () -> ()
    %339 = vector.shape_cast %338 : vector<2x8x8xf32> to vector<16x8xf32>
    %340 = arith.truncf %339 : vector<16x8xf32> to vector<16x8xbf16>
    %c1_224 = arith.constant 1 : index
    %c3_225 = arith.constant 3 : index
    %c0_226 = arith.constant 0 : index
    %c0_227 = arith.constant 0 : index
    %341 = vector.load %arg6[%c1_224, %c3_225, %c0_226, %c0_227] : memref<2x4x8x32xbf16, #tpu.memory_space<vmem>>, vector<1x1x8x32xbf16>
    %342 = vector.shape_cast %341 : vector<1x1x8x32xbf16> to vector<8x32xbf16>
    %cst_228 = arith.constant dense<0.000000e+00> : vector<16x32xf32>
    %343 = tpu.matmul %340, %342, %cst_228 {dimension_numbers = #tpu.dot_dimension_numbers<[1], [0], [0], [1], [0, 0, 1, 1], [], []>} : vector<16x8xbf16>, vector<8x32xbf16>, vector<16x32xf32> -> vector<16x32xf32>
    %344 = arith.addf %308, %343 : vector<16x32xf32>
    %345 = arith.addf %198, %344 : vector<16x32xf32>
    %c1_229 = arith.constant 1 : index
    %c0_230 = arith.constant 0 : index
    %c0_231 = arith.constant 0 : index
    %346 = vector.load %arg7[%c1_229, %c0_230, %c0_231] : memref<2x4x32xf32, #tpu.memory_space<vmem>>, vector<1x4x32xf32>
    %347 = vector.shape_cast %346 : vector<1x4x32xf32> to vector<4x32xf32>
    %348 = vector.extract_strided_slice %347 {offsets = [0, 0], sizes = [1, 32], strides = [1, 1]} : vector<4x32xf32> to vector<1x32xf32>
    %349 = vector.broadcast %348 : vector<1x32xf32> to vector<16x32xf32>
    %350 = arith.mulf %345, %349 : vector<16x32xf32>
    %351 = vector.extract_strided_slice %347 {offsets = [1, 0], sizes = [1, 32], strides = [1, 1]} : vector<4x32xf32> to vector<1x32xf32>
    %352 = vector.broadcast %351 : vector<1x32xf32> to vector<16x32xf32>
    %353 = arith.addf %350, %352 : vector<16x32xf32>
    %354 = arith.truncf %353 : vector<16x32xf32> to vector<16x32xbf16>
    %c1_232 = arith.constant 1 : index
    %c0_233 = arith.constant 0 : index
    %c0_234 = arith.constant 0 : index
    %355 = vector.load %arg8[%c1_232, %c0_233, %c0_234] : memref<2x32x64xbf16, #tpu.memory_space<vmem>>, vector<1x32x64xbf16>
    %356 = vector.shape_cast %355 : vector<1x32x64xbf16> to vector<32x64xbf16>
    %cst_235 = arith.constant dense<0.000000e+00> : vector<16x64xf32>
    %357 = tpu.matmul %354, %356, %cst_235 {dimension_numbers = #tpu.dot_dimension_numbers<[1], [0], [0], [1], [0, 0, 1, 1], [], []>} : vector<16x32xbf16>, vector<32x64xbf16>, vector<16x64xf32> -> vector<16x64xf32>
    %c1_236 = arith.constant 1 : index
    %c0_237 = arith.constant 0 : index
    %c0_238 = arith.constant 0 : index
    %358 = vector.load %arg9[%c1_236, %c0_237, %c0_238] : memref<2x1x64xf32, #tpu.memory_space<vmem>>, vector<1x1x64xf32>
    %359 = vector.shape_cast %358 : vector<1x1x64xf32> to vector<1x64xf32>
    %360 = vector.broadcast %359 : vector<1x64xf32> to vector<16x64xf32>
    %361 = arith.addf %357, %360 : vector<16x64xf32>
    %cst_239 = arith.constant 5.000000e-01 : f32
    %362 = vector.broadcast %cst_239 : f32 to vector<16x64xf32>
    %363 = arith.mulf %362, %361 : vector<16x64xf32>
    %cst_240 = arith.constant 0.707106769 : f32
    %364 = vector.broadcast %cst_240 : f32 to vector<16x64xf32>
    %365 = arith.mulf %361, %364 : vector<16x64xf32>
    %366 = math.erf %365 : vector<16x64xf32>
    %cst_241 = arith.constant 1.000000e+00 : f32
    %367 = vector.broadcast %cst_241 : f32 to vector<16x64xf32>
    %368 = arith.addf %367, %366 : vector<16x64xf32>
    %369 = arith.mulf %363, %368 : vector<16x64xf32>
    %370 = arith.truncf %369 : vector<16x64xf32> to vector<16x64xbf16>
    %c1_242 = arith.constant 1 : index
    %c0_243 = arith.constant 0 : index
    %c0_244 = arith.constant 0 : index
    %371 = vector.load %arg10[%c1_242, %c0_243, %c0_244] : memref<2x64x32xbf16, #tpu.memory_space<vmem>>, vector<1x64x32xbf16>
    %372 = vector.shape_cast %371 : vector<1x64x32xbf16> to vector<64x32xbf16>
    %cst_245 = arith.constant dense<0.000000e+00> : vector<16x32xf32>
    %373 = tpu.matmul %370, %372, %cst_245 {dimension_numbers = #tpu.dot_dimension_numbers<[1], [0], [0], [1], [0, 0, 1, 1], [], []>} : vector<16x64xbf16>, vector<64x32xbf16>, vector<16x32xf32> -> vector<16x32xf32>
    %c1_246 = arith.constant 1 : index
    %c0_247 = arith.constant 0 : index
    %c0_248 = arith.constant 0 : index
    %374 = vector.load %arg11[%c1_246, %c0_247, %c0_248] : memref<2x1x32xf32, #tpu.memory_space<vmem>>, vector<1x1x32xf32>
    %375 = vector.shape_cast %374 : vector<1x1x32xf32> to vector<1x32xf32>
    %376 = vector.broadcast %375 : vector<1x32xf32> to vector<16x32xf32>
    %377 = arith.addf %373, %376 : vector<16x32xf32>
    %378 = arith.addf %353, %377 : vector<16x32xf32>
    %379 = vector.extract_strided_slice %347 {offsets = [2, 0], sizes = [1, 32], strides = [1, 1]} : vector<4x32xf32> to vector<1x32xf32>
    %380 = vector.broadcast %379 : vector<1x32xf32> to vector<16x32xf32>
    %381 = arith.mulf %378, %380 : vector<16x32xf32>
    %382 = vector.extract_strided_slice %347 {offsets = [3, 0], sizes = [1, 32], strides = [1, 1]} : vector<4x32xf32> to vector<1x32xf32>
    %383 = vector.broadcast %382 : vector<1x32xf32> to vector<16x32xf32>
    %384 = arith.addf %381, %383 : vector<16x32xf32>
    %cst_249 = arith.constant 5.000000e-01 : f32
    %385 = vector.broadcast %cst_249 : f32 to vector<16x32xf32>
    %386 = arith.mulf %385, %384 : vector<16x32xf32>
    %cst_250 = arith.constant 0.707106769 : f32
    %387 = vector.broadcast %cst_250 : f32 to vector<16x32xf32>
    %388 = arith.mulf %384, %387 : vector<16x32xf32>
    %389 = math.erf %388 : vector<16x32xf32>
    %cst_251 = arith.constant 1.000000e+00 : f32
    %390 = vector.broadcast %cst_251 : f32 to vector<16x32xf32>
    %391 = arith.addf %390, %389 : vector<16x32xf32>
    %392 = arith.mulf %386, %391 : vector<16x32xf32>
    %393 = vector.shape_cast %392 : vector<16x32xf32> to vector<2x8x32xf32>
    %cst_252 = arith.constant 0.000000e+00 : f32
    %394 = vector.broadcast %cst_252 : f32 to vector<2x3xf32>
    %395 = vector.extract_strided_slice %393 {offsets = [0, 0, 0], sizes = [2, 1, 32], strides = [1, 1, 1]} : vector<2x8x32xf32> to vector<2x1x32xf32>
    %396 = vector.shape_cast %395 : vector<2x1x32xf32> to vector<2x32xf32>
    %397 = arith.truncf %396 : vector<2x32xf32> to vector<2x32xbf16>
    %c0_253 = arith.constant 0 : index
    %c0_254 = arith.constant 0 : index
    %c0_255 = arith.constant 0 : index
    %398 = vector.load %arg12[%c0_253, %c0_254, %c0_255] : memref<8x32x3xbf16, #tpu.memory_space<vmem>>, vector<1x32x3xbf16>
    %399 = vector.shape_cast %398 : vector<1x32x3xbf16> to vector<32x3xbf16>
    %cst_256 = arith.constant dense<0.000000e+00> : vector<2x3xf32>
    %400 = tpu.matmul %397, %399, %cst_256 {dimension_numbers = #tpu.dot_dimension_numbers<[1], [0], [0], [1], [0, 0, 1, 1], [], []>} : vector<2x32xbf16>, vector<32x3xbf16>, vector<2x3xf32> -> vector<2x3xf32>
    %401 = arith.addf %394, %400 : vector<2x3xf32>
    %402 = vector.extract_strided_slice %393 {offsets = [0, 1, 0], sizes = [2, 1, 32], strides = [1, 1, 1]} : vector<2x8x32xf32> to vector<2x1x32xf32>
    %403 = vector.shape_cast %402 : vector<2x1x32xf32> to vector<2x32xf32>
    %404 = arith.truncf %403 : vector<2x32xf32> to vector<2x32xbf16>
    %c1_257 = arith.constant 1 : index
    %c0_258 = arith.constant 0 : index
    %c0_259 = arith.constant 0 : index
    %405 = vector.load %arg12[%c1_257, %c0_258, %c0_259] : memref<8x32x3xbf16, #tpu.memory_space<vmem>>, vector<1x32x3xbf16>
    %406 = vector.shape_cast %405 : vector<1x32x3xbf16> to vector<32x3xbf16>
    %cst_260 = arith.constant dense<0.000000e+00> : vector<2x3xf32>
    %407 = tpu.matmul %404, %406, %cst_260 {dimension_numbers = #tpu.dot_dimension_numbers<[1], [0], [0], [1], [0, 0, 1, 1], [], []>} : vector<2x32xbf16>, vector<32x3xbf16>, vector<2x3xf32> -> vector<2x3xf32>
    %408 = arith.addf %401, %407 : vector<2x3xf32>
    %409 = vector.extract_strided_slice %393 {offsets = [0, 2, 0], sizes = [2, 1, 32], strides = [1, 1, 1]} : vector<2x8x32xf32> to vector<2x1x32xf32>
    %410 = vector.shape_cast %409 : vector<2x1x32xf32> to vector<2x32xf32>
    %411 = arith.truncf %410 : vector<2x32xf32> to vector<2x32xbf16>
    %c2_261 = arith.constant 2 : index
    %c0_262 = arith.constant 0 : index
    %c0_263 = arith.constant 0 : index
    %412 = vector.load %arg12[%c2_261, %c0_262, %c0_263] : memref<8x32x3xbf16, #tpu.memory_space<vmem>>, vector<1x32x3xbf16>
    %413 = vector.shape_cast %412 : vector<1x32x3xbf16> to vector<32x3xbf16>
    %cst_264 = arith.constant dense<0.000000e+00> : vector<2x3xf32>
    %414 = tpu.matmul %411, %413, %cst_264 {dimension_numbers = #tpu.dot_dimension_numbers<[1], [0], [0], [1], [0, 0, 1, 1], [], []>} : vector<2x32xbf16>, vector<32x3xbf16>, vector<2x3xf32> -> vector<2x3xf32>
    %415 = arith.addf %408, %414 : vector<2x3xf32>
    %416 = vector.extract_strided_slice %393 {offsets = [0, 3, 0], sizes = [2, 1, 32], strides = [1, 1, 1]} : vector<2x8x32xf32> to vector<2x1x32xf32>
    %417 = vector.shape_cast %416 : vector<2x1x32xf32> to vector<2x32xf32>
    %418 = arith.truncf %417 : vector<2x32xf32> to vector<2x32xbf16>
    %c3_265 = arith.constant 3 : index
    %c0_266 = arith.constant 0 : index
    %c0_267 = arith.constant 0 : index
    %419 = vector.load %arg12[%c3_265, %c0_266, %c0_267] : memref<8x32x3xbf16, #tpu.memory_space<vmem>>, vector<1x32x3xbf16>
    %420 = vector.shape_cast %419 : vector<1x32x3xbf16> to vector<32x3xbf16>
    %cst_268 = arith.constant dense<0.000000e+00> : vector<2x3xf32>
    %421 = tpu.matmul %418, %420, %cst_268 {dimension_numbers = #tpu.dot_dimension_numbers<[1], [0], [0], [1], [0, 0, 1, 1], [], []>} : vector<2x32xbf16>, vector<32x3xbf16>, vector<2x3xf32> -> vector<2x3xf32>
    %422 = arith.addf %415, %421 : vector<2x3xf32>
    %423 = vector.extract_strided_slice %393 {offsets = [0, 4, 0], sizes = [2, 1, 32], strides = [1, 1, 1]} : vector<2x8x32xf32> to vector<2x1x32xf32>
    %424 = vector.shape_cast %423 : vector<2x1x32xf32> to vector<2x32xf32>
    %425 = arith.truncf %424 : vector<2x32xf32> to vector<2x32xbf16>
    %c4 = arith.constant 4 : index
    %c0_269 = arith.constant 0 : index
    %c0_270 = arith.constant 0 : index
    %426 = vector.load %arg12[%c4, %c0_269, %c0_270] : memref<8x32x3xbf16, #tpu.memory_space<vmem>>, vector<1x32x3xbf16>
    %427 = vector.shape_cast %426 : vector<1x32x3xbf16> to vector<32x3xbf16>
    %cst_271 = arith.constant dense<0.000000e+00> : vector<2x3xf32>
    %428 = tpu.matmul %425, %427, %cst_271 {dimension_numbers = #tpu.dot_dimension_numbers<[1], [0], [0], [1], [0, 0, 1, 1], [], []>} : vector<2x32xbf16>, vector<32x3xbf16>, vector<2x3xf32> -> vector<2x3xf32>
    %429 = arith.addf %422, %428 : vector<2x3xf32>
    %430 = vector.extract_strided_slice %393 {offsets = [0, 5, 0], sizes = [2, 1, 32], strides = [1, 1, 1]} : vector<2x8x32xf32> to vector<2x1x32xf32>
    %431 = vector.shape_cast %430 : vector<2x1x32xf32> to vector<2x32xf32>
    %432 = arith.truncf %431 : vector<2x32xf32> to vector<2x32xbf16>
    %c5 = arith.constant 5 : index
    %c0_272 = arith.constant 0 : index
    %c0_273 = arith.constant 0 : index
    %433 = vector.load %arg12[%c5, %c0_272, %c0_273] : memref<8x32x3xbf16, #tpu.memory_space<vmem>>, vector<1x32x3xbf16>
    %434 = vector.shape_cast %433 : vector<1x32x3xbf16> to vector<32x3xbf16>
    %cst_274 = arith.constant dense<0.000000e+00> : vector<2x3xf32>
    %435 = tpu.matmul %432, %434, %cst_274 {dimension_numbers = #tpu.dot_dimension_numbers<[1], [0], [0], [1], [0, 0, 1, 1], [], []>} : vector<2x32xbf16>, vector<32x3xbf16>, vector<2x3xf32> -> vector<2x3xf32>
    %436 = arith.addf %429, %435 : vector<2x3xf32>
    %437 = vector.extract_strided_slice %393 {offsets = [0, 6, 0], sizes = [2, 1, 32], strides = [1, 1, 1]} : vector<2x8x32xf32> to vector<2x1x32xf32>
    %438 = vector.shape_cast %437 : vector<2x1x32xf32> to vector<2x32xf32>
    %439 = arith.truncf %438 : vector<2x32xf32> to vector<2x32xbf16>
    %c6 = arith.constant 6 : index
    %c0_275 = arith.constant 0 : index
    %c0_276 = arith.constant 0 : index
    %440 = vector.load %arg12[%c6, %c0_275, %c0_276] : memref<8x32x3xbf16, #tpu.memory_space<vmem>>, vector<1x32x3xbf16>
    %441 = vector.shape_cast %440 : vector<1x32x3xbf16> to vector<32x3xbf16>
    %cst_277 = arith.constant dense<0.000000e+00> : vector<2x3xf32>
    %442 = tpu.matmul %439, %441, %cst_277 {dimension_numbers = #tpu.dot_dimension_numbers<[1], [0], [0], [1], [0, 0, 1, 1], [], []>} : vector<2x32xbf16>, vector<32x3xbf16>, vector<2x3xf32> -> vector<2x3xf32>
    %443 = arith.addf %436, %442 : vector<2x3xf32>
    %444 = vector.extract_strided_slice %393 {offsets = [0, 7, 0], sizes = [2, 1, 32], strides = [1, 1, 1]} : vector<2x8x32xf32> to vector<2x1x32xf32>
    %445 = vector.shape_cast %444 : vector<2x1x32xf32> to vector<2x32xf32>
    %446 = arith.truncf %445 : vector<2x32xf32> to vector<2x32xbf16>
    %c7 = arith.constant 7 : index
    %c0_278 = arith.constant 0 : index
    %c0_279 = arith.constant 0 : index
    %447 = vector.load %arg12[%c7, %c0_278, %c0_279] : memref<8x32x3xbf16, #tpu.memory_space<vmem>>, vector<1x32x3xbf16>
    %448 = vector.shape_cast %447 : vector<1x32x3xbf16> to vector<32x3xbf16>
    %cst_280 = arith.constant dense<0.000000e+00> : vector<2x3xf32>
    %449 = tpu.matmul %446, %448, %cst_280 {dimension_numbers = #tpu.dot_dimension_numbers<[1], [0], [0], [1], [0, 0, 1, 1], [], []>} : vector<2x32xbf16>, vector<32x3xbf16>, vector<2x3xf32> -> vector<2x3xf32>
    %450 = arith.addf %443, %449 : vector<2x3xf32>
    %c0_281 = arith.constant 0 : index
    %c0_282 = arith.constant 0 : index
    %451 = vector.load %arg13[%c0_281, %c0_282] : memref<1x3xf32, #tpu.memory_space<vmem>>, vector<1x3xf32>
    %452 = vector.broadcast %451 : vector<1x3xf32> to vector<2x3xf32>
    %453 = arith.addf %450, %452 : vector<2x3xf32>
    %c0_283 = arith.constant 0 : index
    %c0_284 = arith.constant 0 : index
    %454 = vector.load %arg14[%c0_283, %c0_284] : memref<2x3xf32, #tpu.memory_space<vmem>>, vector<2x3xf32>
    tpu.vector_store %arg14[%c0_283, %c0_284], %453 {strides = array<i32>} : memref<2x3xf32, #tpu.memory_space<vmem>>, vector<2x3xf32>,
    return
  }
}

</mosaic_0001>

<bundles_post_ra>
// kernel: tpu_custom_call.1
= control target key start
LH: loop header
LB: loop body
LE: loop exit
PB: predicated region body
PF: predicated region fallthrough
CT: control target
= control target key end

     0   :  { %v5964_v2 = vmov 0.0   ;;  %vm88_vm0 = vcmask 1043456   ;;  %vm5965_vm1 = vmmov 0   ;;  %s6895_s0 = inlined_call_operand.vmem [shape: f32[2,4,8], index: 0, kind: input, shape index: {}]   ;;  %s6896_s1 = inlined_call_operand.vmem [shape: f32[4,32], index: 1, kind: input, shape index: {}]   ;;  %s6897_s2 = inlined_call_operand.vmem [shape: f32[8,32], index: 2, kind: input, shape index: {}]   ;;  %s6898_s3 = inlined_call_operand.vmem [shape: bf16[2,4,32,8], index: 3, kind: input, shape index: {}]   ;;  %s6899_s4 = inlined_call_operand.vmem [shape: bf16[2,4,32,8], index: 4, kind: input, shape index: {}]   ;;  %s6900_s5 = inlined_call_operand.vmem [shape: bf16[2,4,32,8], index: 5, kind: input, shape index: {}]   ;;  %s6901_s6 = inlined_call_operand.vmem [shape: bf16[2,4,8,32], index: 6, kind: input, shape index: {}]   ;;  %s6902_s7 = inlined_call_operand.vmem [shape: f32[2,4,32], index: 7, kind: input, shape index: {}]   ;;  %s6903_s8 = inlined_call_operand.vmem [shape: bf16[2,32,64], index: 8, kind: input, shape index: {}]   ;;  %s6904_s9 = inlined_call_operand.vmem [shape: f32[2,1,64], index: 9, kind: input, shape index: {}]   ;;  %s6905_s10 = inlined_call_operand.vmem [shape: bf16[2,64,32], index: 10, kind: input, shape index: {}]   ;;  %s6906_s11 = inlined_call_operand.vmem [shape: f32[2,1,32], index: 11, kind: input, shape index: {}]   ;;  %s6907_s12 = inlined_call_operand.vmem [shape: bf16[8,32,3], index: 12, kind: input, shape index: {}]   ;;  %s6908_s13 = inlined_call_operand.vmem [shape: f32[1,3], index: 13, kind: input, shape index: {}]   ;;  %s6909_s14 = inlined_call_operand.hbm [shape: f32[2,3], index: 14, kind: output, shape index: {}]  }
   0x1   :  { %v51_v0 = vld [vmem:[%s6895_s0] sm:$0xf]  ;;  %v4749_v1 = vld [vmem:[%s6895_s0 + $0x4] sm:$0xf]  ;;  %5239 = vmatprep.subr.mxu0 %v5964_v2  ;;  %5241 = vmatprep.mubr.msk.f32.mxu0 %vm5965_vm1, %v5964_v2 }
   0x2   :  { %52 = vxpose.xlu0.b32.start.end [1/1] (short) (narrow) %v51_v0, 8  ;;  %v49_v3 = vld [vmem:[%s6896_s1] sm:$0xf]  ;;  %5244 = vmatprep.subr.mxu1 %v5964_v2 }
   0x3   :  { %5240 = vmatpush3.msk.msra.mxu0 %vm88_vm0, %v49_v3  ;;  %5246 = vmatprep.mubr.msk.f32.mxu1 %vm5965_vm1, %v5964_v2 }
   0x4   :  { %5245 = vmatpush3.msk.msra.mxu1 %vm88_vm0, %v49_v3  ;;  %5249 = vmatprep.subr.bf16.mxu0 %v5964_v2 }
   0x5   :  { %5257 = vmatprep.subr.bf16.mxu1 %v5964_v2 }
   0x6   :  { %164 = vxpose.xlu0.b32.start.end [1/1] (short) (narrow) %v4749_v1, 8 }
   0x7   :  { %19 = vsyncpa [#allocation3], 0  ;;  %vm84_vm2 = vcmask 31744   ;;  %v5788_v6 = vld [vmem:[%s6898_s3] sm:$0xff]   ;;  %v5790_v8 = vld [vmem:[%s6898_s3 + $0x8] sm:$0xff]   ;;  %vm286_vm3 = vcmask 261120  }
   0x8   :  { %v5789_v7 = vld [vmem:[%s6899_s4] sm:$0xff]   ;;  %v5791_v9 = vld [vmem:[%s6899_s4 + $0x8] sm:$0xff]   ;;  %vm449_vm4 = vcmask 64512   ;;  %vm2168_vm5 = vcmask 523264   ;;  %vm4217_vm6 = vcmask 1041409   ;;  %vm4731_vm7 = vcmask 17408  }
   0x9   :  { %v50_v12 = vld [vmem:[%s6897_s2] sm:$0xff]  ;;  %v5793_v19 = vld [vmem:[%s6900_s5 + $0x8] sm:$0xff]   ;;  %s5966_s2 = smov [#allocation2]  }
   0xa   :  { %v5792_v17 = vld [vmem:[%s6900_s5] sm:$0xff]   ;;  %s4739_s29 = sshll.u32 %s5966_s2, 4  ;;  %s4740_s29 = int_to_ptr.vmem [resolvable:$true] %s4739_s29 }
   0xb   :  { %p5945_p1 = scmp.lt.s32.totalorder %s4740_s29, %s4740_s29 }
  0x82   :  { %v68_v4 = vpop.trf.xlu0 }
  0x83   :  { %5242 = vmatmul.mubr.msk.f32.vlgmr.msra.gmra.mrb[0].mxu0 %vm84_vm2, %v68_v4 }
  0x84   :  { %5253 = vmatprep.mubr.msk.bf16.mxu0 %vm5965_vm1, %v5964_v2  ;;  %5250 = vmatpush3.bf16.msra.mxu0 %v5788_v6 }
  0x85   :  { %5251 = vmatprep.subr.bf16.mxu0 %v5964_v2 }
  0x86   :  { %v180_v5 = vpop.trf.xlu0 }
  0x87   :  { %5247 = vmatmul.mubr.msk.f32.vlgmr.msra.gmra.mrb[0].mxu1 %vm84_vm2, %v180_v5  ;;  %v5794_v5 = vld [vmem:[%s6899_s4 + $0x10] sm:$0xff]  }
  0x88   :  { %5261 = vmatprep.mubr.msk.bf16.mxu1 %vm5965_vm1, %v5964_v2  ;;  %5258 = vmatpush3.bf16.msra.mxu1 %v5789_v7 }
  0x89   :  { %5259 = vmatprep.subr.bf16.mxu1 %v5964_v2  ;;  %5252 = vmatpush3.bf16.msra.mxu0 %v5790_v8 }
  0x8a   :  { %5265 = vmatprep.subr.bf16.mxu0 %v5964_v2 }
  0x8c   :  { %5260 = vmatpush3.bf16.msra.mxu1 %v5791_v9  ;;  %v5795_v9 = vld [vmem:[%s6898_s3 + $0x10] sm:$0xff]  }
  0x8d   :  { %5273 = vmatprep.subr.bf16.mxu1 %v5964_v2 }
 0x156   :  { %v158_v10 = vpop.f32.mrb[0].mxu0 }
 0x157   :  { %v5243_v11 = vpop.f32.mrb[1].mxu0  ;;  %v6084_v14 = vadd.f32 %v158_v10, %v50_v12  ;;  %v5796_v10 = vld [vmem:[%s6899_s4 + $0x18] sm:$0xff]  }
 0x15a   :  { %v265_v13 = vpop.f32.mrb[0].mxu1 }
 0x15b   :  { %v6086_v15 = vadd.f32 %v265_v13, %v50_v12  ;;  %v5248_v16 = vpop.f32.mrb[1].mxu1  ;;  %v5797_v12 = vld [vmem:[%s6898_s3 + $0x18] sm:$0xff]   ;;  %v5798_v13 = vld [vmem:[%s6900_s5 + $0x10] sm:$0xff]  }
 0x15c   :  { %v5799_v16 = vld [vmem:[%s6900_s5 + $0x18] sm:$0xff]  }
 0x15d   :  { %v6093_v18 = vpack.c.bf16 %v6086_v15, %v6084_v14 }
 0x15f   :  { %5254 = vmatmul.mubr.msk.bf16.vlgmr.msra.gmra.mrb[4].mxu0 %vm286_vm3, %v6093_v18  ;;  %5262 = vmatmul.mubr.msk.bf16.vlgmr.msra.gmra.mrb[4].mxu1 %vm286_vm3, %v6093_v18 }
 0x160   :  { %5266 = vmatpush3.bf16.msra.mxu0 %v5792_v17  ;;  %5269 = vmatprep.mubr.msk.bf16.mxu0 %vm5965_vm1, %v5964_v2 }
 0x161   :  { %5267 = vmatprep.subr.bf16.mxu0 %v5964_v2  ;;  %5275 = vmatprep.mubr.msk.bf16.mxu1 %vm5965_vm1, %v5964_v2 }
 0x164   :  { %5268 = vmatpush3.bf16.msra.mxu0 %v5793_v19 }
 0x165   :  { %5279 = vmatprep.subr.bf16.mxu0 %v5964_v2 }
 0x167   :  { %5270 = vmatmul.mubr.msk.bf16.vlgmr.msra.gmra.mrb[8].mxu0 %vm286_vm3, %v6093_v18 }
 0x168   :  { %5281 = vmatprep.mubr.msk.bf16.mxu0 %vm5965_vm1, %v5964_v2 }
 0x232   :  { %v324_v20 = vpop.f32.mrb[4].mxu0  ;;  %v381_v21 = vpop.f32.mrb[4].mxu1 }
 0x233   :  { %v447_v22 = vpack.c.bf16 %v381_v21, %v381_v21  ;;  %v5255_v23 = vpop.f32.mrb[5].mxu0  ;;  %v5263_v24 = vpop.f32.mrb[5].mxu1  ;;  %v445_v33 = vpack.c.bf16 %v324_v20, %v324_v20 }
 0x234   :  { %v327_v25 = vpop.f32.mrb[6].mxu0  ;;  %v384_v26 = vpop.f32.mrb[6].mxu1 }
 0x235   :  { %v454_v27 = vsel %vm449_vm4, %v447_v22, 0  ;;  %v448_v28 = vpack.c.bf16 %v384_v26, %v384_v26  ;;  %v5256_v29 = vpop.f32.mrb[7].mxu0  ;;  %v5264_v30 = vpop.f32.mrb[7].mxu1  ;;  %v446_v37 = vpack.c.bf16 %v327_v25, %v327_v25 }
 0x236   :  { %5274 = vmatpush3.bf16.xpose.msra.mxu1 %v454_v27 }
 0x237   :  { %v500_v31 = vsel %vm449_vm4, %v448_v28, 0  ;;  %5285 = vmatprep.subr.bf16.mxu1 %v5964_v2 }
 0x238   :  { %5280 = vmatpush3.bf16.xpose.msra.mxu0 %v500_v31 }
 0x239   :  { %5291 = vmatprep.subr.bf16.mxu0 %v5964_v2 }
 0x23a   :  { %v438_v32 = vpop.f32.mrb[8].mxu0 }
 0x23b   :  { %v568_v34 = vpack.c.bf16 %v438_v32, %v438_v32  ;;  %v5271_v35 = vpop.f32.mrb[9].mxu0 }
 0x23c   :  { %v441_v36 = vpop.f32.mrb[10].mxu0 }
 0x23d   :  { %v574_v38 = vsel %vm88_vm0, %v568_v34, 0  ;;  %v569_v39 = vpack.c.bf16 %v441_v36, %v441_v36  ;;  %v5272_v40 = vpop.f32.mrb[11].mxu0  ;;  %5276 = vmatmul.mubr.msk.bf16.vlgmr.msra.gmra.mrb[8].mxu1 %vm449_vm4, %v445_v33 }
 0x23e   :  { %5286 = vmatpush3.bf16.msra.mxu1 %v574_v38  ;;  %5287 = vmatprep.mubr.msk.bf16.mxu1 %vm5965_vm1, %v5964_v2 }
 0x23f   :  { %v620_v41 = vsel %vm88_vm0, %v569_v39, 0  ;;  %5282 = vmatmul.mubr.msk.bf16.vlgmr.msra.gmra.mrb[12].mxu0 %vm449_vm4, %v446_v37  ;;  %5297 = vmatprep.subr.bf16.mxu1 %v5964_v2 }
 0x240   :  { %5292 = vmatpush3.bf16.msra.mxu0 %v620_v41  ;;  %5293 = vmatprep.mubr.msk.bf16.mxu0 %vm5965_vm1, %v5964_v2 }
 0x241   :  { %5305 = vmatprep.subr.bf16.mxu0 %v5964_v2 }
 0x310   :  { %v490_v42 = vpop.f32.mrb[8].mxu1 }
 0x311   :  { %v5277_v43 = vpop.f32.mrb[9].mxu1  ;;  %v542_v50 = vmul.f32 0.35355338, %v490_v42 }
 0x312   :  { %v493_v44 = vpop.f32.mrb[10].mxu1  ;;  %v536_v45 = vpop.f32.mrb[12].mxu0 }
 0x313   :  { %v543_v46 = vmul.f32 0.35355338, %v536_v45  ;;  %v5278_v47 = vpop.f32.mrb[11].mxu1  ;;  %v5283_v48 = vpop.f32.mrb[13].mxu0  ;;  %v544_v53 = vsel %vm449_vm4, %v542_v50, -inf }
 0x314   :  { %v539_v49 = vpop.f32.mrb[14].mxu0 }
 0x315   :  { %v5284_v51 = vpop.f32.mrb[15].mxu0  ;;  %v547_v52 = vsel %vm449_vm4, %v543_v46, -inf }
 0x316   :  { %548 = vmax.xlane.f32.xlu1 %v547_v52 }
 0x31a   :  { %545 = vmax.xlane.f32.xlu1 %v544_v53 }
 0x3a3   :  { %v549_v54 = vpop.xlane.xlu1 %548 }
 0x3a4   :  { %v551_v55 = vsub.f32 %v543_v46, %v549_v54 }
 0x3a6   :  { %v554_v56 = vmul.f32 1.442695, %v551_v55 }
 0x3a7   :  { %v546_v57 = vpop.xlane.xlu1 %545 }
 0x3a8   :  { %5864 = vpow2.f32 %v554_v56  ;;  %v550_v58 = vsub.f32 %v542_v50, %v546_v57 }
 0x3aa   :  { %v552_v59 = vmul.f32 1.442695, %v550_v58 }
 0x3ac   :  { %5866 = vpow2.f32 %v552_v59 }
 0x3b2   :  { %v5865_v60 = vpop.eup %5864 }
 0x3b3   :  { %v559_v61 = vsel %vm449_vm4, %v5865_v60, 0.0 }
 0x3b4   :  { %560 = vadd.xlane.f32.xlu0 %v559_v61 }
 0x3b6   :  { %v5867_v62 = vpop.eup %5866 }
 0x3b7   :  { %v556_v63 = vsel %vm449_vm4, %v5867_v62, 0.0 }
 0x3b8   :  { %557 = vadd.xlane.f32.xlu1 %v556_v63 }
 0x441   :  { %v561_v0 = vpop.xlane.xlu0 %560 }
 0x442   :  { %5868 = vrcp.f32 %v561_v0 }
 0x445   :  { %v558_v1 = vpop.xlane.xlu1 %557 }
 0x446   :  { %5870 = vrcp.f32 %v558_v1 }
 0x44c   :  { %v5869_v3 = vpop.eup %5868 }
 0x44d   :  { %v565_v4 = vmul.f32 %v5869_v3, %v5865_v60 }
 0x44f   :  { %v567_v6 = vpack.c.bf16 %v565_v4, %v565_v4 }
 0x450   :  { %v5871_v7 = vpop.eup %5870 }
 0x451   :  { %v564_v8 = vmul.f32 %v5871_v7, %v5867_v62  ;;  %5294 = vmatmul.mubr.msk.bf16.vlgmr.msra.gmra.mrb[16].mxu0 %vm449_vm4, %v567_v6 }
 0x452   :  { %5306 = vmatpush3.bf16.msra.mxu0 %v5794_v5  ;;  %5309 = vmatprep.mubr.msk.bf16.mxu0 %vm5965_vm1, %v5964_v2 }
 0x453   :  { %v566_v11 = vpack.c.bf16 %v564_v8, %v564_v8  ;;  %5307 = vmatprep.subr.bf16.mxu0 %v5964_v2 }
 0x455   :  { %5288 = vmatmul.mubr.msk.bf16.vlgmr.msra.gmra.mrb[12].mxu1 %vm449_vm4, %v566_v11 }
 0x456   :  { %5298 = vmatpush3.bf16.msra.mxu1 %v5795_v9  ;;  %5308 = vmatpush3.bf16.msra.mxu0 %v5796_v10 }
 0x457   :  { %5299 = vmatprep.subr.bf16.mxu1 %v5964_v2  ;;  %5301 = vmatprep.mubr.msk.bf16.mxu1 %vm5965_vm1, %v5964_v2 }
 0x458   :  { %5321 = vmatprep.subr.bf16.mxu0 %v5964_v2 }
 0x459   :  { %5310 = vmatmul.mubr.msk.bf16.vlgmr.msra.gmra.mrb[20].mxu0 %vm286_vm3, %v6093_v18 }
 0x45a   :  { %5300 = vmatpush3.bf16.msra.mxu1 %v5797_v12  ;;  %5323 = vmatprep.mubr.msk.bf16.mxu0 %vm5965_vm1, %v5964_v2 }
 0x45b   :  { %5313 = vmatprep.subr.bf16.mxu1 %v5964_v2 }
 0x45d   :  { %5302 = vmatmul.mubr.msk.bf16.vlgmr.msra.gmra.mrb[16].mxu1 %vm286_vm3, %v6093_v18 }
 0x45e   :  { %5314 = vmatpush3.bf16.msra.mxu1 %v5798_v13  ;;  %5317 = vmatprep.mubr.msk.bf16.mxu1 %vm5965_vm1, %v5964_v2 }
 0x45f   :  { %5315 = vmatprep.subr.bf16.mxu1 %v5964_v2 }
 0x462   :  { %5316 = vmatpush3.bf16.msra.mxu1 %v5799_v16  ;;  %v663_v16 = vld [vmem:[%s6901_s6] sm:$0xf] }
 0x463   :  { %5327 = vmatprep.subr.bf16.mxu1 %v5964_v2 }
 0x465   :  { %5318 = vmatmul.mubr.msk.bf16.vlgmr.msra.gmra.mrb[20].mxu1 %vm286_vm3, %v6093_v18 }
 0x466   :  { %5329 = vmatprep.mubr.msk.bf16.mxu1 %vm5965_vm1, %v5964_v2 }
 0x524   :  { %v6172_v17 = vpop.f32.mrb[16].mxu0 }
 0x525   :  { %v5295_v19 = vpop.f32.mrb[17].mxu0 }
 0x526   :  { %v659_v20 = vpop.f32.mrb[18].mxu0 }
 0x527   :  { %v5296_v21 = vpop.f32.mrb[19].mxu0 }
 0x528   :  { %v6174_v22 = vpop.f32.mrb[12].mxu1  ;;  %v1108_v21 = vsel %vm88_vm0, %v663_v16, 0 }
 0x529   :  { %v662_v23 = vpack.c.bf16 %v6172_v17, %v6174_v22  ;;  %v5289_v24 = vpop.f32.mrb[13].mxu1  ;;  %v4790_v17 = vld [vmem:[%s6901_s6 + $0x4] sm:$0xf] }
 0x52a   :  { %v613_v25 = vpop.f32.mrb[14].mxu1  ;;  %v5800_v24 = vld [vmem:[%s6899_s4 + $0x20] sm:$0xff]   ;;  %v1061_v22 = vsel %vm88_vm0, %v4790_v17, 0 }
 0x52b   :  { %v5290_v26 = vpop.f32.mrb[15].mxu1  ;;  %v5801_v25 = vld [vmem:[%s6899_s4 + $0x28] sm:$0xff]  }
 0x52c   :  { %v773_v27 = vpop.f32.mrb[20].mxu0 }
 0x52d   :  { %v840_v28 = vpack.c.bf16 %v773_v27, %v773_v27  ;;  %v5311_v29 = vpop.f32.mrb[21].mxu0 }
 0x52e   :  { %v776_v30 = vpop.f32.mrb[22].mxu0 }
 0x52f   :  { %v846_v31 = vsel %vm449_vm4, %v840_v28, 0  ;;  %v841_v32 = vpack.c.bf16 %v776_v30, %v776_v30  ;;  %v5312_v33 = vpop.f32.mrb[23].mxu0  ;;  %v5802_v30 = vld [vmem:[%s6898_s3 + $0x20] sm:$0xff]  }
 0x530   :  { %v715_v34 = vpop.f32.mrb[16].mxu1  ;;  %5322 = vmatpush3.bf16.xpose.msra.mxu0 %v846_v31 }
 0x531   :  { %v892_v35 = vsel %vm449_vm4, %v841_v32, 0  ;;  %v5303_v36 = vpop.f32.mrb[17].mxu1  ;;  %5333 = vmatprep.subr.bf16.mxu0 %v5964_v2  ;;  %v838_v39 = vpack.c.bf16 %v715_v34, %v715_v34 }
 0x532   :  { %v718_v37 = vpop.f32.mrb[18].mxu1  ;;  %5328 = vmatpush3.bf16.xpose.msra.mxu1 %v892_v35  ;;  %v5803_v35 = vld [vmem:[%s6898_s3 + $0x28] sm:$0xff]  }
 0x533   :  { %v5304_v38 = vpop.f32.mrb[19].mxu1  ;;  %5339 = vmatprep.subr.bf16.mxu1 %v5964_v2  ;;  %v839_v40 = vpack.c.bf16 %v718_v37, %v718_v37  ;;  %v5804_v37 = vld [vmem:[%s6900_s5 + $0x20] sm:$0xff]  }
 0x537   :  { %5324 = vmatmul.mubr.msk.bf16.vlgmr.msra.gmra.mrb[24].mxu0 %vm449_vm4, %v838_v39 }
 0x538   :  { %v831_v41 = vpop.f32.mrb[20].mxu1  ;;  %5335 = vmatprep.mubr.msk.bf16.mxu0 %vm5965_vm1, %v5964_v2 }
 0x539   :  { %v960_v42 = vpack.c.bf16 %v831_v41, %v831_v41  ;;  %v5319_v43 = vpop.f32.mrb[21].mxu1  ;;  %5330 = vmatmul.mubr.msk.bf16.vlgmr.msra.gmra.mrb[24].mxu1 %vm449_vm4, %v839_v40  ;;  %v5805_v41 = vld [vmem:[%s6900_s5 + $0x28] sm:$0xff]  }
 0x53a   :  { %v834_v44 = vpop.f32.mrb[22].mxu1  ;;  %5341 = vmatprep.mubr.msk.bf16.mxu1 %vm5965_vm1, %v5964_v2 }
 0x53b   :  { %v966_v45 = vsel %vm88_vm0, %v960_v42, 0  ;;  %v961_v46 = vpack.c.bf16 %v834_v44, %v834_v44  ;;  %v5320_v47 = vpop.f32.mrb[23].mxu1 }
 0x53c   :  { %5334 = vmatpush3.bf16.msra.mxu0 %v966_v45 }
 0x53d   :  { %v1012_v48 = vsel %vm88_vm0, %v961_v46, 0  ;;  %5345 = vmatprep.subr.bf16.mxu0 %v5964_v2 }
 0x53e   :  { %5340 = vmatpush3.bf16.msra.mxu1 %v1012_v48 }
 0x53f   :  { %5351 = vmatprep.subr.bf16.mxu1 %v5964_v2 }
 0x60a   :  { %v882_v49 = vpop.f32.mrb[24].mxu0 }
 0x60b   :  { %v934_v50 = vmul.f32 0.35355338, %v882_v49  ;;  %v5325_v51 = vpop.f32.mrb[25].mxu0 }
 0x60c   :  { %v885_v52 = vpop.f32.mrb[26].mxu0  ;;  %v928_v53 = vpop.f32.mrb[24].mxu1 }
 0x60d   :  { %v935_v54 = vmul.f32 0.35355338, %v928_v53  ;;  %v5326_v55 = vpop.f32.mrb[27].mxu0  ;;  %v5331_v56 = vpop.f32.mrb[25].mxu1  ;;  %v936_v57 = vsel %vm449_vm4, %v934_v50, -inf }
 0x60e   :  { %v931_v58 = vpop.f32.mrb[26].mxu1  ;;  %937 = vmax.xlane.f32.xlu1 %v936_v57 }
 0x60f   :  { %v5332_v59 = vpop.f32.mrb[27].mxu1  ;;  %v939_v60 = vsel %vm449_vm4, %v935_v54, -inf }
 0x612   :  { %940 = vmax.xlane.f32.xlu1 %v939_v60 }
 0x69b   :  { %v938_v61 = vpop.xlane.xlu1 %937 }
 0x69c   :  { %v942_v62 = vsub.f32 %v934_v50, %v938_v61 }
 0x69e   :  { %v944_v63 = vmul.f32 1.442695, %v942_v62 }
 0x69f   :  { %v941_v0 = vpop.xlane.xlu1 %940 }
 0x6a0   :  { %5872 = vpow2.f32 %v944_v63  ;;  %v943_v1 = vsub.f32 %v935_v54, %v941_v0 }
 0x6a2   :  { %v946_v3 = vmul.f32 1.442695, %v943_v1 }
 0x6a4   :  { %5874 = vpow2.f32 %v946_v3 }
 0x6aa   :  { %v5873_v4 = vpop.eup %5872 }
 0x6ab   :  { %v948_v5 = vsel %vm449_vm4, %v5873_v4, 0.0 }
 0x6ac   :  { %949 = vadd.xlane.f32.xlu1 %v948_v5 }
 0x6ae   :  { %v5875_v6 = vpop.eup %5874 }
 0x6af   :  { %v951_v7 = vsel %vm449_vm4, %v5875_v6, 0.0 }
 0x6b0   :  { %952 = vadd.xlane.f32.xlu1 %v951_v7 }
 0x739   :  { %v950_v8 = vpop.xlane.xlu1 %949 }
 0x73a   :  { %5876 = vrcp.f32 %v950_v8 }
 0x73d   :  { %v953_v9 = vpop.xlane.xlu1 %952 }
 0x73e   :  { %5878 = vrcp.f32 %v953_v9 }
 0x744   :  { %v5877_v10 = vpop.eup %5876 }
 0x745   :  { %v956_v11 = vmul.f32 %v5877_v10, %v5873_v4 }
 0x747   :  { %v958_v12 = vpack.c.bf16 %v956_v11, %v956_v11 }
 0x748   :  { %v5879_v13 = vpop.eup %5878 }
 0x749   :  { %v957_v19 = vmul.f32 %v5879_v13, %v5875_v6  ;;  %5336 = vmatmul.mubr.msk.bf16.vlgmr.msra.gmra.mrb[28].mxu0 %vm449_vm4, %v958_v12 }
 0x74a   :  { %5347 = vmatprep.mubr.msk.bf16.mxu0 %vm5965_vm1, %v5964_v2  ;;  %5346 = vmatpush3.bf16.msra.mxu0 %v1061_v22 }
 0x74b   :  { %v959_v20 = vpack.c.bf16 %v957_v19, %v957_v19  ;;  %5357 = vmatprep.subr.bf16.mxu0 %v5964_v2 }
 0x74d   :  { %5342 = vmatmul.mubr.msk.bf16.vlgmr.msra.gmra.mrb[28].mxu1 %vm449_vm4, %v959_v20 }
 0x74e   :  { %5352 = vmatpush3.bf16.msra.mxu1 %v1108_v21  ;;  %5353 = vmatprep.mubr.msk.bf16.mxu1 %vm5965_vm1, %v5964_v2 }
 0x74f   :  { %5365 = vmatprep.subr.bf16.mxu1 %v5964_v2 }
 0x755   :  { %5354 = vmatmul.mubr.msk.bf16.vlgmr.msra.gmra.mrb[32].mxu1 %vm449_vm4, %v662_v23 }
 0x756   :  { %5366 = vmatpush3.bf16.msra.mxu1 %v5800_v24  ;;  %5369 = vmatprep.mubr.msk.bf16.mxu1 %vm5965_vm1, %v5964_v2 }
 0x757   :  { %5367 = vmatprep.subr.bf16.mxu1 %v5964_v2 }
 0x75a   :  { %5368 = vmatpush3.bf16.msra.mxu1 %v5801_v25 }
 0x75b   :  { %5381 = vmatprep.subr.bf16.mxu1 %v5964_v2 }
 0x75d   :  { %5370 = vmatmul.mubr.msk.bf16.vlgmr.msra.gmra.mrb[36].mxu1 %vm286_vm3, %v6093_v18 }
 0x75e   :  { %5383 = vmatprep.mubr.msk.bf16.mxu1 %vm5965_vm1, %v5964_v2 }
 0x81c   :  { %v1002_v23 = vpop.f32.mrb[28].mxu0 }
 0x81d   :  { %v5337_v26 = vpop.f32.mrb[29].mxu0 }
 0x81e   :  { %v1005_v27 = vpop.f32.mrb[30].mxu0 }
 0x81f   :  { %v5338_v28 = vpop.f32.mrb[31].mxu0 }
 0x820   :  { %v1048_v29 = vpop.f32.mrb[28].mxu1 }
 0x821   :  { %v1054_v31 = vpack.c.bf16 %v1048_v29, %v1002_v23  ;;  %v5343_v32 = vpop.f32.mrb[29].mxu1 }
 0x822   :  { %v1051_v33 = vpop.f32.mrb[30].mxu1 }
 0x823   :  { %v5344_v34 = vpop.f32.mrb[31].mxu1  ;;  %5348 = vmatmul.mubr.msk.bf16.vlgmr.msra.gmra.mrb[32].mxu0 %vm449_vm4, %v1054_v31 }
 0x824   :  { %5358 = vmatpush3.bf16.msra.mxu0 %v5802_v30  ;;  %5361 = vmatprep.mubr.msk.bf16.mxu0 %vm5965_vm1, %v5964_v2 }
 0x825   :  { %5359 = vmatprep.subr.bf16.mxu0 %v5964_v2 }
 0x828   :  { %5360 = vmatpush3.bf16.msra.mxu0 %v5803_v35  ;;  %v1144_v36 = vpop.f32.mrb[32].mxu1 }
 0x829   :  { %v5355_v38 = vpop.f32.mrb[33].mxu1  ;;  %5373 = vmatprep.subr.bf16.mxu0 %v5964_v2 }
 0x82a   :  { %v1147_v39 = vpop.f32.mrb[34].mxu1 }
 0x82b   :  { %v5356_v40 = vpop.f32.mrb[35].mxu1  ;;  %5362 = vmatmul.mubr.msk.bf16.vlgmr.msra.gmra.mrb[36].mxu0 %vm286_vm3, %v6093_v18 }
 0x82c   :  { %5374 = vmatpush3.bf16.msra.mxu0 %v5804_v37  ;;  %5377 = vmatprep.mubr.msk.bf16.mxu0 %vm5965_vm1, %v5964_v2 }
 0x82d   :  { %5375 = vmatprep.subr.bf16.mxu0 %v5964_v2 }
 0x830   :  { %5376 = vmatpush3.bf16.msra.mxu0 %v5805_v41  ;;  %v1260_v42 = vpop.f32.mrb[36].mxu1  ;;  %v5807_v41 = vld [vmem:[%s6898_s3 + $0x38] sm:$0xff]  }
 0x831   :  { %v1327_v43 = vpack.c.bf16 %v1260_v42, %v1260_v42  ;;  %v5371_v44 = vpop.f32.mrb[37].mxu1  ;;  %5387 = vmatprep.subr.bf16.mxu0 %v5964_v2  ;;  %v5808_v42 = vld [vmem:[%s6900_s5 + $0x30] sm:$0xff]  }
 0x832   :  { %v1263_v45 = vpop.f32.mrb[38].mxu1  ;;  %v4818_v44 = vld [vmem:[%s6901_s6 + $0x8] sm:$0xf] }
 0x833   :  { %v1333_v46 = vsel %vm449_vm4, %v1327_v43, 0  ;;  %v5372_v47 = vpop.f32.mrb[39].mxu1  ;;  %5378 = vmatmul.mubr.msk.bf16.vlgmr.msra.gmra.mrb[40].mxu0 %vm286_vm3, %v6093_v18  ;;  %v1328_v48 = vpack.c.bf16 %v1263_v45, %v1263_v45  ;;  %v5809_v43 = vld [vmem:[%s6900_s5 + $0x38] sm:$0xff]   ;;  %v1548_v45 = vsel %vm88_vm0, %v4818_v44, 0 }
 0x834   :  { %5382 = vmatpush3.bf16.xpose.msra.mxu1 %v1333_v46  ;;  %5389 = vmatprep.mubr.msk.bf16.mxu0 %vm5965_vm1, %v5964_v2 }
 0x835   :  { %5393 = vmatprep.subr.bf16.mxu1 %v5964_v2  ;;  %v1379_v49 = vsel %vm449_vm4, %v1328_v48, 0 }
 0x839   :  { %5388 = vmatpush3.bf16.xpose.msra.mxu0 %v1379_v49 }
 0x83a   :  { %5399 = vmatprep.subr.bf16.mxu0 %v5964_v2 }
 0x8f6   :  { %v1097_v50 = vpop.f32.mrb[32].mxu0 }
 0x8f7   :  { %v6261_v51 = vadd.f32 %v1144_v36, %v1097_v50  ;;  %v5349_v52 = vpop.f32.mrb[33].mxu0 }
 0x8f8   :  { %v1100_v53 = vpop.f32.mrb[34].mxu0  ;;  %v5810_v52 = vld [vmem:[%s6899_s4 + $0x30] sm:$0xff]  }
 0x8f9   :  { %v6263_v54 = vadd.f32 %v1147_v39, %v1100_v53  ;;  %v5350_v55 = vpop.f32.mrb[35].mxu0  ;;  %v5806_v39 = vld [vmem:[%s6898_s3 + $0x30] sm:$0xff]  }
 0x8fe   :  { %v1202_v56 = vpop.f32.mrb[36].mxu0 }
 0x8ff   :  { %v1325_v57 = vpack.c.bf16 %v1202_v56, %v1202_v56  ;;  %v5363_v58 = vpop.f32.mrb[37].mxu0 }
 0x900   :  { %v1205_v59 = vpop.f32.mrb[38].mxu0  ;;  %v5811_v58 = vld [vmem:[%s6899_s4 + $0x38] sm:$0xff]  }
 0x901   :  { %v1326_v60 = vpack.c.bf16 %v1205_v59, %v1205_v59  ;;  %v5364_v61 = vpop.f32.mrb[39].mxu0  ;;  %5384 = vmatmul.mubr.msk.bf16.vlgmr.msra.gmra.mrb[40].mxu1 %vm449_vm4, %v1325_v57 }
 0x902   :  { %5395 = vmatprep.mubr.msk.bf16.mxu1 %vm5965_vm1, %v5964_v2 }
 0x903   :  { %5390 = vmatmul.mubr.msk.bf16.vlgmr.msra.gmra.mrb[44].mxu0 %vm449_vm4, %v1326_v60 }
 0x904   :  { %5401 = vmatprep.mubr.msk.bf16.mxu0 %vm5965_vm1, %v5964_v2 }
 0x906   :  { %v1318_v62 = vpop.f32.mrb[40].mxu0 }
 0x907   :  { %v1447_v63 = vpack.c.bf16 %v1318_v62, %v1318_v62  ;;  %v5379_v0 = vpop.f32.mrb[41].mxu0 }
 0x908   :  { %v1321_v1 = vpop.f32.mrb[42].mxu0 }
 0x909   :  { %v1453_v3 = vsel %vm88_vm0, %v1447_v63, 0  ;;  %v1448_v4 = vpack.c.bf16 %v1321_v1, %v1321_v1  ;;  %v5380_v5 = vpop.f32.mrb[43].mxu0 }
 0x90a   :  { %5394 = vmatpush3.bf16.msra.mxu1 %v1453_v3 }
 0x90b   :  { %v1499_v6 = vsel %vm88_vm0, %v1448_v4, 0  ;;  %5405 = vmatprep.subr.bf16.mxu1 %v5964_v2 }
 0x90c   :  { %5400 = vmatpush3.bf16.msra.mxu0 %v1499_v6 }
 0x90d   :  { %5411 = vmatprep.subr.bf16.mxu0 %v5964_v2 }
 0x9d4   :  { %v1369_v7 = vpop.f32.mrb[40].mxu1 }
 0x9d5   :  { %v1421_v8 = vmul.f32 0.35355338, %v1369_v7  ;;  %v5385_v9 = vpop.f32.mrb[41].mxu1 }
 0x9d6   :  { %v1372_v10 = vpop.f32.mrb[42].mxu1  ;;  %v1415_v11 = vpop.f32.mrb[44].mxu0 }
 0x9d7   :  { %v1422_v12 = vmul.f32 0.35355338, %v1415_v11  ;;  %v5386_v13 = vpop.f32.mrb[43].mxu1  ;;  %v5391_v16 = vpop.f32.mrb[45].mxu0  ;;  %v1423_v19 = vsel %vm449_vm4, %v1421_v8, -inf }
 0x9d8   :  { %1424 = vmax.xlane.f32.xlu1 %v1423_v19  ;;  %v1418_v20 = vpop.f32.mrb[46].mxu0 }
 0x9d9   :  { %v5392_v21 = vpop.f32.mrb[47].mxu0  ;;  %v1426_v24 = vsel %vm449_vm4, %v1422_v12, -inf }
 0x9dc   :  { %1427 = vmax.xlane.f32.xlu1 %v1426_v24 }
 0xa65   :  { %v1425_v25 = vpop.xlane.xlu1 %1424 }
 0xa66   :  { %v1429_v17 = vsub.f32 %v1421_v8, %v1425_v25 }
 0xa68   :  { %v1431_v22 = vmul.f32 1.442695, %v1429_v17 }
 0xa69   :  { %v1428_v23 = vpop.xlane.xlu1 %1427 }
 0xa6a   :  { %5880 = vpow2.f32 %v1431_v22  ;;  %v1430_v26 = vsub.f32 %v1422_v12, %v1428_v23 }
 0xa6c   :  { %v1433_v27 = vmul.f32 1.442695, %v1430_v26 }
 0xa6e   :  { %5882 = vpow2.f32 %v1433_v27 }
 0xa74   :  { %v5881_v28 = vpop.eup %5880 }
 0xa75   :  { %v1435_v29 = vsel %vm449_vm4, %v5881_v28, 0.0 }
 0xa76   :  { %1436 = vadd.xlane.f32.xlu1 %v1435_v29 }
 0xa78   :  { %v5883_v30 = vpop.eup %5882 }
 0xa79   :  { %v1438_v31 = vsel %vm449_vm4, %v5883_v30, 0.0 }
 0xa7a   :  { %1439 = vadd.xlane.f32.xlu1 %v1438_v31 }
 0xb03   :  { %v1437_v32 = vpop.xlane.xlu1 %1436 }
 0xb04   :  { %5884 = vrcp.f32 %v1437_v32 }
 0xb07   :  { %v1440_v33 = vpop.xlane.xlu1 %1439 }
 0xb08   :  { %5886 = vrcp.f32 %v1440_v33 }
 0xb0e   :  { %v5885_v34 = vpop.eup %5884 }
 0xb0f   :  { %v1443_v35 = vmul.f32 %v5885_v34, %v5881_v28 }
 0xb11   :  { %v1445_v36 = vpack.c.bf16 %v1443_v35, %v1443_v35 }
 0xb12   :  { %v5887_v37 = vpop.eup %5886 }
 0xb13   :  { %v1444_v38 = vmul.f32 %v5887_v37, %v5883_v30  ;;  %5396 = vmatmul.mubr.msk.bf16.vlgmr.msra.gmra.mrb[44].mxu1 %vm449_vm4, %v1445_v36 }
 0xb14   :  { %5407 = vmatprep.mubr.msk.bf16.mxu1 %vm5965_vm1, %v5964_v2  ;;  %5406 = vmatpush3.bf16.msra.mxu1 %v1548_v45 }
 0xb15   :  { %v1446_v40 = vpack.c.bf16 %v1444_v38, %v1444_v38  ;;  %5419 = vmatprep.subr.bf16.mxu1 %v5964_v2 }
 0xb17   :  { %5402 = vmatmul.mubr.msk.bf16.vlgmr.msra.gmra.mrb[48].mxu0 %vm449_vm4, %v1446_v40 }
 0xb18   :  { %5412 = vmatpush3.bf16.msra.mxu0 %v5806_v39  ;;  %5415 = vmatprep.mubr.msk.bf16.mxu0 %vm5965_vm1, %v5964_v2 }
 0xb19   :  { %5413 = vmatprep.subr.bf16.mxu0 %v5964_v2 }
 0xb1c   :  { %5414 = vmatpush3.bf16.msra.mxu0 %v5807_v41 }
 0xb1d   :  { %5427 = vmatprep.subr.bf16.mxu0 %v5964_v2 }
 0xb1f   :  { %5416 = vmatmul.mubr.msk.bf16.vlgmr.msra.gmra.mrb[52].mxu0 %vm286_vm3, %v6093_v18 }
 0xb20   :  { %5428 = vmatpush3.bf16.msra.mxu0 %v5808_v42  ;;  %5431 = vmatprep.mubr.msk.bf16.mxu0 %vm5965_vm1, %v5964_v2 }
 0xb21   :  { %5429 = vmatprep.subr.bf16.mxu0 %v5964_v2 }
 0xb24   :  { %5430 = vmatpush3.bf16.msra.mxu0 %v5809_v43 }
 0xb25   :  { %5441 = vmatprep.subr.bf16.mxu0 %v5964_v2 }
 0xb27   :  { %5432 = vmatmul.mubr.msk.bf16.vlgmr.msra.gmra.mrb[56].mxu0 %vm286_vm3, %v6093_v18 }
 0xb28   :  { %5443 = vmatprep.mubr.msk.bf16.mxu0 %vm5965_vm1, %v5964_v2 }
 0xbe6   :  { %v1489_v46 = vpop.f32.mrb[44].mxu1 }
 0xbe7   :  { %v5397_v47 = vpop.f32.mrb[45].mxu1 }
 0xbe8   :  { %v1492_v48 = vpop.f32.mrb[46].mxu1 }
 0xbe9   :  { %v5398_v49 = vpop.f32.mrb[47].mxu1 }
 0xbea   :  { %v1535_v50 = vpop.f32.mrb[48].mxu0 }
 0xbeb   :  { %v1541_v53 = vpack.c.bf16 %v1535_v50, %v1489_v46  ;;  %v5403_v55 = vpop.f32.mrb[49].mxu0 }
 0xbec   :  { %v1538_v56 = vpop.f32.mrb[50].mxu0 }
 0xbed   :  { %v5404_v57 = vpop.f32.mrb[51].mxu0  ;;  %5408 = vmatmul.mubr.msk.bf16.vlgmr.msra.gmra.mrb[48].mxu1 %vm449_vm4, %v1541_v53  ;;  %v4845_v56 = vld [vmem:[%s6901_s6 + $0xc] sm:$0xf] }
 0xbee   :  { %5420 = vmatpush3.bf16.msra.mxu1 %v5810_v52  ;;  %5423 = vmatprep.mubr.msk.bf16.mxu1 %vm5965_vm1, %v5964_v2  ;;  %v1990_v57 = vsel %vm88_vm0, %v4845_v56, 0 }
 0xbef   :  { %5421 = vmatprep.subr.bf16.mxu1 %v5964_v2 }
 0xbf2   :  { %v1644_v59 = vpop.f32.mrb[52].mxu0  ;;  %5422 = vmatpush3.bf16.msra.mxu1 %v5811_v58 }
 0xbf3   :  { %v5417_v60 = vpop.f32.mrb[53].mxu0  ;;  %5435 = vmatprep.subr.bf16.mxu1 %v5964_v2 }
 0xbf4   :  { %v1647_v61 = vpop.f32.mrb[54].mxu0 }
 0xbf5   :  { %v5418_v62 = vpop.f32.mrb[55].mxu0  ;;  %5424 = vmatmul.mubr.msk.bf16.vlgmr.msra.gmra.mrb[52].mxu1 %vm286_vm3, %v6093_v18  ;;  %v1768_v24 = vpack.c.bf16 %v1647_v61, %v1647_v61 }
 0xbf6   :  { %5437 = vmatprep.mubr.msk.bf16.mxu1 %vm5965_vm1, %v5964_v2 }
 0xbfa   :  { %v1760_v63 = vpop.f32.mrb[56].mxu0 }
 0xbfb   :  { %v5433_v0 = vpop.f32.mrb[57].mxu0 }
 0xbfc   :  { %v1763_v1 = vpop.f32.mrb[58].mxu0 }
 0xbfd   :  { %v5434_v3 = vpop.f32.mrb[59].mxu0  ;;  %v1890_v21 = vpack.c.bf16 %v1763_v1, %v1763_v1 }
 0xbff   :  { %v1941_v17 = vsel %vm88_vm0, %v1890_v21, 0 }
 0xcc0   :  { %v1584_v4 = vpop.f32.mrb[48].mxu1 }
 0xcc1   :  { %v6330_v5 = vadd.f32 %v1584_v4, %v6261_v51  ;;  %v5409_v6 = vpop.f32.mrb[49].mxu1  ;;  %v1889_v51 = vpack.c.bf16 %v1760_v63, %v1760_v63  ;;  %v5812_v4 = vld [vmem:[%s6903_s8] sm:$0xff]  }
 0xcc2   :  { %v1587_v7 = vpop.f32.mrb[50].mxu1  ;;  %v5813_v6 = vld [vmem:[%s6903_s8 + $0x8] sm:$0xff]  }
 0xcc3   :  { %v6333_v8 = vadd.f32 %v1587_v7, %v6263_v54  ;;  %v5410_v9 = vpop.f32.mrb[51].mxu1  ;;  %v1767_v54 = vpack.c.bf16 %v1644_v59, %v1644_v59  ;;  %v1895_v25 = vsel %vm88_vm0, %v1889_v51, 0  ;;  %v2038_v7 = vlaneseq }
 0xcc5   :  { %v6375_v9 = vshrl.u32 %v2038_v7, 7  ;;  %v5822_v7 = vld [vmem:[%s6899_s4 + $0x40] sm:$0xff]  }
 0xcc8   :  { %v1702_v10 = vpop.f32.mrb[52].mxu1 }
 0xcc9   :  { %v1769_v11 = vpack.c.bf16 %v1702_v10, %v1702_v10  ;;  %v5425_v18 = vpop.f32.mrb[53].mxu1  ;;  %v2040_v10 = vsub.s32 0, %v6375_v9 }
 0xcca   :  { %v1705_v12 = vpop.f32.mrb[54].mxu1 }
 0xccb   :  { %v1775_v13 = vsel %vm449_vm4, %v1769_v11, 0  ;;  %v1770_v16 = vpack.c.bf16 %v1705_v12, %v1705_v12  ;;  %v5426_v19 = vpop.f32.mrb[55].mxu1  ;;  %v6381_v11 = vld [vmem:[%s6902_s7] sm:$0xf] }
 0xccc   :  { %5436 = vmatpush3.bf16.xpose.msra.mxu1 %v1775_v13  ;;  %v2041_v13 = vrot.slane %v6381_v11, %v2040_v10 }
 0xccd   :  { %v1821_v20 = vsel %vm449_vm4, %v1770_v16, 0  ;;  %5447 = vmatprep.subr.bf16.mxu1 %v5964_v2  ;;  %v2046_v16 = vsub.s32 1, %v6375_v9 }
 0xcce   :  { %5442 = vmatpush3.bf16.xpose.msra.mxu0 %v1821_v20 }
 0xccf   :  { %5453 = vmatprep.subr.bf16.mxu0 %v5964_v2 }
 0xcd3   :  { %5438 = vmatmul.mubr.msk.bf16.vlgmr.msra.gmra.mrb[56].mxu1 %vm449_vm4, %v1767_v54 }
 0xcd4   :  { %5448 = vmatpush3.bf16.msra.mxu1 %v1895_v25  ;;  %5449 = vmatprep.mubr.msk.bf16.mxu1 %vm5965_vm1, %v5964_v2  ;;  %v2047_v25 = vrot.slane %v6381_v11, %v2046_v16 }
 0xcd5   :  { %5444 = vmatmul.mubr.msk.bf16.vlgmr.msra.gmra.mrb[60].mxu0 %vm449_vm4, %v1768_v24  ;;  %5459 = vmatprep.subr.bf16.mxu1 %v5964_v2 }
 0xcd6   :  { %5454 = vmatpush3.bf16.msra.mxu0 %v1941_v17  ;;  %5455 = vmatprep.mubr.msk.bf16.mxu0 %vm5965_vm1, %v5964_v2 }
 0xcd7   :  { %5465 = vmatprep.subr.bf16.mxu0 %v5964_v2 }
 0xda6   :  { %v1811_v22 = vpop.f32.mrb[56].mxu1 }
 0xda7   :  { %v1863_v23 = vmul.f32 0.35355338, %v1811_v22  ;;  %v5439_v26 = vpop.f32.mrb[57].mxu1 }
 0xda8   :  { %v1814_v27 = vpop.f32.mrb[58].mxu1  ;;  %v1857_v28 = vpop.f32.mrb[60].mxu0 }
 0xda9   :  { %v1864_v29 = vmul.f32 0.35355338, %v1857_v28  ;;  %v5440_v30 = vpop.f32.mrb[59].mxu1  ;;  %v5445_v31 = vpop.f32.mrb[61].mxu0  ;;  %v1865_v32 = vsel %vm449_vm4, %v1863_v23, -inf  ;;  %v5817_v27 = vld [vmem:[%s6905_s10 + $0x18] sm:$0xff]  }
 0xdaa   :  { %1866 = vmax.xlane.f32.xlu1 %v1865_v32  ;;  %v1860_v33 = vpop.f32.mrb[62].mxu0  ;;  %v4847_v28 = vld [vmem:[%s6904_s9] ss:$0 sm:$0xff] }
 0xdab   :  { %v5446_v34 = vpop.f32.mrb[63].mxu0  ;;  %v1868_v35 = vsel %vm449_vm4, %v1864_v29, -inf }
 0xdae   :  { %1869 = vmax.xlane.f32.xlu1 %v1868_v35 }
 0xe37   :  { %v1867_v36 = vpop.xlane.xlu1 %1866 }
 0xe38   :  { %v1871_v37 = vsub.f32 %v1863_v23, %v1867_v36 }
 0xe3a   :  { %v1873_v38 = vmul.f32 1.442695, %v1871_v37 }
 0xe3b   :  { %v1870_v39 = vpop.xlane.xlu1 %1869 }
 0xe3c   :  { %5888 = vpow2.f32 %v1873_v38  ;;  %v1872_v40 = vsub.f32 %v1864_v29, %v1870_v39 }
 0xe3e   :  { %v1875_v41 = vmul.f32 1.442695, %v1872_v40 }
 0xe40   :  { %5890 = vpow2.f32 %v1875_v41 }
 0xe46   :  { %v5889_v42 = vpop.eup %5888 }
 0xe47   :  { %v1877_v43 = vsel %vm449_vm4, %v5889_v42, 0.0 }
 0xe48   :  { %1878 = vadd.xlane.f32.xlu1 %v1877_v43 }
 0xe4a   :  { %v5891_v44 = vpop.eup %5890 }
 0xe4b   :  { %v1880_v45 = vsel %vm449_vm4, %v5891_v44, 0.0 }
 0xe4c   :  { %1881 = vadd.xlane.f32.xlu0 %v1880_v45 }
 0xed5   :  { %v1879_v46 = vpop.xlane.xlu1 %1878 }
 0xed6   :  { %5892 = vrcp.f32 %v1879_v46  ;;  %v5818_v46 = vld [vmem:[%s6898_s3 + $0x40] sm:$0xff]  }
 0xed9   :  { %v1882_v47 = vpop.xlane.xlu0 %1881 }
 0xeda   :  { %5894 = vrcp.f32 %v1882_v47  ;;  %v5819_v47 = vld [vmem:[%s6900_s5 + $0x40] sm:$0xff]  }
 0xee0   :  { %v5893_v48 = vpop.eup %5892 }
 0xee1   :  { %v1885_v49 = vmul.f32 %v5893_v48, %v5889_v42  ;;  %v5820_v48 = vld [vmem:[%s6898_s3 + $0x48] sm:$0xff]  }
 0xee3   :  { %v1887_v50 = vpack.c.bf16 %v1885_v49, %v1885_v49  ;;  %v5821_v49 = vld [vmem:[%s6900_s5 + $0x48] sm:$0xff]  }
 0xee4   :  { %v5895_v52 = vpop.eup %5894 }
 0xee5   :  { %v1886_v53 = vmul.f32 %v5895_v52, %v5891_v44  ;;  %5450 = vmatmul.mubr.msk.bf16.vlgmr.msra.gmra.mrb[60].mxu1 %vm449_vm4, %v1887_v50  ;;  %v2217_v50 = vsub.s32 2, %v6375_v9  ;;  %v4851_v52 = vld [vmem:[%s6906_s11] ss:$0 sm:$0xff] }
 0xee6   :  { %5461 = vmatprep.mubr.msk.bf16.mxu1 %vm5965_vm1, %v5964_v2  ;;  %5460 = vmatpush3.bf16.msra.mxu1 %v1990_v57  ;;  %v2223_v57 = vsub.s32 3, %v6375_v9 }
 0xee7   :  { %v1888_v55 = vpack.c.bf16 %v1886_v53, %v1886_v53  ;;  %5473 = vmatprep.subr.bf16.mxu1 %v5964_v2  ;;  %v2218_v56 = vrot.slane %v6381_v11, %v2217_v50 }
 0xee9   :  { %5456 = vmatmul.mubr.msk.bf16.vlgmr.msra.gmra.mrb[64].mxu0 %vm449_vm4, %v1888_v55 }
 0xeea   :  { %5469 = vmatprep.mubr.msk.bf16.mxu0 %vm5965_vm1, %v5964_v2  ;;  %5466 = vmatpush3.bf16.msra.mxu0 %v5812_v4 }
 0xeeb   :  { %5467 = vmatprep.subr.bf16.mxu0 %v5964_v2 }
 0xeee   :  { %5468 = vmatpush3.bf16.msra.mxu0 %v5813_v6 }
 0xeef   :  { %5485 = vmatprep.subr.bf16.mxu0 %v5964_v2 }
 0xfb8   :  { %v1931_v58 = vpop.f32.mrb[60].mxu1 }
 0xfb9   :  { %v5451_v59 = vpop.f32.mrb[61].mxu1 }
 0xfba   :  { %v1934_v60 = vpop.f32.mrb[62].mxu1 }
 0xfbb   :  { %v5452_v61 = vpop.f32.mrb[63].mxu1 }
 0xfbc   :  { %v1977_v62 = vpop.f32.mrb[64].mxu0 }
 0xfbd   :  { %v1983_v63 = vpack.c.bf16 %v1977_v62, %v1931_v58  ;;  %v5457_v0 = vpop.f32.mrb[65].mxu0 }
 0xfbe   :  { %v1980_v1 = vpop.f32.mrb[66].mxu0  ;;  %v2224_v0 = vrot.slane %v6381_v11, %v2223_v57  ;;  %v5823_v11 = vld [vmem:[%s6899_s4 + $0x48] sm:$0xff]  }
 0xfbf   :  { %v5458_v3 = vpop.f32.mrb[67].mxu0  ;;  %5462 = vmatmul.mubr.msk.bf16.vlgmr.msra.gmra.mrb[64].mxu1 %vm449_vm4, %v1983_v63 }
 0xfc0   :  { %5481 = vmatprep.mubr.msk.bf16.mxu1 %vm5965_vm1, %v5964_v2 }
0x1092   :  { %v2026_v18 = vpop.f32.mrb[64].mxu1 }
0x1093   :  { %v2033_v12 = vadd.f32 %v2026_v18, %v6330_v5  ;;  %v5463_v19 = vpop.f32.mrb[65].mxu1 }
0x1094   :  { %v2029_v20 = vpop.f32.mrb[66].mxu1 }
0x1095   :  { %v2035_v51 = vadd.f32 %v2033_v12, %v6084_v14  ;;  %v2034_v54 = vadd.f32 %v2029_v20, %v6333_v8  ;;  %v5464_v21 = vpop.f32.mrb[67].mxu1  ;;  %v5814_v14 = vld [vmem:[%s6905_s10] sm:$0xff]   ;;  %v5816_v8 = vld [vmem:[%s6905_s10 + $0x10] sm:$0xff]  }
0x1096   :  { %5474 = vmatpush3.bf16.msra.mxu1 %v5814_v14 }
0x1097   :  { %v2042_v24 = vmul.f32 %v2041_v13, %v2035_v51  ;;  %v2036_v5 = vadd.f32 %v2034_v54, %v6086_v15  ;;  %5475 = vmatprep.subr.bf16.mxu1 %v5964_v2  ;;  %v5815_v15 = vld [vmem:[%s6905_s10 + $0x8] sm:$0xff]  }
0x1099   :  { %v2043_v17 = vmul.f32 %v2041_v13, %v2036_v5  ;;  %v2048_v22 = vadd.f32 %v2047_v25, %v2042_v24 }
0x109a   :  { %5476 = vmatpush3.bf16.msra.mxu1 %v5815_v15 }
0x109b   :  { %v6394_v23 = vadd.f32 %v2047_v25, %v2043_v17  ;;  %5477 = vmatprep.subr.bf16.mxu1 %v5964_v2 }
0x109d   :  { %v2050_v26 = vpack.c.bf16 %v6394_v23, %v2048_v22 }
0x109e   :  { %5478 = vmatpush3.bf16.msra.mxu1 %v5816_v8 }
0x109f   :  { %5470 = vmatmul.mubr.msk.bf16.vlgmr.msra.gmra.mrb[68].mxu0 %vm286_vm3, %v2050_v26  ;;  %5479 = vmatprep.subr.bf16.mxu1 %v5964_v2 }
0x10a0   :  { %5489 = vmatprep.mubr.msk.bf16.mxu0 %vm5965_vm1, %v5964_v2  ;;  %5486 = vmatpush3.bf16.msra.mxu0 %v5818_v46 }
0x10a1   :  { %5487 = vmatprep.subr.bf16.mxu0 %v5964_v2 }
0x10a2   :  { %5480 = vmatpush3.bf16.msra.mxu1 %v5817_v27 }
0x10a3   :  { %5501 = vmatprep.subr.bf16.mxu1 %v5964_v2 }
0x10a4   :  { %5488 = vmatpush3.bf16.msra.mxu0 %v5820_v48 }
0x10a5   :  { %5493 = vmatprep.subr.bf16.mxu0 %v5964_v2 }
0x1172   :  { %v2111_v29 = vpop.f32.mrb[68].mxu0 }
0x1173   :  { %v2112_v30 = vadd.f32 %v4847_v28, %v2111_v29  ;;  %v5471_v31 = vpop.f32.mrb[69].mxu0 }
0x1174   :  { %v2114_v32 = vpop.f32.mrb[70].mxu0 }
0x1175   :  { %v2120_v33 = vmul.f32 0.70710677, %v2112_v30  ;;  %v2115_v34 = vadd.f32 %v4847_v28, %v2114_v32  ;;  %v5472_v35 = vpop.f32.mrb[71].mxu0  ;;  %v2118_v40 = vmul.f32 0.5, %v2112_v30 }
0x1177   :  { %5896 = verf.f32 %v2120_v33  ;;  %v2121_v36 = vmul.f32 0.70710677, %v2115_v34  ;;  %v2119_v41 = vmul.f32 0.5, %v2115_v34 }
0x1179   :  { %5898 = verf.f32 %v2121_v36 }
0x1181   :  { %v5897_v37 = vpop.eup %5896 }
0x1182   :  { %v2124_v38 = vadd.f32 1.0, %v5897_v37 }
0x1183   :  { %v5899_v39 = vpop.eup %5898 }
0x1184   :  { %v2125_v42 = vadd.f32 1.0, %v5899_v39  ;;  %v2126_v43 = vmul.f32 %v2124_v38, %v2118_v40 }
0x1186   :  { %v2127_v44 = vmul.f32 %v2125_v42, %v2119_v41 }
0x1188   :  { %v2128_v45 = vpack.c.bf16 %v2127_v44, %v2126_v43 }
0x118a   :  { %5482 = vmatmul.mubr.msk.bf16.vlgmr.msra.gmra.mrb[68].mxu1 %vm2168_vm5, %v2128_v45 }
0x118b   :  { %5505 = vmatprep.mubr.msk.bf16.mxu1 %vm5965_vm1, %v5964_v2  ;;  %5502 = vmatpush3.bf16.msra.mxu1 %v5819_v47 }
0x118c   :  { %5503 = vmatprep.subr.bf16.mxu1 %v5964_v2 }
0x118f   :  { %5504 = vmatpush3.bf16.msra.mxu1 %v5821_v49 }
0x1190   :  { %5515 = vmatprep.subr.bf16.mxu1 %v5964_v2 }
0x125d   :  { %v2206_v53 = vpop.f32.mrb[68].mxu1 }
0x125e   :  { %v2207_v55 = vadd.f32 %v4851_v52, %v2206_v53  ;;  %v5483_v58 = vpop.f32.mrb[69].mxu1 }
0x125f   :  { %v2209_v59 = vpop.f32.mrb[70].mxu1 }
0x1260   :  { %v2213_v60 = vadd.f32 %v2207_v55, %v2048_v22  ;;  %v2210_v61 = vadd.f32 %v4851_v52, %v2209_v59  ;;  %v5484_v62 = vpop.f32.mrb[71].mxu1 }
0x1262   :  { %v2219_v63 = vmul.f32 %v2218_v56, %v2213_v60  ;;  %v2214_v1 = vadd.f32 %v2210_v61, %v6394_v23 }
0x1264   :  { %v2220_v3 = vmul.f32 %v2218_v56, %v2214_v1  ;;  %v6450_v4 = vadd.f32 %v2224_v0, %v2219_v63  ;;  %v5824_v63 = vld [vmem:[%s6898_s3 + $0x50] sm:$0xff]  }
0x1266   :  { %v6452_v6 = vadd.f32 %v2224_v0, %v2220_v3  ;;  %v5825_v3 = vld [vmem:[%s6899_s4 + $0x50] sm:$0xff]  }
0x1268   :  { %v6459_v18 = vpack.c.bf16 %v6452_v6, %v6450_v4 }
0x126a   :  { %5490 = vmatmul.mubr.msk.bf16.vlgmr.msra.gmra.mrb[72].mxu0 %vm286_vm3, %v6459_v18  ;;  %5506 = vmatmul.mubr.msk.bf16.vlgmr.msra.gmra.mrb[72].mxu1 %vm286_vm3, %v6459_v18 }
0x126b   :  { %5494 = vmatpush3.bf16.msra.mxu0 %v5822_v7  ;;  %5497 = vmatprep.mubr.msk.bf16.mxu0 %vm5965_vm1, %v5964_v2 }
0x126c   :  { %5495 = vmatprep.subr.bf16.mxu0 %v5964_v2  ;;  %5517 = vmatprep.mubr.msk.bf16.mxu1 %vm5965_vm1, %v5964_v2 }
0x126f   :  { %5496 = vmatpush3.bf16.msra.mxu0 %v5823_v11  ;;  %v5826_v11 = vld [vmem:[%s6898_s3 + $0x58] sm:$0xff]  }
0x1270   :  { %5509 = vmatprep.subr.bf16.mxu0 %v5964_v2 }
0x1272   :  { %5498 = vmatmul.mubr.msk.bf16.vlgmr.msra.gmra.mrb[76].mxu0 %vm286_vm3, %v6459_v18 }
0x1273   :  { %5511 = vmatprep.mubr.msk.bf16.mxu0 %vm5965_vm1, %v5964_v2 }
0x133d   :  { %v2282_v12 = vpop.f32.mrb[72].mxu0  ;;  %v2398_v13 = vpop.f32.mrb[72].mxu1 }
0x133e   :  { %v5491_v19 = vpop.f32.mrb[73].mxu0  ;;  %v5507_v20 = vpop.f32.mrb[73].mxu1  ;;  %v2527_v8 = vpack.c.bf16 %v2398_v13, %v2398_v13  ;;  %v2405_v27 = vpack.c.bf16 %v2282_v12, %v2282_v12  ;;  %v5827_v12 = vld [vmem:[%s6899_s4 + $0x58] sm:$0xff]   ;;  %v5828_v13 = vld [vmem:[%s6900_s5 + $0x50] sm:$0xff]  }
0x133f   :  { %v2285_v51 = vpop.f32.mrb[74].mxu0  ;;  %v2401_v54 = vpop.f32.mrb[74].mxu1  ;;  %v5829_v19 = vld [vmem:[%s6900_s5 + $0x58] sm:$0xff]  }
0x1340   :  { %v5492_v21 = vpop.f32.mrb[75].mxu0  ;;  %v5508_v24 = vpop.f32.mrb[75].mxu1  ;;  %v2528_v28 = vpack.c.bf16 %v2401_v54, %v2401_v54  ;;  %v2533_v29 = vsel %vm88_vm0, %v2527_v8, 0  ;;  %v2406_v30 = vpack.c.bf16 %v2285_v51, %v2285_v51 }
0x1342   :  { %v2579_v31 = vsel %vm88_vm0, %v2528_v28, 0 }
0x1345   :  { %v2340_v25 = vpop.f32.mrb[76].mxu0 }
0x1346   :  { %v2407_v5 = vpack.c.bf16 %v2340_v25, %v2340_v25  ;;  %v5499_v17 = vpop.f32.mrb[77].mxu0 }
0x1347   :  { %v2343_v22 = vpop.f32.mrb[78].mxu0 }
0x1348   :  { %v2413_v23 = vsel %vm449_vm4, %v2407_v5, 0  ;;  %v2408_v26 = vpack.c.bf16 %v2343_v22, %v2343_v22  ;;  %v5500_v14 = vpop.f32.mrb[79].mxu0 }
0x1349   :  { %5510 = vmatpush3.bf16.xpose.msra.mxu0 %v2413_v23 }
0x134a   :  { %v2459_v15 = vsel %vm449_vm4, %v2408_v26, 0  ;;  %5521 = vmatprep.subr.bf16.mxu0 %v5964_v2 }
0x134b   :  { %5516 = vmatpush3.bf16.xpose.msra.mxu1 %v2459_v15 }
0x134c   :  { %5527 = vmatprep.subr.bf16.mxu1 %v5964_v2 }
0x1350   :  { %5512 = vmatmul.mubr.msk.bf16.vlgmr.msra.gmra.mrb[80].mxu0 %vm449_vm4, %v2405_v27 }
0x1351   :  { %5522 = vmatpush3.bf16.msra.mxu0 %v2533_v29  ;;  %5523 = vmatprep.mubr.msk.bf16.mxu0 %vm5965_vm1, %v5964_v2 }
0x1352   :  { %5518 = vmatmul.mubr.msk.bf16.vlgmr.msra.gmra.mrb[76].mxu1 %vm449_vm4, %v2406_v30  ;;  %5533 = vmatprep.subr.bf16.mxu0 %v5964_v2 }
0x1353   :  { %5528 = vmatpush3.bf16.msra.mxu1 %v2579_v31  ;;  %5529 = vmatprep.mubr.msk.bf16.mxu1 %vm5965_vm1, %v5964_v2 }
0x1354   :  { %5541 = vmatprep.subr.bf16.mxu1 %v5964_v2 }
0x1423   :  { %v2449_v32 = vpop.f32.mrb[80].mxu0 }
0x1424   :  { %v2501_v33 = vmul.f32 0.35355338, %v2449_v32  ;;  %v5513_v34 = vpop.f32.mrb[81].mxu0 }
0x1425   :  { %v2452_v35 = vpop.f32.mrb[82].mxu0  ;;  %v2495_v36 = vpop.f32.mrb[76].mxu1 }
0x1426   :  { %v2502_v37 = vmul.f32 0.35355338, %v2495_v36  ;;  %v5514_v38 = vpop.f32.mrb[83].mxu0  ;;  %v5519_v39 = vpop.f32.mrb[77].mxu1  ;;  %v2503_v40 = vsel %vm449_vm4, %v2501_v33, -inf }
0x1427   :  { %v2498_v41 = vpop.f32.mrb[78].mxu1  ;;  %2504 = vmax.xlane.f32.xlu0 %v2503_v40 }
0x1428   :  { %v5520_v42 = vpop.f32.mrb[79].mxu1  ;;  %v2506_v43 = vsel %vm449_vm4, %v2502_v37, -inf }
0x1429   :  { %2507 = vmax.xlane.f32.xlu1 %v2506_v43 }
0x14b4   :  { %v2505_v44 = vpop.xlane.xlu0 %2504 }
0x14b5   :  { %v2509_v45 = vsub.f32 %v2501_v33, %v2505_v44 }
0x14b6   :  { %v2508_v46 = vpop.xlane.xlu1 %2507 }
0x14b7   :  { %v2511_v47 = vmul.f32 1.442695, %v2509_v45  ;;  %v2510_v48 = vsub.f32 %v2502_v37, %v2508_v46 }
0x14b9   :  { %5900 = vpow2.f32 %v2511_v47  ;;  %v2513_v49 = vmul.f32 1.442695, %v2510_v48 }
0x14bb   :  { %5902 = vpow2.f32 %v2513_v49 }
0x14c3   :  { %v5901_v52 = vpop.eup %5900 }
0x14c4   :  { %v2515_v53 = vsel %vm449_vm4, %v5901_v52, 0.0 }
0x14c5   :  { %v5903_v55 = vpop.eup %5902  ;;  %2516 = vadd.xlane.f32.xlu0 %v2515_v53 }
0x14c6   :  { %v2518_v56 = vsel %vm449_vm4, %v5903_v55, 0.0 }
0x14c7   :  { %2519 = vadd.xlane.f32.xlu1 %v2518_v56 }
0x1552   :  { %v2517_v58 = vpop.xlane.xlu0 %2516 }
0x1553   :  { %5904 = vrcp.f32 %v2517_v58 }
0x1554   :  { %v2520_v59 = vpop.xlane.xlu1 %2519 }
0x1555   :  { %5906 = vrcp.f32 %v2520_v59 }
0x155d   :  { %v5905_v60 = vpop.eup %5904 }
0x155e   :  { %v2523_v61 = vmul.f32 %v5905_v60, %v5901_v52 }
0x155f   :  { %v5907_v62 = vpop.eup %5906 }
0x1560   :  { %v2524_v0 = vmul.f32 %v5907_v62, %v5903_v55  ;;  %v2525_v1 = vpack.c.bf16 %v2523_v61, %v2523_v61 }
0x1562   :  { %5524 = vmatmul.mubr.msk.bf16.vlgmr.msra.gmra.mrb[84].mxu0 %vm449_vm4, %v2525_v1  ;;  %v2526_v7 = vpack.c.bf16 %v2524_v0, %v2524_v0 }
0x1563   :  { %5534 = vmatpush3.bf16.msra.mxu0 %v5824_v63  ;;  %5537 = vmatprep.mubr.msk.bf16.mxu0 %vm5965_vm1, %v5964_v2 }
0x1564   :  { %5530 = vmatmul.mubr.msk.bf16.vlgmr.msra.gmra.mrb[80].mxu1 %vm449_vm4, %v2526_v7  ;;  %5535 = vmatprep.subr.bf16.mxu0 %v5964_v2 }
0x1565   :  { %5542 = vmatpush3.bf16.msra.mxu1 %v5825_v3  ;;  %5545 = vmatprep.mubr.msk.bf16.mxu1 %vm5965_vm1, %v5964_v2 }
0x1566   :  { %5543 = vmatprep.subr.bf16.mxu1 %v5964_v2 }
0x1567   :  { %5536 = vmatpush3.bf16.msra.mxu0 %v5826_v11 }
0x1568   :  { %5549 = vmatprep.subr.bf16.mxu0 %v5964_v2 }
0x1569   :  { %5544 = vmatpush3.bf16.msra.mxu1 %v5827_v12 }
0x156a   :  { %5538 = vmatmul.mubr.msk.bf16.vlgmr.msra.gmra.mrb[88].mxu0 %vm286_vm3, %v6459_v18  ;;  %5557 = vmatprep.subr.bf16.mxu1 %v5964_v2 }
0x156b   :  { %5550 = vmatpush3.bf16.msra.mxu0 %v5828_v13  ;;  %5553 = vmatprep.mubr.msk.bf16.mxu0 %vm5965_vm1, %v5964_v2 }
0x156c   :  { %5546 = vmatmul.mubr.msk.bf16.vlgmr.msra.gmra.mrb[84].mxu1 %vm286_vm3, %v6459_v18  ;;  %5551 = vmatprep.subr.bf16.mxu0 %v5964_v2 }
0x156d   :  { %5559 = vmatprep.mubr.msk.bf16.mxu1 %vm5965_vm1, %v5964_v2 }
0x156f   :  { %5552 = vmatpush3.bf16.msra.mxu0 %v5829_v19 }
0x1570   :  { %5563 = vmatprep.subr.bf16.mxu0 %v5964_v2 }
0x1572   :  { %5554 = vmatmul.mubr.msk.bf16.vlgmr.msra.gmra.mrb[92].mxu0 %vm286_vm3, %v6459_v18 }
0x1573   :  { %5565 = vmatprep.mubr.msk.bf16.mxu0 %vm5965_vm1, %v5964_v2 }
0x1635   :  { %v6538_v20 = vpop.f32.mrb[84].mxu0 }
0x1636   :  { %v5525_v51 = vpop.f32.mrb[85].mxu0 }
0x1637   :  { %v2572_v54 = vpop.f32.mrb[86].mxu0  ;;  %v6540_v21 = vpop.f32.mrb[80].mxu1 }
0x1638   :  { %v2621_v24 = vpack.c.bf16 %v6540_v21, %v6538_v20  ;;  %v5526_v25 = vpop.f32.mrb[87].mxu0  ;;  %v5531_v5 = vpop.f32.mrb[81].mxu1  ;;  %v4908_v54 = vld [vmem:[%s6901_s6 + $0x14] sm:$0xf] }
0x1639   :  { %v2618_v17 = vpop.f32.mrb[82].mxu1 }
0x163a   :  { %v5532_v22 = vpop.f32.mrb[83].mxu1  ;;  %v4882_v17 = vld [vmem:[%s6901_s6 + $0x10] sm:$0xf] }
0x163d   :  { %v2675_v23 = vpop.f32.mrb[88].mxu0 }
0x163e   :  { %v5539_v26 = vpop.f32.mrb[89].mxu0  ;;  %v2798_v38 = vpack.c.bf16 %v2675_v23, %v2675_v23 }
0x163f   :  { %v2678_v14 = vpop.f32.mrb[90].mxu0  ;;  %v2733_v15 = vpop.f32.mrb[84].mxu1  ;;  %v3021_v26 = vsel %vm88_vm0, %v4908_v54, 0 }
0x1640   :  { %v2800_v8 = vpack.c.bf16 %v2733_v15, %v2733_v15  ;;  %v5540_v27 = vpop.f32.mrb[91].mxu0  ;;  %v5547_v28 = vpop.f32.mrb[85].mxu1  ;;  %v2799_v41 = vpack.c.bf16 %v2678_v14, %v2678_v14  ;;  %v3068_v15 = vsel %vm88_vm0, %v4882_v17, 0 }
0x1641   :  { %v2736_v29 = vpop.f32.mrb[86].mxu1  ;;  %v5831_v27 = vld [vmem:[%s6899_s4 + $0x68] sm:$0xff]  }
0x1642   :  { %v2806_v30 = vsel %vm449_vm4, %v2800_v8, 0  ;;  %v2801_v31 = vpack.c.bf16 %v2736_v29, %v2736_v29  ;;  %v5548_v32 = vpop.f32.mrb[87].mxu1  ;;  %v5830_v8 = vld [vmem:[%s6899_s4 + $0x60] sm:$0xff]  }
0x1643   :  { %5558 = vmatpush3.bf16.xpose.msra.mxu1 %v2806_v30  ;;  %v5832_v29 = vld [vmem:[%s6898_s3 + $0x60] sm:$0xff]  }
0x1644   :  { %v2852_v33 = vsel %vm449_vm4, %v2801_v31, 0  ;;  %5569 = vmatprep.subr.bf16.mxu1 %v5964_v2 }
0x1645   :  { %v2791_v34 = vpop.f32.mrb[92].mxu0  ;;  %5564 = vmatpush3.bf16.xpose.msra.mxu0 %v2852_v33 }
0x1646   :  { %v2920_v35 = vpack.c.bf16 %v2791_v34, %v2791_v34  ;;  %v5555_v36 = vpop.f32.mrb[93].mxu0  ;;  %5575 = vmatprep.subr.bf16.mxu0 %v5964_v2 }
0x1647   :  { %v2794_v37 = vpop.f32.mrb[94].mxu0 }
0x1648   :  { %v2921_v39 = vpack.c.bf16 %v2794_v37, %v2794_v37  ;;  %v5556_v40 = vpop.f32.mrb[95].mxu0  ;;  %v2926_v42 = vsel %vm88_vm0, %v2920_v35, 0  ;;  %v5833_v35 = vld [vmem:[%s6898_s3 + $0x68] sm:$0xff]   ;;  %v5834_v37 = vld [vmem:[%s6900_s5 + $0x60] sm:$0xff]  }
0x164a   :  { %5560 = vmatmul.mubr.msk.bf16.vlgmr.msra.gmra.mrb[88].mxu1 %vm449_vm4, %v2798_v38  ;;  %v2972_v43 = vsel %vm88_vm0, %v2921_v39, 0 }
0x164b   :  { %5570 = vmatpush3.bf16.msra.mxu1 %v2926_v42  ;;  %5571 = vmatprep.mubr.msk.bf16.mxu1 %vm5965_vm1, %v5964_v2 }
0x164c   :  { %5566 = vmatmul.mubr.msk.bf16.vlgmr.msra.gmra.mrb[96].mxu0 %vm449_vm4, %v2799_v41  ;;  %5581 = vmatprep.subr.bf16.mxu1 %v5964_v2  ;;  %v5835_v41 = vld [vmem:[%s6900_s5 + $0x68] sm:$0xff]  }
0x164d   :  { %5576 = vmatpush3.bf16.msra.mxu0 %v2972_v43  ;;  %5577 = vmatprep.mubr.msk.bf16.mxu0 %vm5965_vm1, %v5964_v2 }
0x164e   :  { %5587 = vmatprep.subr.bf16.mxu0 %v5964_v2 }
0x171d   :  { %v2842_v44 = vpop.f32.mrb[88].mxu1 }
0x171e   :  { %v2894_v45 = vmul.f32 0.35355338, %v2842_v44  ;;  %v5561_v46 = vpop.f32.mrb[89].mxu1 }
0x171f   :  { %v2845_v47 = vpop.f32.mrb[90].mxu1  ;;  %v2888_v48 = vpop.f32.mrb[96].mxu0 }
0x1720   :  { %v2895_v49 = vmul.f32 0.35355338, %v2888_v48  ;;  %v5562_v52 = vpop.f32.mrb[91].mxu1  ;;  %v5567_v53 = vpop.f32.mrb[97].mxu0  ;;  %v2896_v55 = vsel %vm449_vm4, %v2894_v45, -inf }
0x1721   :  { %2897 = vmax.xlane.f32.xlu1 %v2896_v55  ;;  %v2891_v56 = vpop.f32.mrb[98].mxu0 }
0x1722   :  { %v5568_v58 = vpop.f32.mrb[99].mxu0  ;;  %v2899_v59 = vsel %vm449_vm4, %v2895_v49, -inf }
0x1723   :  { %2900 = vmax.xlane.f32.xlu0 %v2899_v59 }
0x17ae   :  { %v2898_v60 = vpop.xlane.xlu1 %2897 }
0x17af   :  { %v2902_v61 = vsub.f32 %v2894_v45, %v2898_v60 }
0x17b0   :  { %v2901_v62 = vpop.xlane.xlu0 %2900 }
0x17b1   :  { %v2904_v63 = vmul.f32 1.442695, %v2902_v61  ;;  %v2903_v0 = vsub.f32 %v2895_v49, %v2901_v62 }
0x17b3   :  { %5908 = vpow2.f32 %v2904_v63  ;;  %v2906_v1 = vmul.f32 1.442695, %v2903_v0 }
0x17b5   :  { %5910 = vpow2.f32 %v2906_v1 }
0x17bd   :  { %v5909_v3 = vpop.eup %5908 }
0x17be   :  { %v2908_v7 = vsel %vm449_vm4, %v5909_v3, 0.0 }
0x17bf   :  { %v5911_v11 = vpop.eup %5910  ;;  %2909 = vadd.xlane.f32.xlu1 %v2908_v7 }
0x17c0   :  { %v2911_v12 = vsel %vm449_vm4, %v5911_v11, 0.0 }
0x17c1   :  { %2912 = vadd.xlane.f32.xlu0 %v2911_v12 }
0x184c   :  { %v2910_v13 = vpop.xlane.xlu1 %2909 }
0x184d   :  { %5912 = vrcp.f32 %v2910_v13 }
0x184e   :  { %v2913_v19 = vpop.xlane.xlu0 %2912 }
0x184f   :  { %5914 = vrcp.f32 %v2913_v19 }
0x1857   :  { %v5913_v51 = vpop.eup %5912 }
0x1858   :  { %v2916_v25 = vmul.f32 %v5913_v51, %v5909_v3 }
0x1859   :  { %v5915_v5 = vpop.eup %5914 }
0x185a   :  { %v2917_v22 = vmul.f32 %v5915_v5, %v5911_v11  ;;  %v2918_v23 = vpack.c.bf16 %v2916_v25, %v2916_v25 }
0x185c   :  { %5572 = vmatmul.mubr.msk.bf16.vlgmr.msra.gmra.mrb[92].mxu1 %vm449_vm4, %v2918_v23  ;;  %v2919_v14 = vpack.c.bf16 %v2917_v22, %v2917_v22 }
0x185d   :  { %5582 = vmatpush3.bf16.msra.mxu1 %v3021_v26  ;;  %5583 = vmatprep.mubr.msk.bf16.mxu1 %vm5965_vm1, %v5964_v2 }
0x185e   :  { %5578 = vmatmul.mubr.msk.bf16.vlgmr.msra.gmra.mrb[100].mxu0 %vm449_vm4, %v2919_v14  ;;  %5593 = vmatprep.subr.bf16.mxu1 %v5964_v2 }
0x185f   :  { %5588 = vmatpush3.bf16.msra.mxu0 %v3068_v15  ;;  %5589 = vmatprep.mubr.msk.bf16.mxu0 %vm5965_vm1, %v5964_v2 }
0x1860   :  { %5601 = vmatprep.subr.bf16.mxu0 %v5964_v2 }
0x1866   :  { %5590 = vmatmul.mubr.msk.bf16.vlgmr.msra.gmra.mrb[104].mxu0 %vm449_vm4, %v2621_v24 }
0x1867   :  { %5602 = vmatpush3.bf16.msra.mxu0 %v5830_v8  ;;  %5605 = vmatprep.mubr.msk.bf16.mxu0 %vm5965_vm1, %v5964_v2 }
0x1868   :  { %5603 = vmatprep.subr.bf16.mxu0 %v5964_v2 }
0x186b   :  { %5604 = vmatpush3.bf16.msra.mxu0 %v5831_v27 }
0x186c   :  { %5617 = vmatprep.subr.bf16.mxu0 %v5964_v2 }
0x186e   :  { %5606 = vmatmul.mubr.msk.bf16.vlgmr.msra.gmra.mrb[108].mxu0 %vm286_vm3, %v6459_v18 }
0x186f   :  { %5619 = vmatprep.mubr.msk.bf16.mxu0 %vm5965_vm1, %v5964_v2 }
0x192f   :  { %v2962_v20 = vpop.f32.mrb[92].mxu1 }
0x1930   :  { %v5573_v21 = vpop.f32.mrb[93].mxu1 }
0x1931   :  { %v2965_v24 = vpop.f32.mrb[94].mxu1  ;;  %v3008_v28 = vpop.f32.mrb[100].mxu0 }
0x1932   :  { %v3014_v30 = vpack.c.bf16 %v3008_v28, %v2962_v20  ;;  %v5574_v31 = vpop.f32.mrb[95].mxu1  ;;  %v5579_v32 = vpop.f32.mrb[101].mxu0 }
0x1933   :  { %v3011_v33 = vpop.f32.mrb[102].mxu0 }
0x1934   :  { %v5580_v34 = vpop.f32.mrb[103].mxu0  ;;  %5584 = vmatmul.mubr.msk.bf16.vlgmr.msra.gmra.mrb[96].mxu1 %vm449_vm4, %v3014_v30 }
0x1935   :  { %5594 = vmatpush3.bf16.msra.mxu1 %v5832_v29  ;;  %5597 = vmatprep.mubr.msk.bf16.mxu1 %vm5965_vm1, %v5964_v2 }
0x1936   :  { %5595 = vmatprep.subr.bf16.mxu1 %v5964_v2 }
0x1939   :  { %5596 = vmatpush3.bf16.msra.mxu1 %v5833_v35  ;;  %v3104_v36 = vpop.f32.mrb[104].mxu0 }
0x193a   :  { %v5591_v38 = vpop.f32.mrb[105].mxu0  ;;  %5609 = vmatprep.subr.bf16.mxu1 %v5964_v2 }
0x193b   :  { %v3107_v39 = vpop.f32.mrb[106].mxu0 }
0x193c   :  { %v5592_v40 = vpop.f32.mrb[107].mxu0  ;;  %5598 = vmatmul.mubr.msk.bf16.vlgmr.msra.gmra.mrb[100].mxu1 %vm286_vm3, %v6459_v18 }
0x193d   :  { %5610 = vmatpush3.bf16.msra.mxu1 %v5834_v37  ;;  %5613 = vmatprep.mubr.msk.bf16.mxu1 %vm5965_vm1, %v5964_v2  ;;  %v4936_v40 = vld [vmem:[%s6901_s6 + $0x18] sm:$0xf] }
0x193e   :  { %5611 = vmatprep.subr.bf16.mxu1 %v5964_v2 }
0x1941   :  { %5612 = vmatpush3.bf16.msra.mxu1 %v5835_v41  ;;  %v3220_v42 = vpop.f32.mrb[108].mxu0 }
0x1942   :  { %v3287_v43 = vpack.c.bf16 %v3220_v42, %v3220_v42  ;;  %v5607_v44 = vpop.f32.mrb[109].mxu0  ;;  %5623 = vmatprep.subr.bf16.mxu1 %v5964_v2 }
0x1943   :  { %v3223_v45 = vpop.f32.mrb[110].mxu0 }
0x1944   :  { %v3293_v46 = vsel %vm449_vm4, %v3287_v43, 0  ;;  %v5608_v47 = vpop.f32.mrb[111].mxu0  ;;  %5614 = vmatmul.mubr.msk.bf16.vlgmr.msra.gmra.mrb[104].mxu1 %vm286_vm3, %v6459_v18  ;;  %v3288_v48 = vpack.c.bf16 %v3223_v45, %v3223_v45  ;;  %v3508_v45 = vsel %vm88_vm0, %v4936_v40, 0 }
0x1945   :  { %5618 = vmatpush3.bf16.xpose.msra.mxu0 %v3293_v46  ;;  %5625 = vmatprep.mubr.msk.bf16.mxu1 %vm5965_vm1, %v5964_v2  ;;  %v5836_v46 = vld [vmem:[%s6898_s3 + $0x70] sm:$0xff]  }
0x1946   :  { %5629 = vmatprep.subr.bf16.mxu0 %v5964_v2  ;;  %v3339_v49 = vsel %vm449_vm4, %v3288_v48, 0  ;;  %v5837_v48 = vld [vmem:[%s6898_s3 + $0x78] sm:$0xff]  }
0x194a   :  { %5624 = vmatpush3.bf16.xpose.msra.mxu1 %v3339_v49  ;;  %v5838_v49 = vld [vmem:[%s6900_s5 + $0x70] sm:$0xff]  }
0x194b   :  { %5635 = vmatprep.subr.bf16.mxu1 %v5964_v2 }
0x1a07   :  { %v3057_v52 = vpop.f32.mrb[96].mxu1 }
0x1a08   :  { %v6627_v53 = vadd.f32 %v3104_v36, %v3057_v52  ;;  %v5585_v55 = vpop.f32.mrb[97].mxu1  ;;  %v5839_v52 = vld [vmem:[%s6900_s5 + $0x78] sm:$0xff]  }
0x1a09   :  { %v3060_v56 = vpop.f32.mrb[98].mxu1 }
0x1a0a   :  { %v6629_v58 = vadd.f32 %v3107_v39, %v3060_v56  ;;  %v5586_v59 = vpop.f32.mrb[99].mxu1 }
0x1a0f   :  { %v3162_v60 = vpop.f32.mrb[100].mxu1 }
0x1a10   :  { %v3285_v61 = vpack.c.bf16 %v3162_v60, %v3162_v60  ;;  %v5599_v62 = vpop.f32.mrb[101].mxu1 }
0x1a11   :  { %v3165_v63 = vpop.f32.mrb[102].mxu1 }
0x1a12   :  { %v3286_v0 = vpack.c.bf16 %v3165_v63, %v3165_v63  ;;  %v5600_v1 = vpop.f32.mrb[103].mxu1  ;;  %5620 = vmatmul.mubr.msk.bf16.vlgmr.msra.gmra.mrb[112].mxu0 %vm449_vm4, %v3285_v61  ;;  %v5840_v61 = vld [vmem:[%s6899_s4 + $0x70] sm:$0xff]  }
0x1a13   :  { %5631 = vmatprep.mubr.msk.bf16.mxu0 %vm5965_vm1, %v5964_v2 }
0x1a14   :  { %5626 = vmatmul.mubr.msk.bf16.vlgmr.msra.gmra.mrb[108].mxu1 %vm449_vm4, %v3286_v0 }
0x1a15   :  { %5637 = vmatprep.mubr.msk.bf16.mxu1 %vm5965_vm1, %v5964_v2 }
0x1a17   :  { %v3278_v3 = vpop.f32.mrb[104].mxu1 }
0x1a18   :  { %v3407_v7 = vpack.c.bf16 %v3278_v3, %v3278_v3  ;;  %v5615_v11 = vpop.f32.mrb[105].mxu1 }
0x1a19   :  { %v3281_v12 = vpop.f32.mrb[106].mxu1 }
0x1a1a   :  { %v3413_v13 = vsel %vm88_vm0, %v3407_v7, 0  ;;  %v3408_v19 = vpack.c.bf16 %v3281_v12, %v3281_v12  ;;  %v5616_v51 = vpop.f32.mrb[107].mxu1  ;;  %v5841_v7 = vld [vmem:[%s6899_s4 + $0x78] sm:$0xff]   ;;  %s5940_s4 = scalar_lea.vmem %s4740_s29, 32 }
0x1a1b   :  { %5630 = vmatpush3.bf16.msra.mxu0 %v3413_v13  ;;  %p5941_p0 = scmp.ne.s32.totalorder %s4740_s29, %s5940_s4  ;;  %p5946_p2 = scmp.lt.s32.totalorder %s5940_s4, %s5940_s4 }
0x1a1c   :  { %v3459_v54 = vsel %vm88_vm0, %v3408_v19, 0  ;;  %5641 = vmatprep.subr.bf16.mxu0 %v5964_v2 }
0x1a1d   :  { %5636 = vmatpush3.bf16.msra.mxu1 %v3459_v54  ;;  %p5947_p3 = por %p5946_p2, %p5945_p1 }
0x1a1e   :  { %5647 = vmatprep.subr.bf16.mxu1 %v5964_v2 }
0x1a1f   :  { %p5948_p4 = pnand %p5947_p3, %p5941_p0 }
0x1ae5   :  { %v3329_v25 = vpop.f32.mrb[112].mxu0 }
0x1ae6   :  { %v3381_v5 = vmul.f32 0.35355338, %v3329_v25  ;;  %v5621_v17 = vpop.f32.mrb[113].mxu0 }
0x1ae7   :  { %v3332_v22 = vpop.f32.mrb[114].mxu0  ;;  %v3375_v23 = vpop.f32.mrb[108].mxu1 }
0x1ae8   :  { %v3382_v26 = vmul.f32 0.35355338, %v3375_v23  ;;  %v5622_v14 = vpop.f32.mrb[115].mxu0  ;;  %v5627_v15 = vpop.f32.mrb[109].mxu1  ;;  %v3383_v8 = vsel %vm449_vm4, %v3381_v5, -inf }
0x1ae9   :  { %v3378_v27 = vpop.f32.mrb[110].mxu1  ;;  %3384 = vmax.xlane.f32.xlu1 %v3383_v8 }
0x1aea   :  { %v5628_v20 = vpop.f32.mrb[111].mxu1  ;;  %v3386_v21 = vsel %vm449_vm4, %v3382_v26, -inf }
0x1aeb   :  { %3387 = vmax.xlane.f32.xlu0 %v3386_v21 }
0x1b76   :  { %v3385_v24 = vpop.xlane.xlu1 %3384 }
0x1b77   :  { %v3389_v28 = vsub.f32 %v3381_v5, %v3385_v24 }
0x1b78   :  { %v3388_v29 = vpop.xlane.xlu0 %3387 }
0x1b79   :  { %v3391_v30 = vmul.f32 1.442695, %v3389_v28  ;;  %v3390_v31 = vsub.f32 %v3382_v26, %v3388_v29 }
0x1b7b   :  { %5916 = vpow2.f32 %v3391_v30  ;;  %v3393_v32 = vmul.f32 1.442695, %v3390_v31 }
0x1b7d   :  { %5918 = vpow2.f32 %v3393_v32 }
0x1b85   :  { %v5917_v33 = vpop.eup %5916 }
0x1b86   :  { %v3395_v34 = vsel %vm449_vm4, %v5917_v33, 0.0 }
0x1b87   :  { %v5919_v35 = vpop.eup %5918  ;;  %3396 = vadd.xlane.f32.xlu1 %v3395_v34 }
0x1b88   :  { %v3398_v36 = vsel %vm449_vm4, %v5919_v35, 0.0 }
0x1b89   :  { %3399 = vadd.xlane.f32.xlu0 %v3398_v36 }
0x1c14   :  { %v3397_v37 = vpop.xlane.xlu1 %3396 }
0x1c15   :  { %5920 = vrcp.f32 %v3397_v37 }
0x1c16   :  { %v3400_v38 = vpop.xlane.xlu0 %3399 }
0x1c17   :  { %5922 = vrcp.f32 %v3400_v38 }
0x1c1f   :  { %v5921_v39 = vpop.eup %5920 }
0x1c20   :  { %v3403_v41 = vmul.f32 %v5921_v39, %v5917_v33 }
0x1c21   :  { %v5923_v42 = vpop.eup %5922 }
0x1c22   :  { %v3404_v43 = vmul.f32 %v5923_v42, %v5919_v35  ;;  %v3405_v44 = vpack.c.bf16 %v3403_v41, %v3403_v41 }
0x1c24   :  { %5632 = vmatmul.mubr.msk.bf16.vlgmr.msra.gmra.mrb[116].mxu0 %vm449_vm4, %v3405_v44  ;;  %v3406_v47 = vpack.c.bf16 %v3404_v43, %v3404_v43 }
0x1c25   :  { %5642 = vmatpush3.bf16.msra.mxu0 %v3508_v45  ;;  %5643 = vmatprep.mubr.msk.bf16.mxu0 %vm5965_vm1, %v5964_v2 }
0x1c26   :  { %5638 = vmatmul.mubr.msk.bf16.vlgmr.msra.gmra.mrb[112].mxu1 %vm449_vm4, %v3406_v47  ;;  %5655 = vmatprep.subr.bf16.mxu0 %v5964_v2 }
0x1c27   :  { %5648 = vmatpush3.bf16.msra.mxu1 %v5836_v46  ;;  %5651 = vmatprep.mubr.msk.bf16.mxu1 %vm5965_vm1, %v5964_v2 }
0x1c28   :  { %5649 = vmatprep.subr.bf16.mxu1 %v5964_v2 }
0x1c2b   :  { %5650 = vmatpush3.bf16.msra.mxu1 %v5837_v48 }
0x1c2c   :  { %5663 = vmatprep.subr.bf16.mxu1 %v5964_v2 }
0x1c2e   :  { %5652 = vmatmul.mubr.msk.bf16.vlgmr.msra.gmra.mrb[116].mxu1 %vm286_vm3, %v6459_v18 }
0x1c2f   :  { %5664 = vmatpush3.bf16.msra.mxu1 %v5838_v49  ;;  %5667 = vmatprep.mubr.msk.bf16.mxu1 %vm5965_vm1, %v5964_v2 }
0x1c30   :  { %5665 = vmatprep.subr.bf16.mxu1 %v5964_v2 }
0x1c33   :  { %5666 = vmatpush3.bf16.msra.mxu1 %v5839_v52 }
0x1c34   :  { %5677 = vmatprep.subr.bf16.mxu1 %v5964_v2 }
0x1c36   :  { %5668 = vmatmul.mubr.msk.bf16.vlgmr.msra.gmra.mrb[120].mxu1 %vm286_vm3, %v6459_v18 }
0x1c37   :  { %5679 = vmatprep.mubr.msk.bf16.mxu1 %vm5965_vm1, %v5964_v2 }
0x1cf7   :  { %v3449_v55 = vpop.f32.mrb[116].mxu0 }
0x1cf8   :  { %v5633_v56 = vpop.f32.mrb[117].mxu0 }
0x1cf9   :  { %v3452_v59 = vpop.f32.mrb[118].mxu0  ;;  %v3495_v60 = vpop.f32.mrb[112].mxu1 }
0x1cfa   :  { %v3501_v62 = vpack.c.bf16 %v3495_v60, %v3449_v55  ;;  %v5634_v63 = vpop.f32.mrb[119].mxu0  ;;  %v5639_v0 = vpop.f32.mrb[113].mxu1 }
0x1cfb   :  { %v3498_v1 = vpop.f32.mrb[114].mxu1 }
0x1cfc   :  { %v5640_v3 = vpop.f32.mrb[115].mxu1  ;;  %5644 = vmatmul.mubr.msk.bf16.vlgmr.msra.gmra.mrb[120].mxu0 %vm449_vm4, %v3501_v62  ;;  %v4963_v1 = vld [vmem:[%s6901_s6 + $0x1c] sm:$0xf] }
0x1cfd   :  { %5656 = vmatpush3.bf16.msra.mxu0 %v5840_v61  ;;  %5659 = vmatprep.mubr.msk.bf16.mxu0 %vm5965_vm1, %v5964_v2 }
0x1cfe   :  { %5657 = vmatprep.subr.bf16.mxu0 %v5964_v2 }
0x1d01   :  { %v3604_v11 = vpop.f32.mrb[116].mxu1  ;;  %5658 = vmatpush3.bf16.msra.mxu0 %v5841_v7 }
0x1d02   :  { %v5653_v12 = vpop.f32.mrb[117].mxu1  ;;  %5671 = vmatprep.subr.bf16.mxu0 %v5964_v2 }
0x1d03   :  { %v3607_v13 = vpop.f32.mrb[118].mxu1 }
0x1d04   :  { %v5654_v19 = vpop.f32.mrb[119].mxu1  ;;  %5660 = vmatmul.mubr.msk.bf16.vlgmr.msra.gmra.mrb[124].mxu0 %vm286_vm3, %v6459_v18  ;;  %v3728_v31 = vpack.c.bf16 %v3607_v13, %v3607_v13  ;;  %v3950_v13 = vsel %vm88_vm0, %v4963_v1, 0  ;;  %v4984_v1 = vld [vmem:[%s6906_s11 + $0x1] ss:$0 sm:$0xff] }
0x1d05   :  { %5673 = vmatprep.mubr.msk.bf16.mxu0 %vm5965_vm1, %v5964_v2 }
0x1d09   :  { %v3720_v51 = vpop.f32.mrb[120].mxu1 }
0x1d0a   :  { %v5669_v54 = vpop.f32.mrb[121].mxu1 }
0x1d0b   :  { %v3723_v25 = vpop.f32.mrb[122].mxu1 }
0x1d0c   :  { %v5670_v5 = vpop.f32.mrb[123].mxu1  ;;  %v3850_v30 = vpack.c.bf16 %v3723_v25, %v3723_v25 }
0x1d0e   :  { %v3901_v33 = vsel %vm88_vm0, %v3850_v30, 0 }
0x1dcf   :  { %v3544_v17 = vpop.f32.mrb[120].mxu0 }
0x1dd0   :  { %v6696_v22 = vadd.f32 %v3544_v17, %v6627_v53  ;;  %v5645_v23 = vpop.f32.mrb[121].mxu0  ;;  %v3849_v53 = vpack.c.bf16 %v3720_v51, %v3720_v51 }
0x1dd1   :  { %v3547_v26 = vpop.f32.mrb[122].mxu0 }
0x1dd2   :  { %v6699_v14 = vadd.f32 %v3547_v26, %v6629_v58  ;;  %v5646_v15 = vpop.f32.mrb[123].mxu0  ;;  %v3727_v58 = vpack.c.bf16 %v3604_v11, %v3604_v11  ;;  %v3855_v32 = vsel %vm88_vm0, %v3849_v53, 0 }
0x1dd7   :  { %v3662_v8 = vpop.f32.mrb[124].mxu0 }
0x1dd8   :  { %v3729_v27 = vpack.c.bf16 %v3662_v8, %v3662_v8  ;;  %v5661_v18 = vpop.f32.mrb[125].mxu0 }
0x1dd9   :  { %v3665_v20 = vpop.f32.mrb[126].mxu0  ;;  %v5843_v18 = vld [vmem:[%s6903_s8 + $0x18] sm:$0xff]  }
0x1dda   :  { %v3735_v21 = vsel %vm449_vm4, %v3729_v27, 0  ;;  %v3730_v24 = vpack.c.bf16 %v3665_v20, %v3665_v20  ;;  %v5662_v28 = vpop.f32.mrb[127].mxu0  ;;  %v5842_v27 = vld [vmem:[%s6903_s8 + $0x10] sm:$0xff]   ;;  %v6744_v20 = vld [vmem:[%s6902_s7 + $0x4] sm:$0xf] }
0x1ddb   :  { %5672 = vmatpush3.bf16.xpose.msra.mxu0 %v3735_v21  ;;  %v4002_v28 = vrot.slane %v6744_v20, %v2040_v10  ;;  %v5844_v10 = vld [vmem:[%s6905_s10 + $0x20] sm:$0xff]  }
0x1ddc   :  { %v3781_v29 = vsel %vm449_vm4, %v3730_v24, 0  ;;  %5683 = vmatprep.subr.bf16.mxu0 %v5964_v2 }
0x1ddd   :  { %5678 = vmatpush3.bf16.xpose.msra.mxu1 %v3781_v29 }
0x1dde   :  { %5689 = vmatprep.subr.bf16.mxu1 %v5964_v2 }
0x1de2   :  { %5674 = vmatmul.mubr.msk.bf16.vlgmr.msra.gmra.mrb[128].mxu0 %vm449_vm4, %v3727_v58 }
0x1de3   :  { %5684 = vmatpush3.bf16.msra.mxu0 %v3855_v32  ;;  %5685 = vmatprep.mubr.msk.bf16.mxu0 %vm5965_vm1, %v5964_v2 }
0x1de4   :  { %5680 = vmatmul.mubr.msk.bf16.vlgmr.msra.gmra.mrb[124].mxu1 %vm449_vm4, %v3728_v31  ;;  %5695 = vmatprep.subr.bf16.mxu0 %v5964_v2 }
0x1de5   :  { %5690 = vmatpush3.bf16.msra.mxu1 %v3901_v33  ;;  %5691 = vmatprep.mubr.msk.bf16.mxu1 %vm5965_vm1, %v5964_v2  ;;  %v4008_v33 = vrot.slane %v6744_v20, %v2046_v16  ;;  %v5845_v16 = vld [vmem:[%s6905_s10 + $0x28] sm:$0xff]  }
0x1de6   :  { %5701 = vmatprep.subr.bf16.mxu1 %v5964_v2 }
0x1eb5   :  { %v3771_v34 = vpop.f32.mrb[128].mxu0 }
0x1eb6   :  { %v3823_v35 = vmul.f32 0.35355338, %v3771_v34  ;;  %v5675_v36 = vpop.f32.mrb[129].mxu0 }
0x1eb7   :  { %v3774_v37 = vpop.f32.mrb[130].mxu0  ;;  %v3817_v38 = vpop.f32.mrb[124].mxu1 }
0x1eb8   :  { %v3824_v39 = vmul.f32 0.35355338, %v3817_v38  ;;  %v5676_v40 = vpop.f32.mrb[131].mxu0  ;;  %v5681_v41 = vpop.f32.mrb[125].mxu1  ;;  %v3825_v42 = vsel %vm449_vm4, %v3823_v35, -inf }
0x1eb9   :  { %v3820_v43 = vpop.f32.mrb[126].mxu1  ;;  %3826 = vmax.xlane.f32.xlu1 %v3825_v42 }
0x1eba   :  { %v5682_v44 = vpop.f32.mrb[127].mxu1  ;;  %v3828_v45 = vsel %vm449_vm4, %v3824_v39, -inf }
0x1ebb   :  { %3829 = vmax.xlane.f32.xlu0 %v3828_v45 }
0x1f46   :  { %v3827_v46 = vpop.xlane.xlu1 %3826 }
0x1f47   :  { %v3831_v47 = vsub.f32 %v3823_v35, %v3827_v46 }
0x1f48   :  { %v3830_v48 = vpop.xlane.xlu0 %3829 }
0x1f49   :  { %v3833_v49 = vmul.f32 1.442695, %v3831_v47  ;;  %v3832_v52 = vsub.f32 %v3824_v39, %v3830_v48 }
0x1f4b   :  { %5924 = vpow2.f32 %v3833_v49  ;;  %v3835_v55 = vmul.f32 1.442695, %v3832_v52 }
0x1f4d   :  { %5926 = vpow2.f32 %v3835_v55 }
0x1f55   :  { %v5925_v56 = vpop.eup %5924 }
0x1f56   :  { %v3837_v59 = vsel %vm449_vm4, %v5925_v56, 0.0 }
0x1f57   :  { %v5927_v60 = vpop.eup %5926  ;;  %3838 = vadd.xlane.f32.xlu1 %v3837_v59 }
0x1f58   :  { %v3840_v61 = vsel %vm449_vm4, %v5927_v60, 0.0 }
0x1f59   :  { %3841 = vadd.xlane.f32.xlu0 %v3840_v61  ;;  %v5848_v61 = vld [vmem:[%s6907_s12 + $0x10] sm:$0xff]  }
0x1fe4   :  { %v3839_v62 = vpop.xlane.xlu1 %3838 }
0x1fe5   :  { %5928 = vrcp.f32 %v3839_v62  ;;  %v5849_v62 = vld [vmem:[%s6907_s12 + $0x20] sm:$0xff]  }
0x1fe6   :  { %v3842_v63 = vpop.xlane.xlu0 %3841 }
0x1fe7   :  { %5930 = vrcp.f32 %v3842_v63  ;;  %v5850_v63 = vld [vmem:[%s6907_s12 + $0x18] sm:$0xff]  }
0x1fef   :  { %v5929_v0 = vpop.eup %5928 }
0x1ff0   :  { %v3845_v3 = vmul.f32 %v5929_v0, %v5925_v56  ;;  %v5851_v0 = vld [vmem:[%s6907_s12 + $0x28] sm:$0xff]  }
0x1ff1   :  { %v5931_v7 = vpop.eup %5930 }
0x1ff2   :  { %v3847_v11 = vpack.c.bf16 %v3845_v3, %v3845_v3  ;;  %v3846_v12 = vmul.f32 %v5931_v7, %v5927_v60 }
0x1ff4   :  { %v3848_v19 = vpack.c.bf16 %v3846_v12, %v3846_v12  ;;  %5686 = vmatmul.mubr.msk.bf16.vlgmr.msra.gmra.mrb[132].mxu0 %vm449_vm4, %v3847_v11  ;;  %v4182_v11 = vrot.slane %v6744_v20, %v2217_v50 }
0x1ff5   :  { %5696 = vmatpush3.bf16.msra.mxu0 %v3950_v13  ;;  %5697 = vmatprep.mubr.msk.bf16.mxu0 %vm5965_vm1, %v5964_v2 }
0x1ff6   :  { %5692 = vmatmul.mubr.msk.bf16.vlgmr.msra.gmra.mrb[128].mxu1 %vm449_vm4, %v3848_v19  ;;  %5709 = vmatprep.subr.bf16.mxu0 %v5964_v2 }
0x1ff7   :  { %5705 = vmatprep.mubr.msk.bf16.mxu1 %vm5965_vm1, %v5964_v2  ;;  %5702 = vmatpush3.bf16.msra.mxu1 %v5842_v27 }
0x1ff8   :  { %5703 = vmatprep.subr.bf16.mxu1 %v5964_v2 }
0x1ffb   :  { %5704 = vmatpush3.bf16.msra.mxu1 %v5843_v18 }
0x1ffc   :  { %5721 = vmatprep.subr.bf16.mxu1 %v5964_v2 }
0x20c7   :  { %v3891_v51 = vpop.f32.mrb[132].mxu0 }
0x20c8   :  { %v5687_v54 = vpop.f32.mrb[133].mxu0 }
0x20c9   :  { %v3894_v25 = vpop.f32.mrb[134].mxu0  ;;  %v3937_v5 = vpop.f32.mrb[128].mxu1 }
0x20ca   :  { %v3943_v17 = vpack.c.bf16 %v3937_v5, %v3891_v51  ;;  %v5688_v23 = vpop.f32.mrb[135].mxu0  ;;  %v5693_v26 = vpop.f32.mrb[129].mxu1  ;;  %v4188_v51 = vrot.slane %v6744_v20, %v2223_v57 }
0x20cb   :  { %v3940_v15 = vpop.f32.mrb[130].mxu1 }
0x20cc   :  { %v5694_v8 = vpop.f32.mrb[131].mxu1  ;;  %5698 = vmatmul.mubr.msk.bf16.vlgmr.msra.gmra.mrb[136].mxu0 %vm449_vm4, %v3943_v17 }
0x20cd   :  { %5717 = vmatprep.mubr.msk.bf16.mxu0 %vm5965_vm1, %v5964_v2  ;;  %5710 = vmatpush3.bf16.msra.mxu0 %v5844_v10 }
0x20ce   :  { %5711 = vmatprep.subr.bf16.mxu0 %v5964_v2 }
0x20d1   :  { %5712 = vmatpush3.bf16.msra.mxu0 %v5845_v16 }
0x20d2   :  { %5713 = vmatprep.subr.bf16.mxu0 %v5964_v2 }
0x219f   :  { %v3986_v21 = vpop.f32.mrb[136].mxu0 }
0x21a0   :  { %v3993_v24 = vadd.f32 %v3986_v21, %v6696_v22  ;;  %v5699_v29 = vpop.f32.mrb[137].mxu0 }
0x21a1   :  { %v3989_v53 = vpop.f32.mrb[138].mxu0 }
0x21a2   :  { %v3995_v58 = vadd.f32 %v3993_v24, %v6450_v4  ;;  %v3994_v30 = vadd.f32 %v3989_v53, %v6699_v14  ;;  %v5700_v31 = vpop.f32.mrb[139].mxu0  ;;  %v5846_v4 = vld [vmem:[%s6905_s10 + $0x30] sm:$0xff]   ;;  %v4971_v14 = vld [vmem:[%s6904_s9 + $0x1] ss:$0 sm:$0xff] }
0x21a3   :  { %5714 = vmatpush3.bf16.msra.mxu0 %v5846_v4 }
0x21a4   :  { %v4003_v32 = vmul.f32 %v4002_v28, %v3995_v58  ;;  %v3996_v34 = vadd.f32 %v3994_v30, %v6452_v6  ;;  %5715 = vmatprep.subr.bf16.mxu0 %v5964_v2  ;;  %v5847_v6 = vld [vmem:[%s6905_s10 + $0x38] sm:$0xff]  }
0x21a6   :  { %v4004_v35 = vmul.f32 %v4002_v28, %v3996_v34  ;;  %v4009_v22 = vadd.f32 %v4008_v33, %v4003_v32 }
0x21a7   :  { %5716 = vmatpush3.bf16.msra.mxu0 %v5847_v6 }
0x21a8   :  { %v4010_v36 = vadd.f32 %v4008_v33, %v4004_v35  ;;  %5737 = vmatprep.subr.bf16.mxu0 %v5964_v2 }
0x21aa   :  { %v4011_v37 = vpack.c.bf16 %v4010_v36, %v4009_v22 }
0x21ac   :  { %5706 = vmatmul.mubr.msk.bf16.vlgmr.msra.gmra.mrb[132].mxu1 %vm286_vm3, %v4011_v37  ;;  %v5852_v37 = vld [vmem:[%s6907_s12] sm:$0xff]  }
0x21ad   :  { %5725 = vmatprep.mubr.msk.bf16.mxu1 %vm5965_vm1, %v5964_v2  ;;  %5722 = vmatpush3.bf16.msra.mxu1 %v5848_v61  ;;  %v5857_v61 = vld [vmem:[%s6907_s12 + $0x60] sm:$0xff]  }
0x21ae   :  { %5723 = vmatprep.subr.bf16.mxu1 %v5964_v2 }
0x21b1   :  { %5724 = vmatpush3.bf16.msra.mxu1 %v5850_v63  ;;  %v5858_v63 = vld [vmem:[%s6907_s12 + $0x38] sm:$0xff]  }
0x21b2   :  { %5729 = vmatprep.subr.bf16.mxu1 %v5964_v2 }
0x227f   :  { %v4074_v38 = vpop.f32.mrb[132].mxu1 }
0x2280   :  { %v4075_v39 = vadd.f32 %v4971_v14, %v4074_v38  ;;  %v5707_v40 = vpop.f32.mrb[133].mxu1 }
0x2281   :  { %v4077_v41 = vpop.f32.mrb[134].mxu1 }
0x2282   :  { %v4083_v42 = vmul.f32 0.70710677, %v4075_v39  ;;  %v4078_v43 = vadd.f32 %v4971_v14, %v4077_v41  ;;  %v5708_v44 = vpop.f32.mrb[135].mxu1  ;;  %v4081_v49 = vmul.f32 0.5, %v4075_v39  ;;  %v5853_v41 = vld [vmem:[%s6907_s12 + $0x40] sm:$0xff]  }
0x2284   :  { %5932 = verf.f32 %v4083_v42  ;;  %v4084_v45 = vmul.f32 0.70710677, %v4078_v43  ;;  %v4082_v52 = vmul.f32 0.5, %v4078_v43 }
0x2286   :  { %5934 = verf.f32 %v4084_v45 }
0x228e   :  { %v5933_v46 = vpop.eup %5932 }
0x228f   :  { %v4087_v47 = vadd.f32 1.0, %v5933_v46 }
0x2290   :  { %v5935_v48 = vpop.eup %5934 }
0x2291   :  { %v4088_v55 = vadd.f32 1.0, %v5935_v48  ;;  %v4089_v56 = vmul.f32 %v4087_v47, %v4081_v49  ;;  %v5854_v48 = vld [vmem:[%s6907_s12 + $0x8] sm:$0xff]  }
0x2293   :  { %v4090_v59 = vmul.f32 %v4088_v55, %v4082_v52 }
0x2295   :  { %v4091_v60 = vpack.c.bf16 %v4090_v59, %v4089_v56  ;;  %v5855_v56 = vld [vmem:[%s6907_s12 + $0x48] sm:$0xff]   ;;  %v5856_v59 = vld [vmem:[%s6907_s12 + $0x30] sm:$0xff]  }
0x2297   :  { %5718 = vmatmul.mubr.msk.bf16.vlgmr.msra.gmra.mrb[140].mxu0 %vm2168_vm5, %v4091_v60 }
0x2298   :  { %5741 = vmatprep.mubr.msk.bf16.mxu0 %vm5965_vm1, %v5964_v2  ;;  %5738 = vmatpush3.bf16.msra.mxu0 %v5849_v62 }
0x2299   :  { %5739 = vmatprep.subr.bf16.mxu0 %v5964_v2 }
0x229c   :  { %5740 = vmatpush3.bf16.msra.mxu0 %v5851_v0  ;;  %v5859_v0 = vld [vmem:[%s6907_s12 + $0x68] sm:$0xff]  }
0x229d   :  { %5753 = vmatprep.subr.bf16.mxu0 %v5964_v2 }
0x236a   :  { %v4170_v3 = vpop.f32.mrb[140].mxu0 }
0x236b   :  { %v4171_v7 = vadd.f32 %v4984_v1, %v4170_v3  ;;  %v5719_v12 = vpop.f32.mrb[141].mxu0 }
0x236c   :  { %v4173_v13 = vpop.f32.mrb[142].mxu0  ;;  %v5862_v12 = vld [vmem:[%s6907_s12 + $0x70] sm:$0xff]  }
0x236d   :  { %v4177_v19 = vadd.f32 %v4171_v7, %v4009_v22  ;;  %v4174_v54 = vadd.f32 %v4984_v1, %v4173_v13  ;;  %v5720_v25 = vpop.f32.mrb[143].mxu0  ;;  %v5860_v1 = vld [vmem:[%s6907_s12 + $0x50] sm:$0xff]  }
0x236f   :  { %v4183_v5 = vmul.f32 %v4182_v11, %v4177_v19  ;;  %v4178_v17 = vadd.f32 %v4174_v54, %v4010_v36  ;;  %v5863_v19 = vld [vmem:[%s6907_s12 + $0x78] sm:$0xff]  }
0x2371   :  { %v4189_v23 = vadd.f32 %v4188_v51, %v4183_v5  ;;  %v4184_v26 = vmul.f32 %v4182_v11, %v4178_v17  ;;  %v5861_v11 = vld [vmem:[%s6907_s12 + $0x58] sm:$0xff]  }
0x2373   :  { %v4193_v15 = vmul.f32 0.70710677, %v4189_v23  ;;  %v4190_v8 = vadd.f32 %v4188_v51, %v4184_v26  ;;  %v4191_v50 = vmul.f32 0.5, %v4189_v23 }
0x2375   :  { %5936 = verf.f32 %v4193_v15  ;;  %v4194_v27 = vmul.f32 0.70710677, %v4190_v8  ;;  %v4192_v29 = vmul.f32 0.5, %v4190_v8 }
0x2377   :  { %5938 = verf.f32 %v4194_v27 }
0x237f   :  { %v5937_v18 = vpop.eup %5936 }
0x2380   :  { %v4197_v21 = vadd.f32 1.0, %v5937_v18 }
0x2381   :  { %v5939_v24 = vpop.eup %5938 }
0x2382   :  { %v4199_v28 = vmul.f32 %v4197_v21, %v4191_v50  ;;  %v4198_v9 = vadd.f32 1.0, %v5939_v24 }
0x2384   :  { %v4201_v53 = vpack.c.bf16 %v4199_v28, %v4199_v28  ;;  %v4200_v57 = vmul.f32 %v4198_v9, %v4192_v29 }
0x2386   :  { %v4214_v20 = vunpack.c.l.b16 %v4201_v53  ;;  %v4202_v58 = vpack.c.bf16 %v4200_v57, %v4200_v57 }
0x2388   :  { %v4215_v30 = vunpack.c.l.b16 %v4202_v58  ;;  %v4216_v31 = vrot.slane %v4214_v20, 1  ;;  %v4338_v32 = vrot.slane %v4214_v20, 2  ;;  %v4468_v33 = vrot.slane %v4214_v20, 4 }
0x2389   :  { %v4403_v34 = vrot.slane %v4214_v20, 3  ;;  %v4598_v35 = vrot.slane %v4214_v20, 6  ;;  %v4533_v22 = vrot.slane %v4214_v20, 5  ;;  %v4663_v47 = vrot.slane %v4214_v20, 7 }
0x238a   :  { %v4218_v36 = vsel %vm4217_vm6, %v4215_v30, %v4216_v31  ;;  %v4339_v10 = vrot.slane %v4215_v30, 1  ;;  %v4275_v16 = vrot.slane %v4215_v30, 7  ;;  %v4469_v4 = vrot.slane %v4215_v30, 3 }
0x238b   :  { %v4219_v6 = vpack.c.b16 %v4218_v36, %v4218_v36  ;;  %v4404_v14 = vrot.slane %v4215_v30, 2  ;;  %v4599_v38 = vrot.slane %v4215_v30, 5  ;;  %v4534_v39 = vrot.slane %v4215_v30, 4 }
0x238c   :  { %v4340_v40 = vsel %vm4217_vm6, %v4339_v10, %v4338_v32  ;;  %v4276_v42 = vsel %vm4217_vm6, %v4275_v16, %v4214_v20  ;;  %v4470_v43 = vsel %vm4217_vm6, %v4469_v4, %v4468_v33  ;;  %v4664_v44 = vrot.slane %v4215_v30, 6 }
0x238d   :  { %5726 = vmatmul.mubr.msk.bf16.vlgmr.msra.gmra.mrb[136].mxu1 %vm286_vm3, %v4219_v6  ;;  %v4341_v45 = vpack.c.b16 %v4340_v40, %v4340_v40  ;;  %v4405_v46 = vsel %vm4217_vm6, %v4404_v14, %v4403_v34  ;;  %v4600_v49 = vsel %vm4217_vm6, %v4599_v38, %v4598_v35  ;;  %v4535_v52 = vsel %vm4217_vm6, %v4534_v39, %v4533_v22  ;;  %v5042_v38 = vld [vmem:[%s6908_s13] ss:$0 sm:$0xff] }
0x238e   :  { %5730 = vmatpush3.bf16.msra.mxu1 %v5852_v37  ;;  %5733 = vmatprep.mubr.msk.bf16.mxu1 %vm5965_vm1, %v5964_v2  ;;  %v4665_v55 = vsel %vm4217_vm6, %v4664_v44, %v4663_v47  ;;  %v4277_v60 = vpack.c.b16 %v4276_v42, %v4276_v42  ;;  %v4471_v62 = vpack.c.b16 %v4470_v43, %v4470_v43 }
0x238f   :  { %5742 = vmatmul.mubr.msk.bf16.vlgmr.msra.gmra.mrb[144].mxu0 %vm286_vm3, %v4341_v45  ;;  %5731 = vmatprep.subr.bf16.mxu1 %v5964_v2  ;;  %v4406_v3 = vpack.c.b16 %v4405_v46, %v4405_v46  ;;  %v4601_v7 = vpack.c.b16 %v4600_v49, %v4600_v49  ;;  %v4536_v13 = vpack.c.b16 %v4535_v52, %v4535_v52 }
0x2390   :  { %5754 = vmatpush3.bf16.msra.mxu0 %v5853_v41  ;;  %5757 = vmatprep.mubr.msk.bf16.mxu0 %vm5965_vm1, %v5964_v2  ;;  %v4666_v51 = vpack.c.b16 %v4665_v55, %v4665_v55 }
0x2391   :  { %5755 = vmatprep.subr.bf16.mxu0 %v5964_v2 }
0x2392   :  { %5732 = vmatpush3.bf16.msra.mxu1 %v5854_v48 }
0x2393   :  { %5745 = vmatprep.subr.bf16.mxu1 %v5964_v2 }
0x2394   :  { %5756 = vmatpush3.bf16.msra.mxu0 %v5855_v56 }
0x2395   :  { %5734 = vmatmul.mubr.msk.bf16.vlgmr.msra.gmra.mrb[140].mxu1 %vm286_vm3, %v4277_v60  ;;  %5769 = vmatprep.subr.bf16.mxu0 %v5964_v2 }
0x2396   :  { %5746 = vmatpush3.bf16.msra.mxu1 %v5856_v59  ;;  %5749 = vmatprep.mubr.msk.bf16.mxu1 %vm5965_vm1, %v5964_v2 }
0x2397   :  { %5758 = vmatmul.mubr.msk.bf16.vlgmr.msra.gmra.mrb[148].mxu0 %vm286_vm3, %v4471_v62  ;;  %5747 = vmatprep.subr.bf16.mxu1 %v5964_v2 }
0x2398   :  { %5770 = vmatpush3.bf16.msra.mxu0 %v5857_v61  ;;  %5773 = vmatprep.mubr.msk.bf16.mxu0 %vm5965_vm1, %v5964_v2 }
0x2399   :  { %5771 = vmatprep.subr.bf16.mxu0 %v5964_v2 }
0x239a   :  { %5748 = vmatpush3.bf16.msra.mxu1 %v5858_v63 }
0x239b   :  { %5761 = vmatprep.subr.bf16.mxu1 %v5964_v2 }
0x239c   :  { %5772 = vmatpush3.bf16.msra.mxu0 %v5859_v0 }
0x239d   :  { %5750 = vmatmul.mubr.msk.bf16.vlgmr.msra.gmra.mrb[144].mxu1 %vm286_vm3, %v4406_v3 }
0x239e   :  { %5762 = vmatpush3.bf16.msra.mxu1 %v5860_v1  ;;  %5765 = vmatprep.mubr.msk.bf16.mxu1 %vm5965_vm1, %v5964_v2 }
0x239f   :  { %5774 = vmatmul.mubr.msk.bf16.vlgmr.msra.gmra.mrb[152].mxu0 %vm286_vm3, %v4601_v7  ;;  %5763 = vmatprep.subr.bf16.mxu1 %v5964_v2 }
0x23a2   :  { %5764 = vmatpush3.bf16.msra.mxu1 %v5861_v11 }
0x23a3   :  { %5777 = vmatprep.subr.bf16.mxu1 %v5964_v2 }
0x23a5   :  { %5766 = vmatmul.mubr.msk.bf16.vlgmr.msra.gmra.mrb[148].mxu1 %vm286_vm3, %v4536_v13 }
0x23a6   :  { %5778 = vmatpush3.bf16.msra.mxu1 %v5862_v12  ;;  %5781 = vmatprep.mubr.msk.bf16.mxu1 %vm5965_vm1, %v5964_v2 }
0x23a7   :  { %5779 = vmatprep.subr.bf16.mxu1 %v5964_v2 }
0x23aa   :  { %5780 = vmatpush3.bf16.msra.mxu1 %v5863_v19 }
0x23ad   :  { %5782 = vmatmul.mubr.msk.bf16.vlgmr.msra.gmra.mrb[152].mxu1 %vm286_vm3, %v4666_v51 }
0x2460   :  { %v4269_v54 = vpop.f32.mrb[136].mxu1 }
0x2461   :  { %v5727_v25 = vpop.f32.mrb[137].mxu1 }
0x2462   :  { %v4272_v5 = vpop.f32.mrb[138].mxu1  ;;  %v4391_v17 = vpop.f32.mrb[144].mxu0 }
0x2463   :  { %v5728_v23 = vpop.f32.mrb[139].mxu1  ;;  %v5743_v26 = vpop.f32.mrb[145].mxu0 }
0x2464   :  { %v4394_v15 = vpop.f32.mrb[146].mxu0 }
0x2465   :  { %v5744_v8 = vpop.f32.mrb[147].mxu0 }
0x2468   :  { %v4327_v27 = vpop.f32.mrb[140].mxu1 }
0x2469   :  { %v4328_v18 = vadd.f32 %v4327_v27, %v4269_v54  ;;  %v5735_v50 = vpop.f32.mrb[141].mxu1 }
0x246a   :  { %v4330_v21 = vpop.f32.mrb[142].mxu1  ;;  %v4521_v24 = vpop.f32.mrb[148].mxu0 }
0x246b   :  { %v5736_v28 = vpop.f32.mrb[143].mxu1  ;;  %v5759_v29 = vpop.f32.mrb[149].mxu0  ;;  %v4397_v2 = vadd.f32 %v4391_v17, %v4328_v18 }
0x246c   :  { %v4524_v9 = vpop.f32.mrb[150].mxu0 }
0x246d   :  { %v5760_v53 = vpop.f32.mrb[151].mxu0 }
0x2470   :  { %v4456_v57 = vpop.f32.mrb[144].mxu1 }
0x2471   :  { %v4462_v20 = vadd.f32 %v4456_v57, %v4397_v2  ;;  %v5751_v58 = vpop.f32.mrb[145].mxu1 }
0x2472   :  { %v4459_v30 = vpop.f32.mrb[146].mxu1  ;;  %v4651_v31 = vpop.f32.mrb[152].mxu0 }
0x2473   :  { %v5752_v32 = vpop.f32.mrb[147].mxu1  ;;  %v5775_v33 = vpop.f32.mrb[153].mxu0  ;;  %v4527_v34 = vadd.f32 %v4521_v24, %v4462_v20 }
0x2474   :  { %v4654_v35 = vpop.f32.mrb[154].mxu0 }
0x2475   :  { %v5776_v22 = vpop.f32.mrb[155].mxu0 }
0x2478   :  { %v4586_v36 = vpop.f32.mrb[148].mxu1 }
0x2479   :  { %v4592_v37 = vadd.f32 %v4586_v36, %v4527_v34  ;;  %v5767_v10 = vpop.f32.mrb[149].mxu1 }
0x247a   :  { %v4589_v16 = vpop.f32.mrb[150].mxu1 }
0x247b   :  { %v5768_v4 = vpop.f32.mrb[151].mxu1  ;;  %v4657_v6 = vadd.f32 %v4651_v31, %v4592_v37 }
0x2480   :  { %v4716_v14 = vpop.f32.mrb[152].mxu1 }
0x2481   :  { %v4722_v39 = vadd.f32 %v4716_v14, %v4657_v6  ;;  %v5783_v40 = vpop.f32.mrb[153].mxu1 }
0x2482   :  { %v4719_v41 = vpop.f32.mrb[154].mxu1 }
0x2483   :  { %v4730_v42 = vadd.f32 %v5042_v38, %v4722_v39  ;;  %v5784_v43 = vpop.f32.mrb[155].mxu1 }
0x2485   :  { %4732 = vst.msk [vmem:[#allocation2] sm:$0x3] %vm4731_vm7, %v4730_v42 }
0x2486   :  { %5951 = shalt.err (!%p5948_p4)
}
0x2487   :  { %s5952_s13 = scalar_lea.hbm %s6909_s14, 32 }
0x2488   :  { %p5953_p5 = scmp.ne.s32.totalorder %s6909_s14, %s5952_s13  ;;  %p5956_p6 = scmp.lt.u32.totalorder %s5952_s13, %s6909_s14 }
0x248a   :  { %p5958_p7 = pnand %p5956_p6, %p5953_p5 }
0x248c   :  { %5961 = shalt.err (!%p5958_p7)
}
0x248d   :  { %4742 = dma.vmem_to_hbm [thread:$0]  %s4740_s29, 32, %s6909_s14, [#allocation3]  }
0x248e   :  { %5962 = dma.done.wait [#allocation3], 32  }
0x248f   :  { %5963 = vsyncadd [#allocation3], 4294967264 }
0x2490   :  { %4746 = vsyncpa [#allocation3], 1 }

</bundles_post_ra>
